<compile_context>
chip_gen: v5e
topology: v5e:2x2
jax: 0.10.0
libtpu: 0.0.40
codegen_flags: <defaults>
</compile_context>

<pallas_src>
import functools

import jax
import jax.numpy as jnp
from jax.experimental import pallas as pl
from jax.experimental.pallas import tpu as pltpu


def _round_up(v, m):
    return ((v + m - 1) // m) * m


def _device_kind():
    try:
        return jax.devices()[0].device_kind.lower()
    except Exception:
        return ""


def fused_gin5_kernel(a_ref, x_hbm_ref, w1_ref, b1_ref, w2_ref, b2_ref,
                      o_ref, h0_ref, dma_sem, *, row_tile, a_resident):
    """Fused 5-layer GIN. grid = (num_layers, num_row_tiles).

    a_ref     : bf16 A' = A + (1+eps)*I; either the full (N_pad, N_pad) matrix
                (VMEM-resident, a_resident=True) or a streamed (row_tile, N_pad) tile.
    x_hbm_ref : (N_pad, F_pad) bf16 padded features, raw HBM ref (pl.ANY).
    w1/b1/w2/b2 : per-layer stacked MLP params (weights bf16, biases f32),
                selected by the layer grid axis.
    o_ref     : (N_pad, F_pad) bf16 output block, resident across the whole grid;
                doubles as the even-layer activation buffer.
    h0_ref    : (N_pad, F_pad) bf16 VMEM scratch, odd-layer activation buffer.
    dma_sem   : DMA semaphore for the one-time x -> h0 copy.
    """
    l = pl.program_id(0)
    r = pl.program_id(1)
    last = pl.num_programs(0) - 1
    row0 = pl.multiple_of(r * row_tile, row_tile)

    # Load the (bf16) input features into the layer-0 activation buffer exactly once.
    @pl.when(jnp.logical_and(l == 0, r == 0))
    def _():
        cp = pltpu.make_async_copy(x_hbm_ref, h0_ref, dma_sem)
        cp.start()
        cp.wait()

    def a_tile():
        if a_resident:
            return a_ref[pl.ds(row0, row_tile), :]
        return a_ref[...]

    def layer_body(h_src_ref, h_dst_ref):
        # Aggregation: bf16 x bf16 -> f32 accumulate on the MXU (no f32 up-cast of A).
        agg = jnp.dot(a_tile(), h_src_ref[...],
                      preferred_element_type=jnp.float32)          # [tm, F_pad] f32
        # MLP: Linear -> ReLU -> Linear, bf16 operands, f32 accumulation, f32 biases.
        hid = jnp.dot(agg.astype(jnp.bfloat16), w1_ref[0],
                      preferred_element_type=jnp.float32) + b1_ref[0]
        hid = jnp.maximum(hid, 0.0)
        out = jnp.dot(hid.astype(jnp.bfloat16), w2_ref[0],
                      preferred_element_type=jnp.float32) + b2_ref[0]

        @pl.when(l < last)
        def _():
            # Inter-layer ReLU; next layer reads from h_dst.
            h_dst_ref[pl.ds(row0, row_tile), :] = (
                jnp.maximum(out, 0.0).astype(h_dst_ref.dtype))

        @pl.when(l == last)
        def _():
            # Final layer (even) -> lands in o_ref, no activation.
            h_dst_ref[pl.ds(row0, row_tile), :] = out.astype(h_dst_ref.dtype)

    even = (l % 2) == 0

    @pl.when(even)
    def _():
        layer_body(h0_ref, o_ref)      # layers 0, 2, 4 (final write -> o_ref)

    @pl.when(jnp.logical_not(even))
    def _():
        layer_body(o_ref, h0_ref)      # layers 1, 3


def edge_index_to_dense_adj(edge_index, num_nodes, num_nodes_pad, *, eps=0.0):
    """A'[dst, src] = #edges(src->dst) + (1+eps)*I (real nodes only), stored bf16."""
    src = edge_index[0]
    dst = edge_index[1]
    a = jnp.zeros((num_nodes_pad, num_nodes_pad), jnp.float32)
    a = a.at[dst, src].add(1.0)
    diag = (1.0 + eps) * (jnp.arange(num_nodes_pad) < num_nodes).astype(jnp.float32)
    a = a + jnp.diag(diag)
    # Edge multiplicities (+1) are small integers -> exact in bf16.
    return a.astype(jnp.bfloat16)


def pack_params(params, f_pad):
    """Stack per-layer MLP params lane-dense: weights bf16, biases f32."""
    n_layers = len(params)
    w1 = jnp.zeros((n_layers, f_pad, f_pad), jnp.bfloat16)
    b1 = jnp.zeros((n_layers, 1, f_pad), jnp.float32)
    w2 = jnp.zeros((n_layers, f_pad, f_pad), jnp.bfloat16)
    b2 = jnp.zeros((n_layers, 1, f_pad), jnp.float32)
    for i, p in enumerate(params):
        din, dhid = p["w1"].shape
        dout = p["w2"].shape[1]
        w1 = w1.at[i, :din, :dhid].set(p["w1"].astype(jnp.bfloat16))
        b1 = b1.at[i, 0, :dhid].set(p["b1"])
        w2 = w2.at[i, :dhid, :dout].set(p["w2"].astype(jnp.bfloat16))
        b2 = b2.at[i, 0, :dout].set(p["b2"])
    return w1, b1, w2, b2


def gin_classifier_5_layer(x, edge_index, params, *, eps=0.0, row_tile=None):
    n, in_dim = x.shape
    hidden_dim = params[0]["w1"].shape[1]
    out_dim = params[-1]["w2"].shape[1]
    n_layers = len(params)
    # o_ref/h0 ping-pong relies on an odd layer count (final write lands in o_ref).
    assert n_layers % 2 == 1, "fused kernel assumes an odd number of GIN layers"

    kind = _device_kind()
    is_v7 = "v7" in kind
    is_v5e = ("v5e" in kind) or ("v5 lite" in kind) or ("v5lite" in kind)
    if row_tile is None:
        # v5e MXU is 128x128 -> M=128 already fills it; v6e/v7x MXU is 256 wide.
        row_tile = 128 if is_v5e else 256
    vmem_cap = (56 << 20) if is_v7 else (100 << 20)

    # Lane-dense padded sizes.
    f_pad = _round_up(max(in_dim, hidden_dim, out_dim, 128), 128)
    n_pad = _round_up(max(n, row_tile), row_tile)
    num_row_tiles = n_pad // row_tile

    # VMEM budget (conservative: count pipelined operands double-buffered).
    o_bytes = n_pad * f_pad * 2                                  # bf16 output (resident)
    h0_bytes = n_pad * f_pad * 2                                 # bf16 scratch
    w_bytes = 2 * (f_pad * f_pad * 2) + 2 * (f_pad * 4)          # one layer w1+w2(bf16)+b1+b2(f32)
    a_res_bytes = n_pad * n_pad * 2
    a_stream_bytes = row_tile * n_pad * 2
    fixed = 2 * o_bytes + h0_bytes + 2 * w_bytes
    a_resident = fixed + 2 * a_res_bytes + (2 << 20) <= vmem_cap
    a_bytes = a_res_bytes if a_resident else a_stream_bytes
    vmem_limit = int(min(vmem_cap, max(fixed + 2 * a_bytes + (4 << 20), 32 << 20)))

    a = edge_index_to_dense_adj(edge_index, n, n_pad, eps=eps)
    x_pad = jnp.zeros((n_pad, f_pad), jnp.bfloat16).at[:n, :in_dim].set(
        x.astype(jnp.bfloat16))
    w1, b1, w2, b2 = pack_params(params, f_pad)

    if a_resident:
        # Whole A' DMA'd once and kept resident -> no per-layer HBM re-stream.
        a_spec = pl.BlockSpec((n_pad, n_pad), lambda l, r: (0, 0))
    else:
        # Streamed row tiles (re-read each layer). If the A DMA shows up exposed in a
        # profile, add pipeline_mode=pl.Buffered(3) here.
        a_spec = pl.BlockSpec((row_tile, n_pad), lambda l, r: (r, 0))

    kern = functools.partial(fused_gin5_kernel, row_tile=row_tile,
                             a_resident=a_resident)

    out_pad = pl.pallas_call(
        kern,
        out_shape=jax.ShapeDtypeStruct((n_pad, f_pad), jnp.bfloat16),
        grid_spec=pltpu.PrefetchScalarGridSpec(
            num_scalar_prefetch=0,
            grid=(n_layers, num_row_tiles),
            in_specs=[
                a_spec,
                # x stays in HBM; copied into h0 once at (l==0, r==0).
                pl.BlockSpec(memory_space=pl.ANY),
                # Per-layer weights/biases: selected by the layer axis, constant
                # over the row axis -> DMA'd once per layer.
                pl.BlockSpec((1, f_pad, f_pad), lambda l, r: (l, 0, 0)),
                pl.BlockSpec((1, 1, f_pad), lambda l, r: (l, 0, 0)),
                pl.BlockSpec((1, f_pad, f_pad), lambda l, r: (l, 0, 0)),
                pl.BlockSpec((1, 1, f_pad), lambda l, r: (l, 0, 0)),
            ],
            # Output block resident across the whole grid; also serves as the
            # even-layer activation buffer.
            out_specs=pl.BlockSpec((n_pad, f_pad), lambda l, r: (0, 0)),
            scratch_shapes=[
                pltpu.VMEM((n_pad, f_pad), jnp.bfloat16),   # h0 (odd-layer buffer)
                pltpu.SemaphoreType.DMA,                    # x -> h0 copy
            ],
        ),
        compiler_params=pltpu.CompilerParams(
            # Layer axis is strictly sequential; row tiles share the resident
            # o_ref/h0 buffers -> keep both "arbitrary" (single core).
            dimension_semantics=("arbitrary", "arbitrary"),
            vmem_limit_bytes=vmem_limit,
        ),
    )(a, x_pad, w1, b1, w2, b2)

    return out_pad[:n, :out_dim].astype(jnp.float32)


def init_gin_params(key, in_dim, out_dim):
    """Deterministic params for GINConv's MLP: Linear(in,out) -> ReLU -> Linear(out,out)."""
    k1, k2, k3, k4 = jax.random.split(key, 4)
    w1 = jax.random.normal(k1, (in_dim, out_dim), jnp.float32) * (1.0 / jnp.sqrt(in_dim))
    b1 = jax.random.normal(k2, (out_dim,), jnp.float32) * 0.01
    w2 = jax.random.normal(k3, (out_dim, out_dim), jnp.float32) * (1.0 / jnp.sqrt(out_dim))
    b2 = jax.random.normal(k4, (out_dim,), jnp.float32) * 0.01
    return dict(w1=w1, b1=b1, w2=w2, b2=b2)


def gin_classifier_5_layer_ref(x, edge_index, params, *, eps=0.0):
    """Pure-JAX f32 reference for correctness checking."""
    n = x.shape[0]
    src, dst = edge_index[0], edge_index[1]
    a = jnp.zeros((n, n), jnp.float32).at[dst, src].add(1.0)
    h = x
    for i, p in enumerate(params):
        agg = a @ h + (1.0 + eps) * h
        hid = jnp.maximum(agg @ p["w1"] + p["b1"], 0.0)
        h = hid @ p["w2"] + p["b2"]
        if i != len(params) - 1:
            h = jnp.maximum(h, 0.0)
    return h


if __name__ == "__main__":
    # Small synthetic graph.
    N = 64            # nodes
    E = 128           # directed edges
    INPUT_DIM = 16
    HIDDEN_DIM = 256  # module default hidden width
    OUTPUT_DIM = 8

    key = jax.random.PRNGKey(0)
    kx, ke, kp = jax.random.split(key, 3)

    x = jax.random.normal(kx, (N, INPUT_DIM), jnp.float32)
    edge_index = jax.random.randint(ke, (2, E), 0, N, dtype=jnp.int32)

    # 5 GIN layers: in->hid, hid->hid, hid->hid, hid->hid, hid->out
    dims = [(INPUT_DIM, HIDDEN_DIM), (HIDDEN_DIM, HIDDEN_DIM),
            (HIDDEN_DIM, HIDDEN_DIM), (HIDDEN_DIM, HIDDEN_DIM),
            (HIDDEN_DIM, OUTPUT_DIM)]
    layer_keys = jax.random.split(kp, len(dims))
    params = [init_gin_params(k, din, dout) for k, (din, dout) in zip(layer_keys, dims)]

    out = gin_classifier_5_layer(x, edge_index, params)
    out = jax.block_until_ready(out)

    ref = gin_classifier_5_layer_ref(x, edge_index, params)
    assert out.shape == (N, OUTPUT_DIM)
    # bf16 weights/activations (per perf review) -> relative-error criterion vs the
    # pure-f32 reference instead of tight elementwise allclose.
    rel_err = float(jnp.max(jnp.abs(out - ref)) / (jnp.max(jnp.abs(ref)) + 1e-6))
    assert rel_err < 8e-2, f"mismatch vs reference: rel err {rel_err}"

    print("KERNEL_OK")
</pallas_src>

<mosaic_0001>
module attributes {stable_mosaic.version = 11 : i64} {
  func.func @fused_gin5_kernel(%arg0: i32, %arg1: i32, %arg2: memref<256x256xbf16, #tpu.memory_space<vmem>>, %arg3: memref<256x256xbf16, #tpu.memory_space<any>>, %arg4: memref<1x256x256xbf16, #tpu.memory_space<vmem>>, %arg5: memref<1x1x256xf32, #tpu.memory_space<vmem>>, %arg6: memref<1x256x256xbf16, #tpu.memory_space<vmem>>, %arg7: memref<1x1x256xf32, #tpu.memory_space<vmem>>, %arg8: memref<256x256xbf16, #tpu.memory_space<vmem>>, %arg9: memref<256x256xbf16, #tpu.memory_space<vmem>>, %arg10: memref<!tpu.dma_semaphore, #tpu.memory_space<semaphore_mem>>) attributes {dimension_semantics = [#tpu.dimension_semantics<arbitrary>, #tpu.dimension_semantics<arbitrary>], iteration_bounds = array<i64: 5, 1>, scalar_prefetch = 0 : i64, scratch_operands = 2 : i64, tpu.core_type = #tpu.core_type<tc>, window_params = [{pipeline_mode = #tpu.pipeline_mode<synchronous>, transform_indices = @transform_0, window_bounds = array<i64: 256, 256>}, {}, {transform_indices = @transform_2, window_bounds = array<i64: 1, 256, 256>}, {transform_indices = @transform_3, window_bounds = array<i64: 1, 1, 256>}, {transform_indices = @transform_4, window_bounds = array<i64: 1, 256, 256>}, {transform_indices = @transform_5, window_bounds = array<i64: 1, 1, 256>}, {pipeline_mode = #tpu.pipeline_mode<synchronous>, transform_indices = @transform_6, window_bounds = array<i64: 256, 256>}]} {
    %c256_i32 = arith.constant 256 : i32
    %0 = arith.muli %arg1, %c256_i32 : i32
    %1 = tpu.assume_multiple %0, 256 : i32
    %c0_i32 = arith.constant 0 : i32
    %2 = arith.cmpi eq, %arg0, %c0_i32 : i32
    %c0_i32_0 = arith.constant 0 : i32
    %3 = arith.cmpi eq, %arg1, %c0_i32_0 : i32
    %4 = arith.andi %2, %3 : i1
    %5 = arith.extui %4 : i1 to i32
    %c0_i32_1 = arith.constant 0 : i32
    %6 = arith.cmpi ne, %5, %c0_i32_1 : i32
    scf.if %6 {
      tpu.enqueue_dma source(%arg3 : memref<256x256xbf16, #tpu.memory_space<any>>) target(%arg9 : memref<256x256xbf16, #tpu.memory_space<vmem>>) target_semaphore(%arg10 : memref<!tpu.dma_semaphore, #tpu.memory_space<semaphore_mem>>)
      tpu.wait_dma2 semaphore(%arg10 : memref<!tpu.dma_semaphore, #tpu.memory_space<semaphore_mem>>) src(%arg3 : memref<256x256xbf16, #tpu.memory_space<any>>) dst(%arg9 : memref<256x256xbf16, #tpu.memory_space<vmem>>)
    } else {
    }
    %c2_i32 = arith.constant 2 : i32
    %c0_i32_2 = arith.constant 0 : i32
    %7 = arith.cmpi eq, %c2_i32, %c0_i32_2 : i32
    %c1_i32 = arith.constant 1 : i32
    %8 = arith.select %7, %c1_i32, %c2_i32 : i32
    %9 = arith.remsi %arg0, %8 : i32
    %c0_i32_3 = arith.constant 0 : i32
    %10 = arith.cmpi ne, %9, %c0_i32_3 : i32
    %c0_i32_4 = arith.constant 0 : i32
    %11 = arith.cmpi slt, %9, %c0_i32_4 : i32
    %c0_i32_5 = arith.constant 0 : i32
    %12 = arith.cmpi slt, %8, %c0_i32_5 : i32
    %13 = arith.xori %11, %12 : i1
    %14 = arith.andi %13, %10 : i1
    %15 = arith.addi %9, %8 : i32
    %16 = arith.select %14, %15, %9 : i32
    %c0_i32_6 = arith.constant 0 : i32
    %17 = arith.cmpi eq, %16, %c0_i32_6 : i32
    %18 = arith.extui %17 : i1 to i32
    %c0_i32_7 = arith.constant 0 : i32
    %19 = arith.cmpi ne, %18, %c0_i32_7 : i32
    scf.if %19 {
      %23 = arith.index_cast %1 : i32 to index
      %c0 = arith.constant 0 : index
      %24 = vector.load %arg2[%23, %c0] : memref<256x256xbf16, #tpu.memory_space<vmem>>, vector<256x256xbf16>
      %c0_9 = arith.constant 0 : index
      %c0_10 = arith.constant 0 : index
      %25 = vector.load %arg9[%c0_9, %c0_10] : memref<256x256xbf16, #tpu.memory_space<vmem>>, vector<256x256xbf16>
      %cst = arith.constant dense<0.000000e+00> : vector<256x256xf32>
      %26 = tpu.matmul %24, %25, %cst {dimension_numbers = #tpu.dot_dimension_numbers<[1], [0], [0], [1], [0, 0, 1, 1], [], []>} : vector<256x256xbf16>, vector<256x256xbf16>, vector<256x256xf32> -> vector<256x256xf32>
      %27 = arith.truncf %26 : vector<256x256xf32> to vector<256x256xbf16>
      %c0_11 = arith.constant 0 : index
      %c0_12 = arith.constant 0 : index
      %c0_13 = arith.constant 0 : index
      %28 = vector.load %arg4[%c0_11, %c0_12, %c0_13] : memref<1x256x256xbf16, #tpu.memory_space<vmem>>, vector<1x256x256xbf16>
      %29 = vector.shape_cast %28 : vector<1x256x256xbf16> to vector<256x256xbf16>
      %cst_14 = arith.constant dense<0.000000e+00> : vector<256x256xf32>
      %30 = tpu.matmul %27, %29, %cst_14 {dimension_numbers = #tpu.dot_dimension_numbers<[1], [0], [0], [1], [0, 0, 1, 1], [], []>} : vector<256x256xbf16>, vector<256x256xbf16>, vector<256x256xf32> -> vector<256x256xf32>
      %c0_15 = arith.constant 0 : index
      %c0_16 = arith.constant 0 : index
      %c0_17 = arith.constant 0 : index
      %31 = vector.load %arg5[%c0_15, %c0_16, %c0_17] : memref<1x1x256xf32, #tpu.memory_space<vmem>>, vector<1x1x256xf32>
      %32 = vector.shape_cast %31 : vector<1x1x256xf32> to vector<1x256xf32>
      %33 = vector.broadcast %32 : vector<1x256xf32> to vector<256x256xf32>
      %34 = arith.addf %30, %33 : vector<256x256xf32>
      %cst_18 = arith.constant 0.000000e+00 : f32
      %35 = vector.broadcast %cst_18 : f32 to vector<256x256xf32>
      %36 = arith.maximumf %34, %35 : vector<256x256xf32>
      %37 = arith.truncf %36 : vector<256x256xf32> to vector<256x256xbf16>
      %c0_19 = arith.constant 0 : index
      %c0_20 = arith.constant 0 : index
      %c0_21 = arith.constant 0 : index
      %38 = vector.load %arg6[%c0_19, %c0_20, %c0_21] : memref<1x256x256xbf16, #tpu.memory_space<vmem>>, vector<1x256x256xbf16>
      %39 = vector.shape_cast %38 : vector<1x256x256xbf16> to vector<256x256xbf16>
      %cst_22 = arith.constant dense<0.000000e+00> : vector<256x256xf32>
      %40 = tpu.matmul %37, %39, %cst_22 {dimension_numbers = #tpu.dot_dimension_numbers<[1], [0], [0], [1], [0, 0, 1, 1], [], []>} : vector<256x256xbf16>, vector<256x256xbf16>, vector<256x256xf32> -> vector<256x256xf32>
      %c0_23 = arith.constant 0 : index
      %c0_24 = arith.constant 0 : index
      %c0_25 = arith.constant 0 : index
      %41 = vector.load %arg7[%c0_23, %c0_24, %c0_25] : memref<1x1x256xf32, #tpu.memory_space<vmem>>, vector<1x1x256xf32>
      %42 = vector.shape_cast %41 : vector<1x1x256xf32> to vector<1x256xf32>
      %43 = vector.broadcast %42 : vector<1x256xf32> to vector<256x256xf32>
      %44 = arith.addf %40, %43 : vector<256x256xf32>
      %c4_i32 = arith.constant 4 : i32
      %45 = arith.cmpi slt, %arg0, %c4_i32 : i32
      %46 = arith.extui %45 : i1 to i32
      %c0_i32_26 = arith.constant 0 : i32
      %47 = arith.cmpi ne, %46, %c0_i32_26 : i32
      scf.if %47 {
        %cst_29 = arith.constant 0.000000e+00 : f32
        %51 = vector.broadcast %cst_29 : f32 to vector<256x256xf32>
        %52 = arith.maximumf %44, %51 : vector<256x256xf32>
        %53 = arith.truncf %52 : vector<256x256xf32> to vector<256x256xbf16>
        %54 = arith.index_cast %1 : i32 to index
        %c0_30 = arith.constant 0 : index
        %55 = vector.load %arg8[%54, %c0_30] : memref<256x256xbf16, #tpu.memory_space<vmem>>, vector<256x256xbf16>
        tpu.vector_store %arg8[%54, %c0_30], %53 {strides = array<i32>} : memref<256x256xbf16, #tpu.memory_space<vmem>>, vector<256x256xbf16>,
      } else {
      }
      %c4_i32_27 = arith.constant 4 : i32
      %48 = arith.cmpi eq, %arg0, %c4_i32_27 : i32
      %49 = arith.extui %48 : i1 to i32
      %c0_i32_28 = arith.constant 0 : i32
      %50 = arith.cmpi ne, %49, %c0_i32_28 : i32
      scf.if %50 {
        %51 = arith.truncf %44 : vector<256x256xf32> to vector<256x256xbf16>
        %52 = arith.index_cast %1 : i32 to index
        %c0_29 = arith.constant 0 : index
        %53 = vector.load %arg8[%52, %c0_29] : memref<256x256xbf16, #tpu.memory_space<vmem>>, vector<256x256xbf16>
        tpu.vector_store %arg8[%52, %c0_29], %51 {strides = array<i32>} : memref<256x256xbf16, #tpu.memory_space<vmem>>, vector<256x256xbf16>,
      } else {
      }
    } else {
    }
    %true = arith.constant true
    %20 = arith.xori %17, %true : i1
    %21 = arith.extui %20 : i1 to i32
    %c0_i32_8 = arith.constant 0 : i32
    %22 = arith.cmpi ne, %21, %c0_i32_8 : i32
    scf.if %22 {
      %23 = arith.index_cast %1 : i32 to index
      %c0 = arith.constant 0 : index
      %24 = vector.load %arg2[%23, %c0] : memref<256x256xbf16, #tpu.memory_space<vmem>>, vector<256x256xbf16>
      %c0_9 = arith.constant 0 : index
      %c0_10 = arith.constant 0 : index
      %25 = vector.load %arg8[%c0_9, %c0_10] : memref<256x256xbf16, #tpu.memory_space<vmem>>, vector<256x256xbf16>
      %cst = arith.constant dense<0.000000e+00> : vector<256x256xf32>
      %26 = tpu.matmul %24, %25, %cst {dimension_numbers = #tpu.dot_dimension_numbers<[1], [0], [0], [1], [0, 0, 1, 1], [], []>} : vector<256x256xbf16>, vector<256x256xbf16>, vector<256x256xf32> -> vector<256x256xf32>
      %27 = arith.truncf %26 : vector<256x256xf32> to vector<256x256xbf16>
      %c0_11 = arith.constant 0 : index
      %c0_12 = arith.constant 0 : index
      %c0_13 = arith.constant 0 : index
      %28 = vector.load %arg4[%c0_11, %c0_12, %c0_13] : memref<1x256x256xbf16, #tpu.memory_space<vmem>>, vector<1x256x256xbf16>
      %29 = vector.shape_cast %28 : vector<1x256x256xbf16> to vector<256x256xbf16>
      %cst_14 = arith.constant dense<0.000000e+00> : vector<256x256xf32>
      %30 = tpu.matmul %27, %29, %cst_14 {dimension_numbers = #tpu.dot_dimension_numbers<[1], [0], [0], [1], [0, 0, 1, 1], [], []>} : vector<256x256xbf16>, vector<256x256xbf16>, vector<256x256xf32> -> vector<256x256xf32>
      %c0_15 = arith.constant 0 : index
      %c0_16 = arith.constant 0 : index
      %c0_17 = arith.constant 0 : index
      %31 = vector.load %arg5[%c0_15, %c0_16, %c0_17] : memref<1x1x256xf32, #tpu.memory_space<vmem>>, vector<1x1x256xf32>
      %32 = vector.shape_cast %31 : vector<1x1x256xf32> to vector<1x256xf32>
      %33 = vector.broadcast %32 : vector<1x256xf32> to vector<256x256xf32>
      %34 = arith.addf %30, %33 : vector<256x256xf32>
      %cst_18 = arith.constant 0.000000e+00 : f32
      %35 = vector.broadcast %cst_18 : f32 to vector<256x256xf32>
      %36 = arith.maximumf %34, %35 : vector<256x256xf32>
      %37 = arith.truncf %36 : vector<256x256xf32> to vector<256x256xbf16>
      %c0_19 = arith.constant 0 : index
      %c0_20 = arith.constant 0 : index
      %c0_21 = arith.constant 0 : index
      %38 = vector.load %arg6[%c0_19, %c0_20, %c0_21] : memref<1x256x256xbf16, #tpu.memory_space<vmem>>, vector<1x256x256xbf16>
      %39 = vector.shape_cast %38 : vector<1x256x256xbf16> to vector<256x256xbf16>
      %cst_22 = arith.constant dense<0.000000e+00> : vector<256x256xf32>
      %40 = tpu.matmul %37, %39, %cst_22 {dimension_numbers = #tpu.dot_dimension_numbers<[1], [0], [0], [1], [0, 0, 1, 1], [], []>} : vector<256x256xbf16>, vector<256x256xbf16>, vector<256x256xf32> -> vector<256x256xf32>
      %c0_23 = arith.constant 0 : index
      %c0_24 = arith.constant 0 : index
      %c0_25 = arith.constant 0 : index
      %41 = vector.load %arg7[%c0_23, %c0_24, %c0_25] : memref<1x1x256xf32, #tpu.memory_space<vmem>>, vector<1x1x256xf32>
      %42 = vector.shape_cast %41 : vector<1x1x256xf32> to vector<1x256xf32>
      %43 = vector.broadcast %42 : vector<1x256xf32> to vector<256x256xf32>
      %44 = arith.addf %40, %43 : vector<256x256xf32>
      %c4_i32 = arith.constant 4 : i32
      %45 = arith.cmpi slt, %arg0, %c4_i32 : i32
      %46 = arith.extui %45 : i1 to i32
      %c0_i32_26 = arith.constant 0 : i32
      %47 = arith.cmpi ne, %46, %c0_i32_26 : i32
      scf.if %47 {
        %cst_29 = arith.constant 0.000000e+00 : f32
        %51 = vector.broadcast %cst_29 : f32 to vector<256x256xf32>
        %52 = arith.maximumf %44, %51 : vector<256x256xf32>
        %53 = arith.truncf %52 : vector<256x256xf32> to vector<256x256xbf16>
        %54 = arith.index_cast %1 : i32 to index
        %c0_30 = arith.constant 0 : index
        %55 = vector.load %arg9[%54, %c0_30] : memref<256x256xbf16, #tpu.memory_space<vmem>>, vector<256x256xbf16>
        tpu.vector_store %arg9[%54, %c0_30], %53 {strides = array<i32>} : memref<256x256xbf16, #tpu.memory_space<vmem>>, vector<256x256xbf16>,
      } else {
      }
      %c4_i32_27 = arith.constant 4 : i32
      %48 = arith.cmpi eq, %arg0, %c4_i32_27 : i32
      %49 = arith.extui %48 : i1 to i32
      %c0_i32_28 = arith.constant 0 : i32
      %50 = arith.cmpi ne, %49, %c0_i32_28 : i32
      scf.if %50 {
        %51 = arith.truncf %44 : vector<256x256xf32> to vector<256x256xbf16>
        %52 = arith.index_cast %1 : i32 to index
        %c0_29 = arith.constant 0 : index
        %53 = vector.load %arg9[%52, %c0_29] : memref<256x256xbf16, #tpu.memory_space<vmem>>, vector<256x256xbf16>
        tpu.vector_store %arg9[%52, %c0_29], %51 {strides = array<i32>} : memref<256x256xbf16, #tpu.memory_space<vmem>>, vector<256x256xbf16>,
      } else {
      }
    } else {
    }
    return
  }
  func.func @transform_0(%arg0: i32, %arg1: i32) -> (i32, i32) {
    %c0_i32 = arith.constant 0 : i32
    %c0_i32_0 = arith.constant 0 : i32
    %c0_i32_1 = arith.constant 0 : i32
    return %c0_i32, %c0_i32_0 : i32, i32
  }
  func.func @transform_2(%arg0: i32, %arg1: i32) -> (i32, i32, i32) {
    %c0_i32 = arith.constant 0 : i32
    %c0_i32_0 = arith.constant 0 : i32
    %c0_i32_1 = arith.constant 0 : i32
    return %arg0, %c0_i32, %c0_i32_0 : i32, i32, i32
  }
  func.func @transform_3(%arg0: i32, %arg1: i32) -> (i32, i32, i32) {
    %c0_i32 = arith.constant 0 : i32
    %c0_i32_0 = arith.constant 0 : i32
    %c0_i32_1 = arith.constant 0 : i32
    return %arg0, %c0_i32, %c0_i32_0 : i32, i32, i32
  }
  func.func @transform_4(%arg0: i32, %arg1: i32) -> (i32, i32, i32) {
    %c0_i32 = arith.constant 0 : i32
    %c0_i32_0 = arith.constant 0 : i32
    %c0_i32_1 = arith.constant 0 : i32
    return %arg0, %c0_i32, %c0_i32_0 : i32, i32, i32
  }
  func.func @transform_5(%arg0: i32, %arg1: i32) -> (i32, i32, i32) {
    %c0_i32 = arith.constant 0 : i32
    %c0_i32_0 = arith.constant 0 : i32
    %c0_i32_1 = arith.constant 0 : i32
    return %arg0, %c0_i32, %c0_i32_0 : i32, i32, i32
  }
  func.func @transform_6(%arg0: i32, %arg1: i32) -> (i32, i32) {
    %c0_i32 = arith.constant 0 : i32
    %c0_i32_0 = arith.constant 0 : i32
    %c0_i32_1 = arith.constant 0 : i32
    return %c0_i32, %c0_i32_0 : i32, i32
  }
}

</mosaic_0001>

<bundles_post_ra>
// kernel: tpu_custom_call.1
= control target key start
LH: loop header
LB: loop body
LE: loop exit
PB: predicated region body
PF: predicated region fallthrough
CT: control target
= control target key end

     0   :  { %s8427_s0 = inlined_call_operand.hbm [shape: bf16[256,256], index: 0, kind: input, shape index: {}]   ;;  %s8428_s1 = inlined_call_operand.hbm [shape: bf16[256,256], index: 1, kind: input, shape index: {}]   ;;  %s8429_s2 = inlined_call_operand.hbm [shape: bf16[5,256,256], index: 2, kind: input, shape index: {}]   ;;  %s8430_s3 = inlined_call_operand.hbm [shape: f32[5,1,256], index: 3, kind: input, shape index: {}]   ;;  %s8431_s4 = inlined_call_operand.hbm [shape: bf16[5,256,256], index: 4, kind: input, shape index: {}]   ;;  %s8432_s5 = inlined_call_operand.hbm [shape: f32[5,1,256], index: 5, kind: input, shape index: {}]   ;;  %s8433_s6 = inlined_call_operand.hbm [shape: bf16[256,256], index: 6, kind: output, shape index: {}]  }
   0x1   :  { %8467 = sst [smem:[#allocation83_spill]] %s8427_s0 }
   0x2   :  { %8468 = sst [smem:[#allocation84_spill]] %s8429_s2 }
   0x3   :  { %8469 = sst [smem:[#allocation85_spill]] %s8431_s4 }
   0x4   :  { %11 = vsyncpa [#allocation5], 0 }
   0x5   :  { %12 = vsyncpa [#allocation8], 0 }
   0x6   :  { %14 = vsyncpa [#allocation8 + $0x1], 0 }
   0x7   :  { %15 = vsyncpa [#allocation11], 0 }
   0x8   :  { %17 = vsyncpa [#allocation11 + $0x1], 0 }
   0x9   :  { %18 = vsyncpa [#allocation6], 0  ;;  %s6683_s21 = smov 0   ;;  %s6685_s22 = smov 0  }
   0xa   :  { %s6687_s23 = smov 0   ;;  %s6689_s24 = smov 0  }
   0xb   :  { %s6691_s25 = smov 0   ;;  %s6693_s26 = smov 0  }
   0xc LB: > { %8470 = sst [smem:[#allocation23_spill]] %s6627_s23  ;;  %s36_s27 = sadd.s32 1, %s6635_s25  ;;  %s6639_s26 = sphi %s6693_s26, %s24_s26   ;;  %s6635_s25 = sphi %s6691_s25, %s8626_s25   ;;  %s6631_s24 = sphi %s6689_s24, %s8625_s24   ;;  %s6627_s23 = sphi %s6687_s23, %s8624_s23   ;;  %s6623_s22 = sphi %s6685_s22, %s8628_s22   ;;  %s6619_s21 = sphi %s6683_s21, %s8627_s21  }
   0xd   : > { %8471 = sst [smem:[#allocation24_spill]] %s6635_s25  ;;  %s64_s28 = sadd.s32 1, %s6627_s23 }
   0xe   : > { %p38_p0 = scmp.ge.s32.totalorder %s36_s27, 5  ;;  %p71_p1 = scmp.ne.s32.totalorder %s6627_s23, %s6623_s22 }
   0xf   : > { %p72_p2 = scmp.eq.s32.totalorder %s6639_s26, 0  ;;  %p6308_p5 = scmp.lt.s32.totalorder %s6639_s26, 5 }
  0x10   : > { %s8630_s27 = smov (%p38_p0, %s36_s27), 0  ;;  %s214_s7 = sand.u32 1, %s6639_s26  }
  0x11   : > { %8472 = sst [smem:[#allocation25_spill]] %s8630_s27  ;;  %p6720_p3 = por %p72_p2, %p71_p1 }
  0x12   : > { %s61_s30 = ssub.s32 %s6635_s25, %s8630_s27  ;;  %s216_s8 = sand.u32 1, %s6627_s23  }
  0x13   : > { %p62_p4 = scmp.eq.s32.totalorder %s61_s30, 0  ;;  %s4958_s10 = sshll.u32 %s216_s8, 8 }
  0x14   : > { %s6013_s11 = sshll.u32 %s6635_s25, 8  ;;  %s8475_s2 = sld [smem:[#allocation84_spill]] }
  0x15   : > { %s6730_s9 = scalar_select %p62_p4, %s6627_s23, %s64_s28  }
  0x16   : > { %s218_s15 = scalar_lea.vmem [#allocation7], %s4958_s10  ;;  %p6740_p6 = pnand %p6308_p5, %p6720_p3 }
  0x17   : > { %8474 = sst [smem:[#allocation26_spill]] %s6730_s9  ;;  %s226_s16 = sshll.u32 %s218_s15, 4  ;;  %s227_s16 = int_to_ptr.vmem [resolvable:$true] %s226_s16 }
  0x18   : > { %s8477_s4 = sld [smem:[#allocation85_spill]]  ;;  %s6747_s30 = scalar_lea.sflag [#allocation8], %s214_s7 }
  0x19   : > { %s8434_s12 = smov 128   ;;  %s8435_s13 = smov 8  }
  0x1a   : > { %s223_s14 = scalar_lea.hbm %s8475_s2, %s6013_s11  ;;  %s6755_s19 = scalar_lea.sflag [#allocation11], %s214_s7 }
  0x1b   : > { %s224_s17 = sshll.u32 %s223_s14, 4  ;;  %s259_s14 = scalar_lea.vmem [#allocation10], %s4958_s10  ;;  %s225_s17 = int_to_ptr.hbm [resolvable:$true] %s224_s17 }
  0x1c   : > { %6297 = dma.hbm_to_vmem [thread:$0]  (!%p6740_p6), %s225_s17, 4096, %s227_s16, %s6747_s30, %s8434_s12, %s8434_s12, %s8435_s13  }
  0x1d   : > { %s267_s15 = sshll.u32 %s259_s14, 4  ;;  %p77_p7 = scmp.ne.s32.totalorder %s6623_s22, %s6619_s21  ;;  %s268_s15 = int_to_ptr.vmem [resolvable:$true] %s267_s15 }
  0x1e   : > { %s264_s28 = scalar_lea.hbm %s8477_s4, %s6013_s11  ;;  %s6764_s11 = sadd.s32 4294967295, %s6639_s26  }
  0x1f   : > { %s265_s29 = sshll.u32 %s264_s28, 4  ;;  %p78_p8 = scmp.eq.s32.totalorder %s6764_s11, 0  ;;  %s266_s29 = int_to_ptr.hbm [resolvable:$true] %s265_s29 }
  0x20   : > { %6303 = dma.hbm_to_vmem [thread:$0]  (!%p6740_p6), %s266_s29, 4096, %s268_s15, %s6755_s19, %s8434_s12, %s8434_s12, %s8435_s13  }
  0x21   : > { %p4955_p9 = scmp.ge.s32.totalorder %s6639_s26, 1  ;;  %p187_p10 = scmp.lt.s32.totalorder %s6639_s26, 6 }
  0x22   : > { %p6773_p11 = por %p78_p8, %p77_p7  ;;  %s8479_s0 = sld [smem:[#allocation83_spill]] }
  0x23   : > { %p6780_p12 = pnand %p4955_p9, %p187_p10  ;;  %s4961_s21 = sshll.u32 %s216_s8, 1 }
  0x24   : > { %s6643_s28 = smov [#allocation4]   ;;  %s4962_s14 = sshll.u32 %s6635_s25, 1 }
  0x25   : > { %p6290_p13 = pneg %p6780_p12  ;;  %s200_s29 = sshll.u32 %s6643_s28, 4  ;;  %s201_s29 = int_to_ptr.vmem [resolvable:$true] %s200_s29 }
  0x26   : > { %s244_s16 = scalar_lea.hbm %s8430_s3, %s4962_s14  ;;  %s240_s12 = scalar_lea.vmem [#allocation9], %s4961_s21 }
  0x27   : > { %p6291_p0 = pnand %p6290_p13, %p78_p8  ;;  %s248_s13 = sshll.u32 %s240_s12, 4  ;;  %s249_s13 = int_to_ptr.vmem [resolvable:$true] %s248_s13 }
  0x28   : > { %s198_s17 = sshll.u32 %s8479_s0, 4  ;;  %s246_s0 = sshll.u32 %s244_s16, 4  ;;  %s199_s17 = int_to_ptr.hbm [resolvable:$true] %s198_s17  ;;  %s247_s0 = int_to_ptr.hbm [resolvable:$true] %s246_s0 }
  0x29   : > { %s8481_s2 = smov 8   ;;  %s8482_s4 = smov 128  }
  0x2a   : > { %6293 = dma.hbm_to_vmem [thread:$0]  (!%p6291_p0), %s199_s17, 4096, %s201_s29, [#allocation5], %s8482_s4, %s8482_s4, %s8481_s2  }
  0x2b   : > { %6300 = dma.hbm_to_vmem [thread:$0]  (!%p6740_p6), %s247_s0, 32, %s249_s13, %s6747_s30  }
  0x2c   : > { %s285_s27 = scalar_lea.hbm %s8432_s5, %s4962_s14  ;;  %s281_s9 = scalar_lea.vmem [#allocation12], %s4961_s21 }
  0x2d   : > { %s287_s25 = sshll.u32 %s285_s27, 4  ;;  %s289_s23 = sshll.u32 %s281_s9, 4  ;;  %s288_s25 = int_to_ptr.hbm [resolvable:$true] %s287_s25  ;;  %s290_s23 = int_to_ptr.vmem [resolvable:$true] %s289_s23 }
  0x2e   : > { %6306 = dma.hbm_to_vmem [thread:$0]  (!%p6740_p6), %s288_s25, 32, %s290_s23, %s6755_s19  }
  0x2f   : > { %298 = sbr.rel (%p6780_p12) target bundleno = 2107 (0x83b), region = 40 }
  0x34   : > { %6598 = dma.done.wait (%p78_p8), [#allocation5], 4096  }
  0x35   : > { %6600 = vsyncadd (%p78_p8), [#allocation5], 4294963200  ;;  %s305_s0 = sand.u32 1, %s6764_s11   ;;  %s307_s2 = sand.u32 1, %s6623_s22  }
  0x36   : > { %s4970_s4 = sshll.u32 %s307_s2, 8  ;;  %s306_s27 = scalar_lea.sflag [#allocation8], %s305_s0 }
  0x37   : > { %s6814_s9 = scalar_lea.vmem [#allocation7], %s4970_s4 }
  0x38   : > { %6602 = dma.done.wait (%p6773_p11), %s306_s27, 4128  }
  0x39   : > { %6604 = vsyncadd (%p6773_p11), %s306_s27, 4294963168  ;;  %s6820_s23 = sshll.u32 %s307_s2, 1  ;;  %s326_s18 = scalar_lea.sflag [#allocation11], %s305_s0 }
  0x3a   : > { %s319_s25 = scalar_lea.vmem [#allocation9], %s6820_s23  ;;  %s6823_s30 = scalar_lea.vmem [#allocation10], %s4970_s4 }
  0x3b   : > { %6606 = dma.done.wait (%p6773_p11), %s326_s18, 4128  }
  0x3c   : > { %6608 = vsyncadd (%p6773_p11), %s326_s18, 4294963168  ;;  %p378_p1 = scmp.eq.s32.totalorder %s6631_s24, 0  ;;  %s391_s19 = sshll.u32 %s8428_s1, 4  ;;  %s392_s19 = int_to_ptr.hbm [resolvable:$true] %s391_s19 }
  0x3d   : > { %s6644_s17 = smov [#allocation2]   ;;  %s339_s21 = scalar_lea.vmem [#allocation12], %s6820_s23 }
  0x3e   : > { %s393_s20 = sshll.u32 %s6644_s17, 4  ;;  %s394_s20 = int_to_ptr.vmem [resolvable:$true] %s393_s20 }
  0x3f   : > { %6284 = dma.hbm_to_vmem [thread:$0]  (%p378_p1), %s392_s19, 4096, %s394_s20, [#allocation3] }
  0x40   : > { %6610 = dma.done.wait (%p378_p1), [#allocation3], 4096 }
  0x41   : > { %6612 = vsyncadd (%p378_p1), [#allocation3], 4294963200  ;;  %p401_p2 = scmp.lt.s32.totalorder %s6631_s24, 0  ;;  %s402_s7 = ssub.s32 0, %s6631_s24 }
  0x42   : > { %s4975_s29 = smin.u32 %s6631_s24, %s402_s7 }
  0x43   : > { %s404_s14 = sand.u32 1, %s4975_s29  }
  0x44   : > { %s405_s15 = ssub.s32 0, %s404_s14 }
  0x45   : > { %s8632_s15 = smov (!%p401_p2, %s405_s15), %s404_s14 }
  0x46   : > { %p4977_p3 = scmp.lt.s32.totalorder %s8632_s15, 0  ;;  %s411_s10 = sadd.s32 2, %s8632_s15 }
  0x48   : > { %s8634_s10 = smov (!%p4977_p3, %s411_s10), %s8632_s15 }
  0x49   : > { %p4978_p4 = scmp.ne.s32.totalorder %s8634_s10, 0 }
  0x4b   : > { %416 = sbr.rel (%p4978_p4) target bundleno = 1087 (0x43f), region = 72 }
  0x50   : > { %v5165_v0 = vld [vmem:[#allocation2 + $0x70] sm:$0xf]  ;;  %v6063_v1 = vld [vmem:[#allocation2 + $0x74] sm:$0xf0]  ;;  %v6062_v5 = vld [vmem:[#allocation2 + $0x74] sm:$0xf] }
  0x51   : > { %v5229_v2 = vld [vmem:[#allocation2 + $0xf0] sm:$0xf]  ;;  %v5166_v3 = vor.u32 %v6063_v1, %v5165_v0  ;;  %v6079_v4 = vld [vmem:[#allocation2 + $0xf4] sm:$0xf0]  ;;  %v5167_v6 = vld [vmem:[#allocation2 + $0x78] sm:$0xf0] }
  0x52   : > { %v5230_v7 = vor.u32 %v6079_v4, %v5229_v2  ;;  %v5170_v8 = vor.u32 %v6062_v5, %v5167_v6  ;;  %v6078_v9 = vld [vmem:[#allocation2 + $0xf4] sm:$0xf]  ;;  %v5231_v10 = vld [vmem:[#allocation2 + $0xf8] sm:$0xf0]  ;;  %v5157_v11 = vld [vmem:[#allocation2 + $0x60] sm:$0xf] }
  0x53   : > { %806 = vmatpush.bf16.msra.mxu0 %v5166_v3  ;;  %v5234_v12 = vor.u32 %v6078_v9, %v5231_v10  ;;  %v6061_v13 = vld [vmem:[#allocation2 + $0x64] sm:$0xf0]  ;;  %v5221_v14 = vld [vmem:[#allocation2 + $0xe0] sm:$0xf]  ;;  %v6060_v18 = vld [vmem:[#allocation2 + $0x64] sm:$0xf] }
  0x54   : > { %v6077_v15 = vld [vmem:[#allocation2 + $0xe4] sm:$0xf0]  ;;  %895 = vmatpush.bf16.msra.mxu1 %v5230_v7  ;;  %984 = vmatpush.bf16.msra.mxu2 %v5170_v8  ;;  %v5158_v16 = vor.u32 %v6061_v13, %v5157_v11  ;;  %v5159_v19 = vld [vmem:[#allocation2 + $0x68] sm:$0xf0]  ;;  %v6076_v20 = vld [vmem:[#allocation2 + $0xe4] sm:$0xf] }
  0x55   : > { %v5222_v17 = vor.u32 %v6077_v15, %v5221_v14  ;;  %1073 = vmatpush.bf16.msra.mxu3 %v5234_v12  ;;  %v5162_v21 = vor.u32 %v6060_v18, %v5159_v19  ;;  %v5223_v22 = vld [vmem:[#allocation2 + $0xe8] sm:$0xf0]  ;;  %v5149_v23 = vld [vmem:[#allocation2 + $0x50] sm:$0xf]  ;;  %v6059_v24 = vld [vmem:[#allocation2 + $0x54] sm:$0xf0] }
  0x56   : > { %v5226_v25 = vor.u32 %v6076_v20, %v5223_v22  ;;  %v5213_v26 = vld [vmem:[#allocation2 + $0xd0] sm:$0xf]  ;;  %v6075_v27 = vld [vmem:[#allocation2 + $0xd4] sm:$0xf0]  ;;  %v6058_v28 = vld [vmem:[#allocation2 + $0x54] sm:$0xf]  ;;  %v5150_v29 = vor.u32 %v6059_v24, %v5149_v23 }
  0x57   : > { %807 = vmatpush.bf16.msra.mxu0 %v5158_v16  ;;  %v5151_v30 = vld [vmem:[#allocation2 + $0x58] sm:$0xf0]  ;;  %v6074_v31 = vld [vmem:[#allocation2 + $0xd4] sm:$0xf]  ;;  %v5214_v33 = vor.u32 %v6075_v27, %v5213_v26  ;;  %v5141_v35 = vld [vmem:[#allocation2 + $0x40] sm:$0xf] }
  0x58   : > { %v5215_v32 = vld [vmem:[#allocation2 + $0xd8] sm:$0xf0]  ;;  %896 = vmatpush.bf16.msra.mxu1 %v5222_v17  ;;  %985 = vmatpush.bf16.msra.mxu2 %v5162_v21  ;;  %v5154_v34 = vor.u32 %v6058_v28, %v5151_v30  ;;  %v6057_v36 = vld [vmem:[#allocation2 + $0x44] sm:$0xf0]  ;;  %v5205_v37 = vld [vmem:[#allocation2 + $0xc0] sm:$0xf] }
  0x59   : > { %1074 = vmatpush.bf16.msra.mxu3 %v5226_v25  ;;  %v5218_v38 = vor.u32 %v6074_v31, %v5215_v32  ;;  %v6073_v39 = vld [vmem:[#allocation2 + $0xc4] sm:$0xf0]  ;;  %v6056_v40 = vld [vmem:[#allocation2 + $0x44] sm:$0xf]  ;;  %v5143_v41 = vld [vmem:[#allocation2 + $0x48] sm:$0xf0]  ;;  %v5142_v44 = vor.u32 %v6057_v36, %v5141_v35 }
  0x5a   : > { %v6072_v42 = vld [vmem:[#allocation2 + $0xc4] sm:$0xf]  ;;  %v5207_v43 = vld [vmem:[#allocation2 + $0xc8] sm:$0xf0]  ;;  %v5206_v45 = vor.u32 %v6073_v39, %v5205_v37  ;;  %v5146_v46 = vor.u32 %v6056_v40, %v5143_v41  ;;  %v5133_v47 = vld [vmem:[#allocation2 + $0x30] sm:$0xf] }
  0x5b   : > { %808 = vmatpush.bf16.msra.mxu0 %v5150_v29  ;;  %v6055_v48 = vld [vmem:[#allocation2 + $0x34] sm:$0xf0]  ;;  %v5197_v49 = vld [vmem:[#allocation2 + $0xb0] sm:$0xf]  ;;  %v5210_v50 = vor.u32 %v6072_v42, %v5207_v43  ;;  %v6054_v52 = vld [vmem:[#allocation2 + $0x34] sm:$0xf] }
  0x5c   : > { %897 = vmatpush.bf16.msra.mxu1 %v5214_v33  ;;  %986 = vmatpush.bf16.msra.mxu2 %v5154_v34  ;;  %v6071_v51 = vld [vmem:[#allocation2 + $0xb4] sm:$0xf0]  ;;  %v5135_v53 = vld [vmem:[#allocation2 + $0x38] sm:$0xf0]  ;;  %v6070_v54 = vld [vmem:[#allocation2 + $0xb4] sm:$0xf]  ;;  %v5134_v56 = vor.u32 %v6055_v48, %v5133_v47 }
  0x5d   : > { %1075 = vmatpush.bf16.msra.mxu3 %v5218_v38  ;;  %v5199_v55 = vld [vmem:[#allocation2 + $0xb8] sm:$0xf0]  ;;  %v5198_v57 = vor.u32 %v6071_v51, %v5197_v49  ;;  %v5138_v58 = vor.u32 %v6054_v52, %v5135_v53  ;;  %v5125_v59 = vld [vmem:[#allocation2 + $0x20] sm:$0xf]  ;;  %v6053_v60 = vld [vmem:[#allocation2 + $0x24] sm:$0xf0] }
  0x5e   : > { %v5189_v61 = vld [vmem:[#allocation2 + $0xa0] sm:$0xf]  ;;  %v5202_v62 = vor.u32 %v6070_v54, %v5199_v55  ;;  %v6069_v63 = vld [vmem:[#allocation2 + $0xa4] sm:$0xf0]  ;;  %v6052_v0 = vld [vmem:[#allocation2 + $0x24] sm:$0xf]  ;;  %v5126_v4 = vor.u32 %v6053_v60, %v5125_v59 }
  0x5f   : > { %809 = vmatpush.bf16.msra.mxu0 %v5142_v44  ;;  %v5127_v1 = vld [vmem:[#allocation2 + $0x28] sm:$0xf0]  ;;  %v6068_v2 = vld [vmem:[#allocation2 + $0xa4] sm:$0xf]  ;;  %v5190_v5 = vor.u32 %v6069_v63, %v5189_v61  ;;  %v5117_v7 = vld [vmem:[#allocation2 + $0x10] sm:$0xf] }
  0x60   : > { %898 = vmatpush.bf16.msra.mxu1 %v5206_v45  ;;  %987 = vmatpush.bf16.msra.mxu2 %v5146_v46  ;;  %v5191_v3 = vld [vmem:[#allocation2 + $0xa8] sm:$0xf0]  ;;  %v5130_v6 = vor.u32 %v6052_v0, %v5127_v1  ;;  %v6051_v8 = vld [vmem:[#allocation2 + $0x14] sm:$0xf0]  ;;  %v5181_v9 = vld [vmem:[#allocation2 + $0x90] sm:$0xf] }
  0x61   : > { %1076 = vmatpush.bf16.msra.mxu3 %v5210_v50  ;;  %v5194_v10 = vor.u32 %v6068_v2, %v5191_v3  ;;  %v6067_v11 = vld [vmem:[#allocation2 + $0x94] sm:$0xf0]  ;;  %v6050_v12 = vld [vmem:[#allocation2 + $0x14] sm:$0xf]  ;;  %v5119_v13 = vld [vmem:[#allocation2 + $0x18] sm:$0xf0]  ;;  %v5118_v16 = vor.u32 %v6051_v8, %v5117_v7 }
  0x62   : > { %v6066_v14 = vld [vmem:[#allocation2 + $0x94] sm:$0xf]  ;;  %v5183_v15 = vld [vmem:[#allocation2 + $0x98] sm:$0xf0]  ;;  %v5109_v17 = vld [vmem:[#allocation2] sm:$0xf]  ;;  %v5182_v19 = vor.u32 %v6067_v11, %v5181_v9  ;;  %v5122_v20 = vor.u32 %v6050_v12, %v5119_v13 }
  0x63   : > { %810 = vmatpush.bf16.msra.mxu0 %v5134_v56  ;;  %v6049_v18 = vld [vmem:[#allocation2 + $0x4] sm:$0xf0]  ;;  %v5173_v21 = vld [vmem:[#allocation2 + $0x80] sm:$0xf]  ;;  %v6048_v23 = vld [vmem:[#allocation2 + $0x4] sm:$0xf]  ;;  %v5186_v24 = vor.u32 %v6066_v14, %v5183_v15 }
  0x64   : > { %899 = vmatpush.bf16.msra.mxu1 %v5198_v57  ;;  %988 = vmatpush.bf16.msra.mxu2 %v5138_v58  ;;  %v6065_v22 = vld [vmem:[#allocation2 + $0x84] sm:$0xf0]  ;;  %v5111_v25 = vld [vmem:[#allocation2 + $0x8] sm:$0xf0]  ;;  %v6064_v26 = vld [vmem:[#allocation2 + $0x84] sm:$0xf]  ;;  %v5110_v31 = vor.u32 %v6049_v18, %v5109_v17 }
  0x65   : > { %1077 = vmatpush.bf16.msra.mxu3 %v5202_v62  ;;  %v5175_v27 = vld [vmem:[#allocation2 + $0x88] sm:$0xf0]  ;;  %v4981_v28 = vld [vmem:[#allocation4] sm:$0xf]  ;;  %v6094_v29 = vld [vmem:[%s6814_s9 + $0x74] sm:$0xf]  ;;  %v5174_v35 = vor.u32 %v6065_v22, %v5173_v21  ;;  %v5114_v36 = vor.u32 %v6048_v23, %v5111_v25 }
  0x66   : > { %v5295_v30 = vld [vmem:[%s6814_s9 + $0x78] sm:$0xf0]  ;;  %v6017_v32 = vld [vmem:[#allocation4 + $0x4] sm:$0xf0]  ;;  %v6110_v33 = vld [vmem:[%s6814_s9 + $0xf4] sm:$0xf]  ;;  %v5178_v39 = vor.u32 %v6064_v26, %v5175_v27 }
  0x67   : > { %811 = vmatpush.bf16.msra.mxu0 %v5126_v4  ;;  %v5359_v34 = vld [vmem:[%s6814_s9 + $0xf8] sm:$0xf0]  ;;  %v6016_v37 = vld [vmem:[#allocation4 + $0x4] sm:$0xf]  ;;  %v4983_v38 = vld [vmem:[#allocation4 + $0x8] sm:$0xf0]  ;;  %v5298_v40 = vor.u32 %v6094_v29, %v5295_v30  ;;  %v4982_v43 = vor.u32 %v6017_v32, %v4981_v28 }
  0x68   : > { %900 = vmatpush.bf16.msra.mxu1 %v5190_v5  ;;  %989 = vmatpush.bf16.msra.mxu2 %v5130_v6  ;;  %v5293_v41 = vld [vmem:[%s6814_s9 + $0x70] sm:$0xf]  ;;  %v6095_v42 = vld [vmem:[%s6814_s9 + $0x74] sm:$0xf0]  ;;  %v5362_v44 = vor.u32 %v6110_v33, %v5359_v34  ;;  %v4986_v47 = vor.u32 %v6016_v37, %v4983_v38  ;;  %v6092_v50 = vld [vmem:[%s6814_s9 + $0x64] sm:$0xf] }
  0x69   : > { %1078 = vmatpush.bf16.msra.mxu3 %v5194_v10  ;;  %v5357_v45 = vld [vmem:[%s6814_s9 + $0xf0] sm:$0xf]  ;;  %v6111_v46 = vld [vmem:[%s6814_s9 + $0xf4] sm:$0xf0]  ;;  %v5294_v48 = vor.u32 %v6095_v42, %v5293_v41  ;;  %v5287_v51 = vld [vmem:[%s6814_s9 + $0x68] sm:$0xf0] }
  0x6a   : > { %v5358_v49 = vor.u32 %v6111_v46, %v5357_v45  ;;  %v6108_v52 = vld [vmem:[%s6814_s9 + $0xe4] sm:$0xf]  ;;  %v5290_v53 = vor.u32 %v6092_v50, %v5287_v51  ;;  %v5351_v54 = vld [vmem:[%s6814_s9 + $0xe8] sm:$0xf0]  ;;  %v5285_v55 = vld [vmem:[%s6814_s9 + $0x60] sm:$0xf] }
  0x6b   : > { %812 = vmatpush.bf16.msra.mxu0 %v5118_v16  ;;  %v6093_v56 = vld [vmem:[%s6814_s9 + $0x64] sm:$0xf0]  ;;  %v5354_v57 = vor.u32 %v6108_v52, %v5351_v54  ;;  %v5349_v59 = vld [vmem:[%s6814_s9 + $0xe0] sm:$0xf]  ;;  %v4989_v62 = vld [vmem:[#allocation4 + $0x10] sm:$0xf] }
  0x6c   : > { %901 = vmatpush.bf16.msra.mxu1 %v5182_v19  ;;  %990 = vmatpush.bf16.msra.mxu2 %v5122_v20  ;;  %v5286_v58 = vor.u32 %v6093_v56, %v5285_v55  ;;  %v6109_v60 = vld [vmem:[%s6814_s9 + $0xe4] sm:$0xf0]  ;;  %v6019_v63 = vld [vmem:[#allocation4 + $0x14] sm:$0xf0]  ;;  %v6018_v0 = vld [vmem:[#allocation4 + $0x14] sm:$0xf] }
  0x6d   : > { %1079 = vmatpush.bf16.msra.mxu3 %v5186_v24  ;;  %v5350_v61 = vor.u32 %v6109_v60, %v5349_v59  ;;  %v4991_v1 = vld [vmem:[#allocation4 + $0x18] sm:$0xf0]  ;;  %v4990_v2 = vor.u32 %v6019_v63, %v4989_v62  ;;  %v4997_v4 = vld [vmem:[#allocation4 + $0x20] sm:$0xf]  ;;  %v6021_v5 = vld [vmem:[#allocation4 + $0x24] sm:$0xf0] }
  0x6e   : > { %v4994_v3 = vor.u32 %v6018_v0, %v4991_v1  ;;  %v6020_v6 = vld [vmem:[#allocation4 + $0x24] sm:$0xf]  ;;  %v4999_v7 = vld [vmem:[#allocation4 + $0x28] sm:$0xf0]  ;;  %v4998_v8 = vor.u32 %v6021_v5, %v4997_v4  ;;  %v6090_v10 = vld [vmem:[%s6814_s9 + $0x54] sm:$0xf] }
  0x6f   : > { %813 = vmatpush.bf16.msra.mxu0 %v5110_v31  ;;  %v5002_v9 = vor.u32 %v6020_v6, %v4999_v7  ;;  %v5279_v11 = vld [vmem:[%s6814_s9 + $0x58] sm:$0xf0]  ;;  %v6106_v12 = vld [vmem:[%s6814_s9 + $0xd4] sm:$0xf]  ;;  %v5277_v15 = vld [vmem:[%s6814_s9 + $0x50] sm:$0xf] }
  0x70   : > { %902 = vmatpush.bf16.msra.mxu1 %v5174_v35  ;;  %991 = vmatpush.bf16.msra.mxu2 %v5114_v36  ;;  %v5282_v13 = vor.u32 %v6090_v10, %v5279_v11  ;;  %v5343_v14 = vld [vmem:[%s6814_s9 + $0xd8] sm:$0xf0]  ;;  %v6091_v16 = vld [vmem:[%s6814_s9 + $0x54] sm:$0xf0]  ;;  %v5341_v19 = vld [vmem:[%s6814_s9 + $0xd0] sm:$0xf] }
  0x71   : > { %1080 = vmatpush.bf16.msra.mxu3 %v5178_v39  ;;  %v5346_v17 = vor.u32 %v6106_v12, %v5343_v14  ;;  %v5278_v18 = vor.u32 %v6091_v16, %v5277_v15  ;;  %v6107_v20 = vld [vmem:[%s6814_s9 + $0xd4] sm:$0xf0]  ;;  %v5005_v22 = vld [vmem:[#allocation4 + $0x30] sm:$0xf]  ;;  %v6022_v24 = vld [vmem:[#allocation4 + $0x34] sm:$0xf] }
  0x72   : > { %814 = vmatmul.bf16.vlgmr.msra.gmra.mxu0 %v4982_v43  ;;  %v5342_v21 = vor.u32 %v6107_v20, %v5341_v19  ;;  %v6023_v23 = vld [vmem:[#allocation4 + $0x34] sm:$0xf0]  ;;  %v5007_v25 = vld [vmem:[#allocation4 + $0x38] sm:$0xf0]  ;;  %v5013_v28 = vld [vmem:[#allocation4 + $0x40] sm:$0xf] }
  0x73   : > { %903 = vmatmul.bf16.vlgmr.msra.gmra.mxu1 %v4986_v47  ;;  %992 = vmatmul.bf16.vlgmr.msra.gmra.mxu2 %v4982_v43  ;;  %v5006_v26 = vor.u32 %v6023_v23, %v5005_v22  ;;  %v5010_v27 = vor.u32 %v6022_v24, %v5007_v25  ;;  %v6025_v29 = vld [vmem:[#allocation4 + $0x44] sm:$0xf0]  ;;  %v6024_v30 = vld [vmem:[#allocation4 + $0x44] sm:$0xf]  ;;  %v5015_v31 = vld [vmem:[#allocation4 + $0x48] sm:$0xf0] }
  0x74   : > { %1570 = vmatpush.bf16.msrb.mxu2 %v5298_v40  ;;  %1081 = vmatmul.bf16.vlgmr.msra.gmra.mxu3 %v4986_v47  ;;  %v5014_v32 = vor.u32 %v6025_v29, %v5013_v28  ;;  %v5018_v33 = vor.u32 %v6024_v30, %v5015_v31  ;;  %v6088_v34 = vld [vmem:[%s6814_s9 + $0x44] sm:$0xf]  ;;  %v5271_v35 = vld [vmem:[%s6814_s9 + $0x48] sm:$0xf0]  ;;  %v5269_v39 = vld [vmem:[%s6814_s9 + $0x40] sm:$0xf] }
  0x75   : > { %1659 = vmatpush.bf16.msrb.mxu3 %v5362_v44  ;;  %1392 = vmatpush.bf16.msrb.mxu0 %v5294_v48  ;;  %v6104_v36 = vld [vmem:[%s6814_s9 + $0xc4] sm:$0xf]  ;;  %v5274_v37 = vor.u32 %v6088_v34, %v5271_v35  ;;  %v5335_v38 = vld [vmem:[%s6814_s9 + $0xc8] sm:$0xf0]  ;;  %v6089_v40 = vld [vmem:[%s6814_s9 + $0x44] sm:$0xf0] }
  0x76   : > { %1481 = vmatpush.bf16.msrb.mxu1 %v5358_v49  ;;  %v5338_v41 = vor.u32 %v6104_v36, %v5335_v38  ;;  %v5270_v42 = vor.u32 %v6089_v40, %v5269_v39  ;;  %v5333_v43 = vld [vmem:[%s6814_s9 + $0xc0] sm:$0xf]  ;;  %v6105_v44 = vld [vmem:[%s6814_s9 + $0xc4] sm:$0xf0]  ;;  %v5021_v46 = vld [vmem:[#allocation4 + $0x50] sm:$0xf] }
  0x77   : > { %v5334_v45 = vor.u32 %v6105_v44, %v5333_v43  ;;  %v6027_v47 = vld [vmem:[#allocation4 + $0x54] sm:$0xf0]  ;;  %v6026_v48 = vld [vmem:[#allocation4 + $0x54] sm:$0xf]  ;;  %v5023_v49 = vld [vmem:[#allocation4 + $0x58] sm:$0xf0] }
  0x78   : > { %1571 = vmatpush.bf16.msrb.mxu2 %v5290_v53  ;;  %v5022_v50 = vor.u32 %v6027_v47, %v5021_v46  ;;  %v5026_v51 = vor.u32 %v6026_v48, %v5023_v49  ;;  %v5029_v52 = vld [vmem:[#allocation4 + $0x60] sm:$0xf]  ;;  %v6029_v53 = vld [vmem:[#allocation4 + $0x64] sm:$0xf0]  ;;  %v6028_v54 = vld [vmem:[#allocation4 + $0x64] sm:$0xf] }
  0x79   : > { %1660 = vmatpush.bf16.msrb.mxu3 %v5354_v57  ;;  %1393 = vmatpush.bf16.msrb.mxu0 %v5286_v58  ;;  %v5031_v55 = vld [vmem:[#allocation4 + $0x68] sm:$0xf0]  ;;  %v5030_v56 = vor.u32 %v6029_v53, %v5029_v52  ;;  %v6086_v58 = vld [vmem:[%s6814_s9 + $0x34] sm:$0xf]  ;;  %v5263_v59 = vld [vmem:[%s6814_s9 + $0x38] sm:$0xf0] }
  0x7a   : > { %1482 = vmatpush.bf16.msrb.mxu1 %v5350_v61  ;;  %v5034_v57 = vor.u32 %v6028_v54, %v5031_v55  ;;  %v6102_v60 = vld [vmem:[%s6814_s9 + $0xb4] sm:$0xf]  ;;  %v5266_v61 = vor.u32 %v6086_v58, %v5263_v59  ;;  %v5327_v62 = vld [vmem:[%s6814_s9 + $0xb8] sm:$0xf0]  ;;  %v5037_v0 = vld [vmem:[#allocation4 + $0x70] sm:$0xf] }
  0x7b   : > { %v5330_v63 = vor.u32 %v6102_v60, %v5327_v62  ;;  %v6031_v1 = vld [vmem:[#allocation4 + $0x74] sm:$0xf0]  ;;  %v5325_v4 = vld [vmem:[%s6814_s9 + $0xb0] sm:$0xf]  ;;  %v6030_v5 = vld [vmem:[#allocation4 + $0x74] sm:$0xf] }
  0x7c   : > { %1572 = vmatpush.bf16.msrb.mxu2 %v5282_v13  ;;  %v5039_v6 = vld [vmem:[#allocation4 + $0x78] sm:$0xf0]  ;;  %v5038_v10 = vor.u32 %v6031_v1, %v5037_v0  ;;  %v5045_v12 = vld [vmem:[#allocation4 + $0x80] sm:$0xf]  ;;  %v6033_v13 = vld [vmem:[#allocation4 + $0x84] sm:$0xf0] }
  0x7d   : > { %1661 = vmatpush.bf16.msrb.mxu3 %v5346_v17  ;;  %1394 = vmatpush.bf16.msrb.mxu0 %v5278_v18  ;;  %v5042_v11 = vor.u32 %v6030_v5, %v5039_v6  ;;  %v6032_v14 = vld [vmem:[#allocation4 + $0x84] sm:$0xf]  ;;  %v5047_v15 = vld [vmem:[#allocation4 + $0x88] sm:$0xf0]  ;;  %v5046_v16 = vor.u32 %v6033_v13, %v5045_v12  ;;  %v6035_v34 = vld [vmem:[#allocation4 + $0x94] sm:$0xf0] }
  0x7e   : > { %1483 = vmatpush.bf16.msrb.mxu1 %v5342_v21  ;;  %v5050_v18 = vor.u32 %v6032_v14, %v5047_v15  ;;  %v6084_v21 = vld [vmem:[%s6814_s9 + $0x24] sm:$0xf]  ;;  %v5255_v22 = vld [vmem:[%s6814_s9 + $0x28] sm:$0xf0]  ;;  %v5253_v36 = vld [vmem:[%s6814_s9 + $0x20] sm:$0xf] }
  0x7f   : > { %v6100_v23 = vld [vmem:[%s6814_s9 + $0xa4] sm:$0xf]  ;;  %v5258_v24 = vor.u32 %v6084_v21, %v5255_v22  ;;  %v5319_v25 = vld [vmem:[%s6814_s9 + $0xa8] sm:$0xf0]  ;;  %v5317_v38 = vld [vmem:[%s6814_s9 + $0xa0] sm:$0xf] }
  0x80   : > { %1573 = vmatpush.bf16.msrb.mxu2 %v5274_v37  ;;  %v6085_v37 = vld [vmem:[%s6814_s9 + $0x24] sm:$0xf0]  ;;  %v6034_v39 = vld [vmem:[#allocation4 + $0x94] sm:$0xf]  ;;  %v5055_v40 = vld [vmem:[#allocation4 + $0x98] sm:$0xf0] }
  0x81   : > { %1662 = vmatpush.bf16.msrb.mxu3 %v5338_v41  ;;  %1395 = vmatpush.bf16.msrb.mxu0 %v5270_v42  ;;  %v5254_v41 = vor.u32 %v6085_v37, %v5253_v36  ;;  %v6101_v42 = vld [vmem:[%s6814_s9 + $0xa4] sm:$0xf0]  ;;  %v5058_v48 = vor.u32 %v6034_v39, %v5055_v40  ;;  %v5061_v60 = vld [vmem:[#allocation4 + $0xa0] sm:$0xf]  ;;  %v6036_v62 = vld [vmem:[#allocation4 + $0xa4] sm:$0xf] }
  0x82   : > { %819 = vmatmul.bf16.gmra.mxu0 %v4990_v2  ;;  %1484 = vmatpush.bf16.msrb.mxu1 %v5334_v45  ;;  %v5318_v43 = vor.u32 %v6101_v42, %v5317_v38  ;;  %v5311_v13 = vld [vmem:[%s6814_s9 + $0x98] sm:$0xf0]  ;;  %v5069_v21 = vld [vmem:[#allocation4 + $0xb0] sm:$0xf]  ;;  %v6039_v22 = vld [vmem:[#allocation4 + $0xb4] sm:$0xf0] }
  0x83   : > { %908 = vmatmul.bf16.gmra.mxu1 %v4994_v3  ;;  %997 = vmatmul.bf16.gmra.mxu2 %v4990_v2  ;;  %v5261_v2 = vld [vmem:[%s6814_s9 + $0x30] sm:$0xf]  ;;  %p5491_p5 = scmp.ge.s32.totalorder %s6631_s24, 4 }
  0x84   : > { %1086 = vmatmul.bf16.gmra.mxu3 %v4994_v3  ;;  %1574 = vmatpush.bf16.msrb.mxu2 %v5266_v61  ;;  %v6087_v3 = vld [vmem:[%s6814_s9 + $0x34] sm:$0xf0]  ;;  %v6037_v61 = vld [vmem:[#allocation4 + $0xa4] sm:$0xf0] }
  0x85   : > { %1663 = vmatpush.bf16.msrb.mxu3 %v5330_v63  ;;  %v5262_v7 = vor.u32 %v6087_v3, %v5261_v2  ;;  %v5063_v63 = vld [vmem:[#allocation4 + $0xa8] sm:$0xf0]  ;;  %v5062_v1 = vor.u32 %v6037_v61, %v5061_v60 }
  0x87   : > { %1396 = vmatpush.bf16.msrb.mxu0 %v5262_v7 }
  0x88   : > { %1575 = vmatpush.bf16.msrb.mxu2 %v5258_v24  ;;  %v5245_v24 = vld [vmem:[%s6814_s9 + $0x10] sm:$0xf] }
  0x8b   : > { %1397 = vmatpush.bf16.msrb.mxu0 %v5254_v41 }
  0x92   : > { %824 = vmatmul.bf16.gmra.mxu0 %v4998_v8 }
  0x93   : > { %913 = vmatmul.bf16.gmra.mxu1 %v5002_v9  ;;  %1002 = vmatmul.bf16.gmra.mxu2 %v4998_v8  ;;  %v6103_v8 = vld [vmem:[%s6814_s9 + $0xb4] sm:$0xf0] }
  0x94   : > { %1091 = vmatmul.bf16.gmra.mxu3 %v5002_v9  ;;  %v5326_v9 = vor.u32 %v6103_v8, %v5325_v4  ;;  %v5066_v4 = vor.u32 %v6036_v62, %v5063_v63 }
  0x96   : > { %1485 = vmatpush.bf16.msrb.mxu1 %v5326_v9  ;;  %v6082_v9 = vld [vmem:[%s6814_s9 + $0x14] sm:$0xf] }
  0x9a   : > { %1486 = vmatpush.bf16.msrb.mxu1 %v5318_v43 }
  0xa2   : > { %829 = vmatmul.bf16.gmra.mxu0 %v5006_v26 }
  0xa3   : > { %918 = vmatmul.bf16.gmra.mxu1 %v5010_v27  ;;  %1007 = vmatmul.bf16.gmra.mxu2 %v5006_v26 }
  0xa4   : > { %1096 = vmatmul.bf16.gmra.mxu3 %v5010_v27  ;;  %v5322_v27 = vor.u32 %v6100_v23, %v5319_v25  ;;  %v6083_v25 = vld [vmem:[%s6814_s9 + $0x14] sm:$0xf0] }
  0xa6   : > { %1664 = vmatpush.bf16.msrb.mxu3 %v5322_v27  ;;  %v6038_v27 = vld [vmem:[#allocation4 + $0xb4] sm:$0xf] }
  0xb2   : > { %834 = vmatmul.bf16.gmra.mxu0 %v5014_v32 }
  0xb3   : > { %923 = vmatmul.bf16.gmra.mxu1 %v5018_v33  ;;  %1012 = vmatmul.bf16.gmra.mxu2 %v5014_v32 }
  0xb4   : > { %1101 = vmatmul.bf16.gmra.mxu3 %v5018_v33  ;;  %v5053_v33 = vld [vmem:[#allocation4 + $0x90] sm:$0xf] }
  0xb5   : > { %v5054_v45 = vor.u32 %v6035_v34, %v5053_v33  ;;  %v5070_v33 = vor.u32 %v6039_v22, %v5069_v21  ;;  %v6097_v22 = vld [vmem:[%s6814_s9 + $0x84] sm:$0xf0] }
  0xc2   : > { %839 = vmatmul.bf16.gmra.mxu0 %v5022_v50 }
  0xc3   : > { %928 = vmatmul.bf16.gmra.mxu1 %v5026_v51  ;;  %1017 = vmatmul.bf16.gmra.mxu2 %v5022_v50 }
  0xc4   : > { %1106 = vmatmul.bf16.gmra.mxu3 %v5026_v51 }
  0xd2   : > { %844 = vmatmul.bf16.gmra.mxu0 %v5030_v56 }
  0xd3   : > { %933 = vmatmul.bf16.gmra.mxu1 %v5034_v57  ;;  %1022 = vmatmul.bf16.gmra.mxu2 %v5030_v56 }
  0xd4   : > { %1111 = vmatmul.bf16.gmra.mxu3 %v5034_v57 }
  0xe2   : > { %849 = vmatmul.bf16.gmra.mxu0 %v5038_v10 }
  0xe3   : > { %938 = vmatmul.bf16.gmra.mxu1 %v5042_v11  ;;  %1027 = vmatmul.bf16.gmra.mxu2 %v5038_v10  ;;  %v5247_v10 = vld [vmem:[%s6814_s9 + $0x18] sm:$0xf0] }
  0xe4   : > { %1116 = vmatmul.bf16.gmra.mxu3 %v5042_v11  ;;  %v6098_v11 = vld [vmem:[%s6814_s9 + $0x94] sm:$0xf]  ;;  %v5250_v12 = vor.u32 %v6082_v9, %v5247_v10 }
  0xe5   : > { %v5314_v15 = vor.u32 %v6098_v11, %v5311_v13  ;;  %v5085_v13 = vld [vmem:[#allocation4 + $0xd0] sm:$0xf] }
  0xe6   : > { %1576 = vmatpush.bf16.msrb.mxu2 %v5250_v12 }
  0xe7   : > { %1665 = vmatpush.bf16.msrb.mxu3 %v5314_v15 }
  0xef   : > { %v815_v17 = vpop.f32.mrf.mxu0 }
  0xf0   : > { %v904_v19 = vpop.f32.mrf.mxu1 }
  0xf1   : > { %v905_v20 = vadd.f32 %v904_v19, %v815_v17 }
  0xf2   : > { %854 = vmatmul.bf16.gmra.mxu0 %v5046_v16 }
  0xf3   : > { %943 = vmatmul.bf16.gmra.mxu1 %v5050_v18  ;;  %1032 = vmatmul.bf16.gmra.mxu2 %v5046_v16 }
  0xf4   : > { %1121 = vmatmul.bf16.gmra.mxu3 %v5050_v18 }
  0xf6   : > { %v993_v26 = vpop.f32.mrf.mxu2 }
  0xf7   : > { %v1082_v28 = vpop.f32.mrf.mxu3  ;;  %v817_v29 = vpop.f32.mrf.mxu0 }
  0xf8   : > { %v1083_v30 = vadd.f32 %v1082_v28, %v993_v26  ;;  %v906_v31 = vpop.f32.mrf.mxu1  ;;  %v5309_v26 = vld [vmem:[%s6814_s9 + $0x90] sm:$0xf]  ;;  %v5071_v28 = vld [vmem:[#allocation4 + $0xb8] sm:$0xf0] }
  0xf9   : > { %v907_v32 = vadd.f32 %v906_v31, %v817_v29  ;;  %v5246_v29 = vor.u32 %v6083_v25, %v5245_v24  ;;  %v5074_v37 = vor.u32 %v6038_v27, %v5071_v28 }
  0xfb   : > { %v6884_v35 = vpack.c.bf16 %v907_v32, %v905_v20  ;;  %1398 = vmatpush.bf16.msrb.mxu0 %v5246_v29 }
  0xfe   : > { %v995_v44 = vpop.f32.mrf.mxu2 }
  0xff   : > { %v1084_v46 = vpop.f32.mrf.mxu3  ;;  %v820_v47 = vpop.f32.mrf.mxu0 }
 0x100   : > { %v1085_v49 = vadd.f32 %v1084_v46, %v995_v44  ;;  %v909_v50 = vpop.f32.mrf.mxu1 }
 0x101   : > { %v910_v51 = vadd.f32 %v909_v50, %v820_v47  ;;  %v6041_v50 = vld [vmem:[#allocation4 + $0xc4] sm:$0xf0] }
 0x102   : > { %v6890_v52 = vpack.c.bf16 %v1085_v49, %v1083_v30  ;;  %859 = vmatmul.bf16.gmra.mxu0 %v5054_v45  ;;  %v6099_v30 = vld [vmem:[%s6814_s9 + $0x94] sm:$0xf0]  ;;  %v5077_v49 = vld [vmem:[#allocation4 + $0xc0] sm:$0xf] }
 0x103   : > { %948 = vmatmul.bf16.gmra.mxu1 %v5058_v48  ;;  %1037 = vmatmul.bf16.gmra.mxu2 %v5054_v45  ;;  %v5310_v31 = vor.u32 %v6099_v30, %v5309_v26 }
 0x104   : > { %1126 = vmatmul.bf16.gmra.mxu3 %v5058_v48 }
 0x105   : > { %1487 = vmatpush.bf16.msrb.mxu1 %v5310_v31 }
 0x106   : > { %v998_v53 = vpop.f32.mrf.mxu2 }
 0x107   : > { %v1087_v54 = vpop.f32.mrf.mxu3  ;;  %v822_v55 = vpop.f32.mrf.mxu0 }
 0x108   : > { %v1088_v56 = vadd.f32 %v1087_v54, %v998_v53  ;;  %v911_v57 = vpop.f32.mrf.mxu1  ;;  %v5079_v53 = vld [vmem:[#allocation4 + $0xc8] sm:$0xf0] }
 0x109   : > { %v912_v58 = vadd.f32 %v911_v57, %v822_v55  ;;  %v5078_v55 = vor.u32 %v6041_v50, %v5077_v49 }
 0x10b   : > { %v6892_v59 = vpack.c.bf16 %v912_v58, %v910_v51  ;;  %v6040_v51 = vld [vmem:[#allocation4 + $0xc4] sm:$0xf] }
 0x10c   : > { %v5082_v58 = vor.u32 %v6040_v51, %v5079_v53 }
 0x10e   : > { %v1000_v0 = vpop.f32.mrf.mxu2 }
 0x10f   : > { %v1089_v2 = vpop.f32.mrf.mxu3  ;;  %v825_v3 = vpop.f32.mrf.mxu0 }
 0x110   : > { %v1090_v5 = vadd.f32 %v1089_v2, %v1000_v0  ;;  %v914_v6 = vpop.f32.mrf.mxu1  ;;  %v6080_v0 = vld [vmem:[%s6814_s9 + $0x4] sm:$0xf] }
 0x111   : > { %v915_v7 = vadd.f32 %v914_v6, %v825_v3  ;;  %v6096_v2 = vld [vmem:[%s6814_s9 + $0x84] sm:$0xf] }
 0x112   : > { %v6894_v8 = vpack.c.bf16 %v1090_v5, %v1088_v56  ;;  %864 = vmatmul.bf16.gmra.mxu0 %v5062_v1 }
 0x113   : > { %953 = vmatmul.bf16.gmra.mxu1 %v5066_v4  ;;  %1042 = vmatmul.bf16.gmra.mxu2 %v5062_v1  ;;  %v5239_v1 = vld [vmem:[%s6814_s9 + $0x8] sm:$0xf0] }
 0x114   : > { %1131 = vmatmul.bf16.gmra.mxu3 %v5066_v4  ;;  %v5242_v3 = vor.u32 %v6080_v0, %v5239_v1  ;;  %v5303_v4 = vld [vmem:[%s6814_s9 + $0x88] sm:$0xf0]  ;;  %v5487_v0 = vld [vmem:[%s6823_s30 + $0xf8] sm:$0xf0] }
 0x115   : > { %v5306_v6 = vor.u32 %v6096_v2, %v5303_v4 }
 0x116   : > { %v1003_v14 = vpop.f32.mrf.mxu2  ;;  %1577 = vmatpush.bf16.msrb.mxu2 %v5242_v3 }
 0x117   : > { %v1092_v16 = vpop.f32.mrf.mxu3  ;;  %v827_v17 = vpop.f32.mrf.mxu0  ;;  %1666 = vmatpush.bf16.msrb.mxu3 %v5306_v6 }
 0x118   : > { %v1093_v18 = vadd.f32 %v1092_v16, %v1003_v14  ;;  %v916_v19 = vpop.f32.mrf.mxu1  ;;  %v6043_v14 = vld [vmem:[#allocation4 + $0xd4] sm:$0xf0]  ;;  %v5237_v16 = vld [vmem:[%s6814_s9] sm:$0xf] }
 0x119   : > { %v917_v20 = vadd.f32 %v916_v19, %v827_v17  ;;  %v6081_v17 = vld [vmem:[%s6814_s9 + $0x4] sm:$0xf0]  ;;  %v6042_v19 = vld [vmem:[#allocation4 + $0xd4] sm:$0xf]  ;;  %v5086_v26 = vor.u32 %v6043_v14, %v5085_v13  ;;  %v6127_v13 = vld [vmem:[%s6823_s30 + $0x74] sm:$0xf0] }
 0x11a   : > { %v5238_v21 = vor.u32 %v6081_v17, %v5237_v16  ;;  %v5485_v14 = vld [vmem:[%s6823_s30 + $0xf0] sm:$0xf]  ;;  %v5103_v17 = vld [vmem:[#allocation4 + $0xf8] sm:$0xf0] }
 0x11b   : > { %v6900_v23 = vpack.c.bf16 %v917_v20, %v915_v7  ;;  %v5087_v20 = vld [vmem:[#allocation4 + $0xd8] sm:$0xf0]  ;;  %v6046_v16 = vld [vmem:[#allocation4 + $0xf4] sm:$0xf] }
 0x11c   : > { %1399 = vmatpush.bf16.msrb.mxu0 %v5238_v21  ;;  %v5090_v29 = vor.u32 %v6042_v19, %v5087_v20  ;;  %v6143_v19 = vld [vmem:[%s6823_s30 + $0xf4] sm:$0xf0] }
 0x11d   : > { %v5486_v20 = vor.u32 %v6143_v19, %v5485_v14 }
 0x11e   : > { %v1005_v32 = vpop.f32.mrf.mxu2 }
 0x11f   : > { %v1094_v34 = vpop.f32.mrf.mxu3  ;;  %v830_v36 = vpop.f32.mrf.mxu0 }
 0x120   : > { %v1095_v38 = vadd.f32 %v1094_v34, %v1005_v32  ;;  %v919_v39 = vpop.f32.mrf.mxu1 }
 0x121   : > { %v920_v40 = vadd.f32 %v919_v39, %v830_v36 }
 0x122   : > { %v6906_v41 = vpack.c.bf16 %v1095_v38, %v1093_v18  ;;  %869 = vmatmul.bf16.gmra.mxu0 %v5070_v33  ;;  %v5301_v18 = vld [vmem:[%s6814_s9 + $0x80] sm:$0xf] }
 0x123   : > { %958 = vmatmul.bf16.gmra.mxu1 %v5074_v37  ;;  %1047 = vmatmul.bf16.gmra.mxu2 %v5070_v33  ;;  %v5302_v24 = vor.u32 %v6097_v22, %v5301_v18 }
 0x124   : > { %1136 = vmatmul.bf16.gmra.mxu3 %v5074_v37 }
 0x125   : > { %1488 = vmatpush.bf16.msrb.mxu1 %v5302_v24 }
 0x126   : > { %v1008_v42 = vpop.f32.mrf.mxu2 }
 0x127   : > { %v1097_v43 = vpop.f32.mrf.mxu3  ;;  %v832_v44 = vpop.f32.mrf.mxu0 }
 0x128   : > { %v1098_v45 = vadd.f32 %v1097_v43, %v1008_v42  ;;  %v921_v46 = vpop.f32.mrf.mxu1  ;;  %v5093_v43 = vld [vmem:[#allocation4 + $0xe0] sm:$0xf] }
 0x129   : > { %v922_v47 = vadd.f32 %v921_v46, %v832_v44  ;;  %v6045_v44 = vld [vmem:[#allocation4 + $0xe4] sm:$0xf0]  ;;  %v5095_v46 = vld [vmem:[#allocation4 + $0xe8] sm:$0xf0]  ;;  %2131 = vmatpush.bf16.msra.mxu1 %v5486_v20 }
 0x12a   : > { %v5094_v49 = vor.u32 %v6045_v44, %v5093_v43 }
 0x12b   : > { %v6908_v48 = vpack.c.bf16 %v922_v47, %v920_v40 }
 0x12e   : > { %v1010_v54 = vpop.f32.mrf.mxu2 }
 0x12f   : > { %v1099_v56 = vpop.f32.mrf.mxu3  ;;  %v835_v57 = vpop.f32.mrf.mxu0 }
 0x130   : > { %v1100_v60 = vadd.f32 %v1099_v56, %v1010_v54  ;;  %v924_v61 = vpop.f32.mrf.mxu1 }
 0x131   : > { %v925_v62 = vadd.f32 %v924_v61, %v835_v57  ;;  %v6142_v61 = vld [vmem:[%s6823_s30 + $0xf4] sm:$0xf] }
 0x132   : > { %v6910_v63 = vpack.c.bf16 %v1100_v60, %v1098_v45  ;;  %874 = vmatmul.bf16.gmra.mxu0 %v5078_v55  ;;  %v6044_v45 = vld [vmem:[#allocation4 + $0xe4] sm:$0xf]  ;;  %v5423_v60 = vld [vmem:[%s6823_s30 + $0x78] sm:$0xf0]  ;;  %v5490_v2 = vor.u32 %v6142_v61, %v5487_v0 }
 0x133   : > { %963 = vmatmul.bf16.gmra.mxu1 %v5082_v58  ;;  %1052 = vmatmul.bf16.gmra.mxu2 %v5078_v55  ;;  %v5098_v53 = vor.u32 %v6044_v45, %v5095_v46 }
 0x134   : > { %1141 = vmatmul.bf16.gmra.mxu3 %v5082_v58  ;;  %v6126_v58 = vld [vmem:[%s6823_s30 + $0x74] sm:$0xf] }
 0x135   : > { %2309 = vmatpush.bf16.msra.mxu3 %v5490_v2  ;;  %v6125_v2 = vld [vmem:[%s6823_s30 + $0x64] sm:$0xf0] }
 0x136   : > { %v1013_v5 = vpop.f32.mrf.mxu2 }
 0x137   : > { %v1102_v7 = vpop.f32.mrf.mxu3  ;;  %v837_v9 = vpop.f32.mrf.mxu0 }
 0x138   : > { %v1103_v10 = vadd.f32 %v1102_v7, %v1013_v5  ;;  %v926_v11 = vpop.f32.mrf.mxu1 }
 0x139   : > { %v927_v12 = vadd.f32 %v926_v11, %v837_v9  ;;  %v5101_v9 = vld [vmem:[#allocation4 + $0xf0] sm:$0xf] }
 0x13b   : > { %v6916_v15 = vpack.c.bf16 %v927_v12, %v925_v62  ;;  %v5426_v62 = vor.u32 %v6126_v58, %v5423_v60  ;;  %v5421_v12 = vld [vmem:[%s6823_s30 + $0x70] sm:$0xf] }
 0x13c   : > { %v5422_v18 = vor.u32 %v6127_v13, %v5421_v12 }
 0x13d   : > { %2220 = vmatpush.bf16.msra.mxu2 %v5426_v62 }
 0x13e   : > { %v1015_v25 = vpop.f32.mrf.mxu2  ;;  %2042 = vmatpush.bf16.msra.mxu0 %v5422_v18 }
 0x13f   : > { %v1104_v27 = vpop.f32.mrf.mxu3  ;;  %v840_v28 = vpop.f32.mrf.mxu0 }
 0x140   : > { %v1105_v30 = vadd.f32 %v1104_v27, %v1015_v25  ;;  %v929_v31 = vpop.f32.mrf.mxu1 }
 0x141   : > { %v930_v32 = vadd.f32 %v929_v31, %v840_v28 }
 0x142   : > { %v6922_v33 = vpack.c.bf16 %v1105_v30, %v1103_v10  ;;  %879 = vmatmul.bf16.gmra.mxu0 %v5086_v26  ;;  %v6047_v10 = vld [vmem:[#allocation4 + $0xf4] sm:$0xf0] }
 0x143   : > { %968 = vmatmul.bf16.gmra.mxu1 %v5090_v29  ;;  %1057 = vmatmul.bf16.gmra.mxu2 %v5086_v26  ;;  %v5102_v22 = vor.u32 %v6047_v10, %v5101_v9  ;;  %v5106_v26 = vor.u32 %v6046_v16, %v5103_v17 }
 0x144   : > { %1146 = vmatmul.bf16.gmra.mxu3 %v5090_v29 }
 0x146   : > { %v1018_v34 = vpop.f32.mrf.mxu2 }
 0x147   : > { %v1107_v36 = vpop.f32.mrf.mxu3  ;;  %v842_v37 = vpop.f32.mrf.mxu0 }
 0x148   : > { %v1108_v38 = vadd.f32 %v1107_v36, %v1018_v34  ;;  %v931_v39 = vpop.f32.mrf.mxu1 }
 0x149   : > { %v932_v40 = vadd.f32 %v931_v39, %v842_v37 }
 0x14b   : > { %v6924_v42 = vpack.c.bf16 %v932_v40, %v930_v32 }
 0x14e   : > { %v1020_v47 = vpop.f32.mrf.mxu2 }
 0x14f   : > { %v1109_v50 = vpop.f32.mrf.mxu3  ;;  %v845_v51 = vpop.f32.mrf.mxu0 }
 0x150   : > { %v1110_v54 = vadd.f32 %v1109_v50, %v1020_v47  ;;  %v934_v55 = vpop.f32.mrf.mxu1  ;;  %v6124_v50 = vld [vmem:[%s6823_s30 + $0x64] sm:$0xf] }
 0x151   : > { %v935_v56 = vadd.f32 %v934_v55, %v845_v51  ;;  %v5415_v51 = vld [vmem:[%s6823_s30 + $0x68] sm:$0xf0] }
 0x152   : > { %v6926_v57 = vpack.c.bf16 %v1110_v54, %v1108_v38  ;;  %884 = vmatmul.bf16.gmra.mxu0 %v5094_v49  ;;  %v5418_v54 = vor.u32 %v6124_v50, %v5415_v51  ;;  %v5479_v55 = vld [vmem:[%s6823_s30 + $0xe8] sm:$0xf0]  ;;  %v6123_v50 = vld [vmem:[%s6823_s30 + $0x54] sm:$0xf0]  ;;  %v5469_v51 = vld [vmem:[%s6823_s30 + $0xd0] sm:$0xf] }
 0x153   : > { %973 = vmatmul.bf16.gmra.mxu1 %v5098_v53  ;;  %1062 = vmatmul.bf16.gmra.mxu2 %v5094_v49 }
 0x154   : > { %1151 = vmatmul.bf16.gmra.mxu3 %v5098_v53  ;;  %v6140_v53 = vld [vmem:[%s6823_s30 + $0xe4] sm:$0xf]  ;;  %2221 = vmatpush.bf16.msra.mxu2 %v5418_v54  ;;  %v6139_v54 = vld [vmem:[%s6823_s30 + $0xd4] sm:$0xf0] }
 0x155   : > { %v5482_v58 = vor.u32 %v6140_v53, %v5479_v55  ;;  %v5470_v55 = vor.u32 %v6139_v54, %v5469_v51 }
 0x156   : > { %v1023_v1 = vpop.f32.mrf.mxu2 }
 0x157   : > { %v1112_v3 = vpop.f32.mrf.mxu3  ;;  %v847_v4 = vpop.f32.mrf.mxu0  ;;  %2310 = vmatpush.bf16.msra.mxu3 %v5482_v58 }
 0x158   : > { %v1113_v5 = vadd.f32 %v1112_v3, %v1023_v1  ;;  %v936_v6 = vpop.f32.mrf.mxu1  ;;  %v5477_v3 = vld [vmem:[%s6823_s30 + $0xe0] sm:$0xf] }
 0x159   : > { %v937_v7 = vadd.f32 %v936_v6, %v847_v4 }
 0x15b   : > { %v6932_v11 = vpack.c.bf16 %v937_v7, %v935_v56 }
 0x15e   : > { %v1025_v21 = vpop.f32.mrf.mxu2 }
 0x15f   : > { %v1114_v24 = vpop.f32.mrf.mxu3  ;;  %v850_v25 = vpop.f32.mrf.mxu0 }
 0x160   : > { %v1115_v27 = vadd.f32 %v1114_v24, %v1025_v21  ;;  %v939_v28 = vpop.f32.mrf.mxu1 }
 0x161   : > { %v940_v29 = vadd.f32 %v939_v28, %v850_v25 }
 0x162   : > { %v6938_v30 = vpack.c.bf16 %v1115_v27, %v1113_v5  ;;  %889 = vmatmul.bf16.gmra.mxu0 %v5102_v22  ;;  %v6141_v5 = vld [vmem:[%s6823_s30 + $0xe4] sm:$0xf0] }
 0x163   : > { %978 = vmatmul.bf16.gmra.mxu1 %v5106_v26  ;;  %1067 = vmatmul.bf16.gmra.mxu2 %v5102_v22  ;;  %v5478_v6 = vor.u32 %v6141_v5, %v5477_v3 }
 0x164   : > { %1156 = vmatmul.bf16.gmra.mxu3 %v5106_v26 }
 0x165   : > { %2132 = vmatpush.bf16.msra.mxu1 %v5478_v6 }
 0x166   : > { %v1028_v31 = vpop.f32.mrf.mxu2 }
 0x167   : > { %v1117_v32 = vpop.f32.mrf.mxu3  ;;  %v852_v34 = vpop.f32.mrf.mxu0 }
 0x168   : > { %v1118_v36 = vadd.f32 %v1117_v32, %v1028_v31  ;;  %v941_v37 = vpop.f32.mrf.mxu1  ;;  %v5407_v32 = vld [vmem:[%s6823_s30 + $0x58] sm:$0xf0] }
 0x169   : > { %v942_v38 = vadd.f32 %v941_v37, %v852_v34  ;;  %v6138_v34 = vld [vmem:[%s6823_s30 + $0xd4] sm:$0xf]  ;;  %v5471_v37 = vld [vmem:[%s6823_s30 + $0xd8] sm:$0xf0]  ;;  %2133 = vmatpush.bf16.msra.mxu1 %v5470_v55 }
 0x16b   : > { %v6940_v39 = vpack.c.bf16 %v942_v38, %v940_v29 }
 0x16e   : > { %v1030_v40 = vpop.f32.mrf.mxu2 }
 0x16f   : > { %v1119_v43 = vpop.f32.mrf.mxu3  ;;  %v855_v44 = vpop.f32.mrf.mxu0 }
 0x170   : > { %v1120_v45 = vadd.f32 %v1119_v43, %v1030_v40  ;;  %v944_v46 = vpop.f32.mrf.mxu1  ;;  %v5474_v40 = vor.u32 %v6138_v34, %v5471_v37 }
 0x171   : > { %v945_v47 = vadd.f32 %v944_v46, %v855_v44 }
 0x172   : > { %v6942_v49 = vpack.c.bf16 %v1120_v45, %v1118_v36  ;;  %1400 = vmatmul.bf16.vlgmr.msrb.gmra.mxu0 %v6884_v35  ;;  %2311 = vmatpush.bf16.msra.mxu3 %v5474_v40 }
 0x173   : > { %1489 = vmatmul.bf16.vlgmr.msrb.gmra.mxu1 %v6890_v52  ;;  %1578 = vmatmul.bf16.vlgmr.msrb.gmra.mxu2 %v6884_v35 }
 0x174   : > { %1667 = vmatmul.bf16.vlgmr.msrb.gmra.mxu3 %v6890_v52  ;;  %v5413_v52 = vld [vmem:[%s6823_s30 + $0x60] sm:$0xf] }
 0x175   : > { %v5414_v4 = vor.u32 %v6125_v2, %v5413_v52 }
 0x176   : > { %v1033_v56 = vpop.f32.mrf.mxu2 }
 0x177   : > { %v1122_v60 = vpop.f32.mrf.mxu3  ;;  %v857_v61 = vpop.f32.mrf.mxu0  ;;  %2043 = vmatpush.bf16.msra.mxu0 %v5414_v4 }
 0x178   : > { %v1123_v62 = vadd.f32 %v1122_v60, %v1033_v56  ;;  %v946_v0 = vpop.f32.mrf.mxu1 }
 0x179   : > { %v947_v35 = vadd.f32 %v946_v0, %v857_v61 }
 0x17b   : > { %v6952_v1 = vpack.c.bf16 %v947_v35, %v945_v47 }
 0x17e   : > { %v1035_v7 = vpop.f32.mrf.mxu2 }
 0x17f   : > { %v1124_v9 = vpop.f32.mrf.mxu3  ;;  %v860_v10 = vpop.f32.mrf.mxu0 }
 0x180   : > { %v1125_v12 = vadd.f32 %v1124_v9, %v1035_v7  ;;  %v949_v13 = vpop.f32.mrf.mxu1 }
 0x181   : > { %v950_v14 = vadd.f32 %v949_v13, %v860_v10 }
 0x182   : > { %v6958_v16 = vpack.c.bf16 %v1125_v12, %v1123_v62  ;;  %1405 = vmatmul.bf16.gmra.mxu0 %v6892_v59 }
 0x183   : > { %1494 = vmatmul.bf16.gmra.mxu1 %v6894_v8  ;;  %1583 = vmatmul.bf16.gmra.mxu2 %v6892_v59 }
 0x184   : > { %1672 = vmatmul.bf16.gmra.mxu3 %v6894_v8  ;;  %v6122_v8 = vld [vmem:[%s6823_s30 + $0x54] sm:$0xf] }
 0x185   : > { %v5410_v36 = vor.u32 %v6122_v8, %v5407_v32  ;;  %v6121_v8 = vld [vmem:[%s6823_s30 + $0x44] sm:$0xf0]  ;;  %v5461_v32 = vld [vmem:[%s6823_s30 + $0xc0] sm:$0xf] }
 0x186   : > { %v1038_v17 = vpop.f32.mrf.mxu2 }
 0x187   : > { %v1127_v18 = vpop.f32.mrf.mxu3  ;;  %v862_v19 = vpop.f32.mrf.mxu0  ;;  %2222 = vmatpush.bf16.msra.mxu2 %v5410_v36  ;;  %v6137_v36 = vld [vmem:[%s6823_s30 + $0xc4] sm:$0xf0] }
 0x188   : > { %v1128_v20 = vadd.f32 %v1127_v18, %v1038_v17  ;;  %v951_v21 = vpop.f32.mrf.mxu1  ;;  %v5399_v18 = vld [vmem:[%s6823_s30 + $0x48] sm:$0xf0]  ;;  %v5462_v37 = vor.u32 %v6137_v36, %v5461_v32 }
 0x189   : > { %v952_v22 = vadd.f32 %v951_v21, %v862_v19  ;;  %v6136_v19 = vld [vmem:[%s6823_s30 + $0xc4] sm:$0xf]  ;;  %v5463_v21 = vld [vmem:[%s6823_s30 + $0xc8] sm:$0xf0] }
 0x18a   : > { %2134 = vmatpush.bf16.msra.mxu1 %v5462_v37 }
 0x18b   : > { %v6964_v24 = vpack.c.bf16 %v952_v22, %v950_v14 }
 0x18e   : > { %v1040_v25 = vpop.f32.mrf.mxu2 }
 0x18f   : > { %v1129_v26 = vpop.f32.mrf.mxu3  ;;  %v865_v27 = vpop.f32.mrf.mxu0 }
 0x190   : > { %v1130_v28 = vadd.f32 %v1129_v26, %v1040_v25  ;;  %v954_v29 = vpop.f32.mrf.mxu1  ;;  %v5466_v25 = vor.u32 %v6136_v19, %v5463_v21  ;;  %v5453_v19 = vld [vmem:[%s6823_s30 + $0xb0] sm:$0xf] }
 0x191   : > { %v955_v59 = vadd.f32 %v954_v29, %v865_v27 }
 0x192   : > { %v6966_v31 = vpack.c.bf16 %v1130_v28, %v1128_v20  ;;  %1410 = vmatmul.bf16.gmra.mxu0 %v6900_v23  ;;  %2312 = vmatpush.bf16.msra.mxu3 %v5466_v25  ;;  %v6135_v25 = vld [vmem:[%s6823_s30 + $0xb4] sm:$0xf0] }
 0x193   : > { %1499 = vmatmul.bf16.gmra.mxu1 %v6906_v41  ;;  %1588 = vmatmul.bf16.gmra.mxu2 %v6900_v23 }
 0x194   : > { %1677 = vmatmul.bf16.gmra.mxu3 %v6906_v41  ;;  %v5405_v41 = vld [vmem:[%s6823_s30 + $0x50] sm:$0xf] }
 0x195   : > { %v5406_v53 = vor.u32 %v6123_v50, %v5405_v41 }
 0x196   : > { %v1043_v38 = vpop.f32.mrf.mxu2 }
 0x197   : > { %v1132_v43 = vpop.f32.mrf.mxu3  ;;  %v867_v44 = vpop.f32.mrf.mxu0  ;;  %2044 = vmatpush.bf16.msra.mxu0 %v5406_v53 }
 0x198   : > { %v1133_v45 = vadd.f32 %v1132_v43, %v1043_v38  ;;  %v956_v46 = vpop.f32.mrf.mxu1 }
 0x199   : > { %v957_v23 = vadd.f32 %v956_v46, %v867_v44 }
 0x19b   : > { %v6976_v47 = vpack.c.bf16 %v957_v23, %v955_v59 }
 0x19e   : > { %v1045_v56 = vpop.f32.mrf.mxu2 }
 0x19f   : > { %v1134_v58 = vpop.f32.mrf.mxu3  ;;  %v870_v60 = vpop.f32.mrf.mxu0 }
 0x1a0   : > { %v1135_v61 = vadd.f32 %v1134_v58, %v1045_v56  ;;  %v959_v62 = vpop.f32.mrf.mxu1 }
 0x1a1   : > { %v960_v0 = vadd.f32 %v959_v62, %v870_v60 }
 0x1a2   : > { %v6982_v35 = vpack.c.bf16 %v1135_v61, %v1133_v45  ;;  %1415 = vmatmul.bf16.gmra.mxu0 %v6908_v48 }
 0x1a3   : > { %1504 = vmatmul.bf16.gmra.mxu1 %v6910_v63  ;;  %1593 = vmatmul.bf16.gmra.mxu2 %v6908_v48 }
 0x1a4   : > { %1682 = vmatmul.bf16.gmra.mxu3 %v6910_v63  ;;  %v6120_v63 = vld [vmem:[%s6823_s30 + $0x44] sm:$0xf] }
 0x1a5   : > { %v5402_v20 = vor.u32 %v6120_v63, %v5399_v18  ;;  %v5389_v63 = vld [vmem:[%s6823_s30 + $0x30] sm:$0xf]  ;;  %v6119_v18 = vld [vmem:[%s6823_s30 + $0x34] sm:$0xf0] }
 0x1a6   : > { %v1048_v52 = vpop.f32.mrf.mxu2 }
 0x1a7   : > { %v1137_v2 = vpop.f32.mrf.mxu3  ;;  %v872_v3 = vpop.f32.mrf.mxu0  ;;  %2223 = vmatpush.bf16.msra.mxu2 %v5402_v20 }
 0x1a8   : > { %v1138_v4 = vadd.f32 %v1137_v2, %v1048_v52  ;;  %v961_v5 = vpop.f32.mrf.mxu1  ;;  %v5391_v2 = vld [vmem:[%s6823_s30 + $0x38] sm:$0xf0] }
 0x1a9   : > { %v962_v6 = vadd.f32 %v961_v5, %v872_v3  ;;  %v6134_v3 = vld [vmem:[%s6823_s30 + $0xb4] sm:$0xf]  ;;  %v5455_v5 = vld [vmem:[%s6823_s30 + $0xb8] sm:$0xf0] }
 0x1ab   : > { %v6988_v7 = vpack.c.bf16 %v962_v6, %v960_v0 }
 0x1ae   : > { %v1050_v9 = vpop.f32.mrf.mxu2 }
 0x1af   : > { %v1139_v10 = vpop.f32.mrf.mxu3  ;;  %v875_v12 = vpop.f32.mrf.mxu0 }
 0x1b0   : > { %v1140_v13 = vadd.f32 %v1139_v10, %v1050_v9  ;;  %v964_v14 = vpop.f32.mrf.mxu1  ;;  %v5458_v9 = vor.u32 %v6134_v3, %v5455_v5 }
 0x1b1   : > { %v965_v48 = vadd.f32 %v964_v14, %v875_v12 }
 0x1b2   : > { %v6990_v17 = vpack.c.bf16 %v1140_v13, %v1138_v4  ;;  %1420 = vmatmul.bf16.gmra.mxu0 %v6916_v15  ;;  %2313 = vmatpush.bf16.msra.mxu3 %v5458_v9  ;;  %v5381_v9 = vld [vmem:[%s6823_s30 + $0x20] sm:$0xf] }
 0x1b3   : > { %1509 = vmatmul.bf16.gmra.mxu1 %v6922_v33  ;;  %1598 = vmatmul.bf16.gmra.mxu2 %v6916_v15 }
 0x1b4   : > { %1687 = vmatmul.bf16.gmra.mxu3 %v6922_v33  ;;  %v5397_v33 = vld [vmem:[%s6823_s30 + $0x40] sm:$0xf] }
 0x1b5   : > { %v5398_v34 = vor.u32 %v6121_v8, %v5397_v33 }
 0x1b6   : > { %v1053_v22 = vpop.f32.mrf.mxu2 }
 0x1b7   : > { %v1142_v26 = vpop.f32.mrf.mxu3  ;;  %v877_v27 = vpop.f32.mrf.mxu0  ;;  %2045 = vmatpush.bf16.msra.mxu0 %v5398_v34 }
 0x1b8   : > { %v1143_v28 = vadd.f32 %v1142_v26, %v1053_v22  ;;  %v966_v29 = vpop.f32.mrf.mxu1  ;;  %v5390_v22 = vor.u32 %v6119_v18, %v5389_v63 }
 0x1b9   : > { %v967_v15 = vadd.f32 %v966_v29, %v877_v27 }
 0x1bb   : > { %v7000_v59 = vpack.c.bf16 %v967_v15, %v965_v48  ;;  %2046 = vmatpush.bf16.msra.mxu0 %v5390_v22 }
 0x1be   : > { %v1055_v38 = vpop.f32.mrf.mxu2 }
 0x1bf   : > { %v1144_v40 = vpop.f32.mrf.mxu3  ;;  %v880_v43 = vpop.f32.mrf.mxu0 }
 0x1c0   : > { %v1145_v44 = vadd.f32 %v1144_v40, %v1055_v38  ;;  %v969_v45 = vpop.f32.mrf.mxu1  ;;  %v1226_v38 = vld [vmem:[%s319_s25] sm:$0x3] }
 0x1c1   : > { %v970_v46 = vadd.f32 %v969_v45, %v880_v43  ;;  %v7040_v43 = vperm.slane %v1226_v38, 0 }
 0x1c2   : > { %v7006_v23 = vpack.c.bf16 %v1145_v44, %v1143_v28  ;;  %1425 = vmatmul.bf16.gmra.mxu0 %v6924_v42  ;;  %v5454_v28 = vor.u32 %v6135_v25, %v5453_v19 }
 0x1c3   : > { %1514 = vmatmul.bf16.gmra.mxu1 %v6926_v57  ;;  %1603 = vmatmul.bf16.gmra.mxu2 %v6924_v42 }
 0x1c4   : > { %1692 = vmatmul.bf16.gmra.mxu3 %v6926_v57  ;;  %v6118_v57 = vld [vmem:[%s6823_s30 + $0x34] sm:$0xf]  ;;  %2135 = vmatpush.bf16.msra.mxu1 %v5454_v28 }
 0x1c5   : > { %v5394_v4 = vor.u32 %v6118_v57, %v5391_v2 }
 0x1c6   : > { %v1058_v41 = vpop.f32.mrf.mxu2 }
 0x1c7   : > { %v1147_v50 = vpop.f32.mrf.mxu3  ;;  %v882_v51 = vpop.f32.mrf.mxu0  ;;  %2224 = vmatpush.bf16.msra.mxu2 %v5394_v4 }
 0x1c8   : > { %v1148_v53 = vadd.f32 %v1147_v50, %v1058_v41  ;;  %v971_v54 = vpop.f32.mrf.mxu1 }
 0x1c9   : > { %v972_v55 = vadd.f32 %v971_v54, %v882_v51  ;;  %v6116_v54 = vld [vmem:[%s6823_s30 + $0x24] sm:$0xf] }
 0x1cb   : > { %v7012_v56 = vpack.c.bf16 %v972_v55, %v970_v46  ;;  %v5383_v55 = vld [vmem:[%s6823_s30 + $0x28] sm:$0xf0] }
 0x1ce   : > { %v1060_v58 = vpop.f32.mrf.mxu2 }
 0x1cf   : > { %v1149_v60 = vpop.f32.mrf.mxu3  ;;  %v885_v61 = vpop.f32.mrf.mxu0 }
 0x1d0   : > { %v1150_v62 = vadd.f32 %v1149_v60, %v1060_v58  ;;  %v974_v0 = vpop.f32.mrf.mxu1  ;;  %v5386_v58 = vor.u32 %v6116_v54, %v5383_v55  ;;  %v6132_v60 = vld [vmem:[%s6823_s30 + $0xa4] sm:$0xf] }
 0x1d1   : > { %v975_v42 = vadd.f32 %v974_v0, %v885_v61  ;;  %v5447_v61 = vld [vmem:[%s6823_s30 + $0xa8] sm:$0xf0] }
 0x1d2   : > { %v7014_v52 = vpack.c.bf16 %v1150_v62, %v1148_v53  ;;  %1430 = vmatmul.bf16.gmra.mxu0 %v6932_v11  ;;  %v7048_v53 = vperm.slane %v1226_v38, 1  ;;  %v5450_v0 = vor.u32 %v6132_v60, %v5447_v61  ;;  %2225 = vmatpush.bf16.msra.mxu2 %v5386_v58 }
 0x1d3   : > { %1519 = vmatmul.bf16.gmra.mxu1 %v6938_v30  ;;  %1608 = vmatmul.bf16.gmra.mxu2 %v6932_v11 }
 0x1d4   : > { %1697 = vmatmul.bf16.gmra.mxu3 %v6938_v30 }
 0x1d5   : > { %2314 = vmatpush.bf16.msra.mxu3 %v5450_v0  ;;  %v5375_v0 = vld [vmem:[%s6823_s30 + $0x18] sm:$0xf0] }
 0x1d6   : > { %v1063_v6 = vpop.f32.mrf.mxu2 }
 0x1d7   : > { %v1152_v10 = vpop.f32.mrf.mxu3  ;;  %v887_v12 = vpop.f32.mrf.mxu0 }
 0x1d8   : > { %v1153_v13 = vadd.f32 %v1152_v10, %v1063_v6  ;;  %v976_v14 = vpop.f32.mrf.mxu1  ;;  %v6117_v10 = vld [vmem:[%s6823_s30 + $0x24] sm:$0xf0] }
 0x1d9   : > { %v977_v11 = vadd.f32 %v976_v14, %v887_v12  ;;  %v5382_v12 = vor.u32 %v6117_v10, %v5381_v9  ;;  %v6133_v14 = vld [vmem:[%s6823_s30 + $0xa4] sm:$0xf0] }
 0x1db   : > { %v7024_v48 = vpack.c.bf16 %v977_v11, %v975_v42  ;;  %2047 = vmatpush.bf16.msra.mxu0 %v5382_v12 }
 0x1de   : > { %v1065_v30 = vpop.f32.mrf.mxu2 }
 0x1df   : > { %v1154_v20 = vpop.f32.mrf.mxu3  ;;  %v890_v21 = vpop.f32.mrf.mxu0 }
 0x1e0   : > { %v1155_v26 = vadd.f32 %v1154_v20, %v1065_v30  ;;  %v979_v27 = vpop.f32.mrf.mxu1 }
 0x1e1   : > { %v980_v29 = vadd.f32 %v979_v27, %v890_v21 }
 0x1e2   : > { %v7030_v15 = vpack.c.bf16 %v1155_v26, %v1153_v13  ;;  %1435 = vmatmul.bf16.gmra.mxu0 %v6940_v39  ;;  %v5445_v13 = vld [vmem:[%s6823_s30 + $0xa0] sm:$0xf] }
 0x1e3   : > { %1524 = vmatmul.bf16.gmra.mxu1 %v6942_v49  ;;  %1613 = vmatmul.bf16.gmra.mxu2 %v6940_v39  ;;  %v5446_v63 = vor.u32 %v6133_v14, %v5445_v13  ;;  %v5373_v14 = vld [vmem:[%s6823_s30 + $0x10] sm:$0xf] }
 0x1e4   : > { %1702 = vmatmul.bf16.gmra.mxu3 %v6942_v49 }
 0x1e5   : > { %2136 = vmatpush.bf16.msra.mxu1 %v5446_v63 }
 0x1e6   : > { %v1068_v33 = vpop.f32.mrf.mxu2 }
 0x1e7   : > { %v1157_v8 = vpop.f32.mrf.mxu3  ;;  %v892_v32 = vpop.f32.mrf.mxu0 }
 0x1e8   : > { %v1158_v34 = vadd.f32 %v1157_v8, %v1068_v33  ;;  %v981_v36 = vpop.f32.mrf.mxu1 }
 0x1e9   : > { %v982_v37 = vadd.f32 %v981_v36, %v892_v32 }
 0x1eb   : > { %v7038_v40 = vpack.c.bf16 %v982_v37, %v980_v29 }
 0x1ee   : > { %v1070_v44 = vpop.f32.mrf.mxu2 }
 0x1ef   : > { %v1159_v45 = vpop.f32.mrf.mxu3  ;;  %v1401_v39 = vpop.f32.mrf.mxu0 }
 0x1f0   : > { %v1160_v49 = vadd.f32 %v1159_v45, %v1070_v44  ;;  %v1402_v46 = vadd.f32 %v1401_v39, %v7040_v43  ;;  %v1490_v41 = vpop.f32.mrf.mxu1 }
 0x1f2   : > { %v7043_v50 = vpack.c.bf16 %v1160_v49, %v1158_v34  ;;  %v1491_v51 = vadd.f32 %v1490_v41, %v1402_v46  ;;  %1440 = vmatmul.bf16.gmra.mxu0 %v6952_v1 }
 0x1f3   : > { %1529 = vmatmul.bf16.gmra.mxu1 %v6958_v16  ;;  %1618 = vmatmul.bf16.gmra.mxu2 %v6952_v1 }
 0x1f4   : > { %1707 = vmatmul.bf16.gmra.mxu3 %v6958_v16  ;;  %v1748_v5 = vmax.f32 %v1491_v51, 0.0 }
 0x1f6   : > { %v1579_v62 = vpop.f32.mrf.mxu2 }
 0x1f7   : > { %v1580_v42 = vadd.f32 %v1579_v62, %v7048_v53  ;;  %v1668_v57 = vpop.f32.mrf.mxu3  ;;  %v1403_v2 = vpop.f32.mrf.mxu0  ;;  %v6114_v62 = vld [vmem:[%s6823_s30 + $0x14] sm:$0xf] }
 0x1f8   : > { %v1404_v1 = vadd.f32 %v1403_v2, %v7040_v43  ;;  %v1492_v3 = vpop.f32.mrf.mxu1  ;;  %v5439_v2 = vld [vmem:[%s6823_s30 + $0x98] sm:$0xf0] }
 0x1f9   : > { %v1669_v16 = vadd.f32 %v1668_v57, %v1580_v42  ;;  %v5378_v42 = vor.u32 %v6114_v62, %v5375_v0  ;;  %v6130_v57 = vld [vmem:[%s6823_s30 + $0x94] sm:$0xf] }
 0x1fa   : > { %v1493_v4 = vadd.f32 %v1492_v3, %v1404_v1 }
 0x1fb   : > { %v1749_v27 = vmax.f32 %v1669_v16, 0.0  ;;  %v5442_v16 = vor.u32 %v6130_v57, %v5439_v2  ;;  %2226 = vmatpush.bf16.msra.mxu2 %v5378_v42 }
 0x1fc   : > { %v1750_v6 = vmax.f32 %v1493_v4, 0.0 }
 0x1fd   : > { %2315 = vmatpush.bf16.msra.mxu3 %v5442_v16  ;;  %v5367_v16 = vld [vmem:[%s6823_s30 + $0x8] sm:$0xf0] }
 0x1fe   : > { %v7061_v11 = vpack.c.bf16 %v1750_v6, %v1748_v5  ;;  %v1581_v30 = vpop.f32.mrf.mxu2 }
 0x1ff   : > { %v1582_v18 = vadd.f32 %v1581_v30, %v7048_v53  ;;  %v1670_v19 = vpop.f32.mrf.mxu3  ;;  %v1406_v20 = vpop.f32.mrf.mxu0  ;;  %v6115_v30 = vld [vmem:[%s6823_s30 + $0x14] sm:$0xf0] }
 0x200   : > { %v1407_v21 = vadd.f32 %v1406_v20, %v7040_v43  ;;  %v1495_v22 = vpop.f32.mrf.mxu1  ;;  %v5374_v63 = vor.u32 %v6115_v30, %v5373_v14 }
 0x201   : > { %v1671_v25 = vadd.f32 %v1670_v19, %v1582_v18  ;;  %v5437_v18 = vld [vmem:[%s6823_s30 + $0x90] sm:$0xf]  ;;  %v6131_v19 = vld [vmem:[%s6823_s30 + $0x94] sm:$0xf0] }
 0x202   : > { %v1496_v26 = vadd.f32 %v1495_v22, %v1407_v21  ;;  %1445 = vmatmul.bf16.gmra.mxu0 %v6964_v24  ;;  %v5438_v21 = vor.u32 %v6131_v19, %v5437_v18  ;;  %v5365_v19 = vld [vmem:[%s6823_s30] sm:$0xf] }
 0x203   : > { %v1751_v28 = vmax.f32 %v1671_v25, 0.0  ;;  %1534 = vmatmul.bf16.gmra.mxu1 %v6966_v31  ;;  %1623 = vmatmul.bf16.gmra.mxu2 %v6964_v24 }
 0x204   : > { %1712 = vmatmul.bf16.gmra.mxu3 %v6966_v31  ;;  %v1752_v45 = vmax.f32 %v1496_v26, 0.0  ;;  %2048 = vmatpush.bf16.msra.mxu0 %v5374_v63 }
 0x205   : > { %v7069_v29 = vpack.c.bf16 %v1751_v28, %v1749_v27  ;;  %2137 = vmatpush.bf16.msra.mxu1 %v5438_v21 }
 0x206   : > { %v1584_v33 = vpop.f32.mrf.mxu2 }
 0x207   : > { %v1585_v8 = vadd.f32 %v1584_v33, %v7048_v53  ;;  %v1673_v32 = vpop.f32.mrf.mxu3  ;;  %v1408_v34 = vpop.f32.mrf.mxu0 }
 0x208   : > { %v1409_v36 = vadd.f32 %v1408_v34, %v7040_v43  ;;  %v1497_v37 = vpop.f32.mrf.mxu1 }
 0x209   : > { %v1674_v38 = vadd.f32 %v1673_v32, %v1585_v8 }
 0x20a   : > { %v1498_v44 = vadd.f32 %v1497_v37, %v1409_v36 }
 0x20b   : > { %v1753_v60 = vmax.f32 %v1674_v38, 0.0 }
 0x20c   : > { %v1754_v39 = vmax.f32 %v1498_v44, 0.0 }
 0x20e   : > { %v1586_v49 = vpop.f32.mrf.mxu2  ;;  %v7073_v24 = vpack.c.bf16 %v1754_v39, %v1752_v45 }
 0x20f   : > { %v1587_v31 = vadd.f32 %v1586_v49, %v7048_v53  ;;  %v1675_v46 = vpop.f32.mrf.mxu3  ;;  %v1411_v41 = vpop.f32.mrf.mxu0 }
 0x210   : > { %v1412_v51 = vadd.f32 %v1411_v41, %v7040_v43  ;;  %v1500_v54 = vpop.f32.mrf.mxu1 }
 0x211   : > { %v1676_v55 = vadd.f32 %v1675_v46, %v1587_v31 }
 0x212   : > { %v1501_v58 = vadd.f32 %v1500_v54, %v1412_v51  ;;  %1450 = vmatmul.bf16.gmra.mxu0 %v6976_v47 }
 0x213   : > { %v1755_v61 = vmax.f32 %v1676_v55, 0.0  ;;  %1539 = vmatmul.bf16.gmra.mxu1 %v6982_v35  ;;  %1628 = vmatmul.bf16.gmra.mxu2 %v6976_v47 }
 0x214   : > { %1717 = vmatmul.bf16.gmra.mxu3 %v6982_v35  ;;  %v1756_v12 = vmax.f32 %v1501_v58, 0.0 }
 0x215   : > { %v7085_v1 = vpack.c.bf16 %v1755_v61, %v1753_v60 }
 0x216   : > { %v1589_v3 = vpop.f32.mrf.mxu2 }
 0x217   : > { %v1590_v4 = vadd.f32 %v1589_v3, %v7048_v53  ;;  %v1678_v5 = vpop.f32.mrf.mxu3  ;;  %v1413_v6 = vpop.f32.mrf.mxu0  ;;  %v6112_v3 = vld [vmem:[%s6823_s30 + $0x4] sm:$0xf] }
 0x218   : > { %v1414_v47 = vadd.f32 %v1413_v6, %v7040_v43  ;;  %v1502_v35 = vpop.f32.mrf.mxu1  ;;  %v5431_v6 = vld [vmem:[%s6823_s30 + $0x88] sm:$0xf0] }
 0x219   : > { %v1679_v9 = vadd.f32 %v1678_v5, %v1590_v4  ;;  %v5370_v4 = vor.u32 %v6112_v3, %v5367_v16  ;;  %v6128_v5 = vld [vmem:[%s6823_s30 + $0x84] sm:$0xf] }
 0x21a   : > { %v1503_v10 = vadd.f32 %v1502_v35, %v1414_v47 }
 0x21b   : > { %v1757_v34 = vmax.f32 %v1679_v9, 0.0  ;;  %v5434_v9 = vor.u32 %v6128_v5, %v5431_v6  ;;  %2227 = vmatpush.bf16.msra.mxu2 %v5370_v4 }
 0x21c   : > { %v1758_v13 = vmax.f32 %v1503_v10, 0.0 }
 0x21d   : > { %2316 = vmatpush.bf16.msra.mxu3 %v5434_v9 }
 0x21e   : > { %v1591_v20 = vpop.f32.mrf.mxu2  ;;  %v7093_v22 = vpack.c.bf16 %v1758_v13, %v1756_v12 }
 0x21f   : > { %v1592_v25 = vadd.f32 %v1591_v20, %v7048_v53  ;;  %v1680_v26 = vpop.f32.mrf.mxu3  ;;  %v1416_v27 = vpop.f32.mrf.mxu0  ;;  %v6113_v20 = vld [vmem:[%s6823_s30 + $0x4] sm:$0xf0] }
 0x220   : > { %v1417_v28 = vadd.f32 %v1416_v27, %v7040_v43  ;;  %v1505_v33 = vpop.f32.mrf.mxu1  ;;  %v5366_v21 = vor.u32 %v6113_v20, %v5365_v19 }
 0x221   : > { %v1681_v8 = vadd.f32 %v1680_v26, %v1592_v25  ;;  %v5429_v25 = vld [vmem:[%s6823_s30 + $0x80] sm:$0xf]  ;;  %v6129_v26 = vld [vmem:[%s6823_s30 + $0x84] sm:$0xf0] }
 0x222   : > { %v1506_v32 = vadd.f32 %v1505_v33, %v1417_v28  ;;  %1455 = vmatmul.bf16.gmra.mxu0 %v6988_v7  ;;  %v5430_v28 = vor.u32 %v6129_v26, %v5429_v25 }
 0x223   : > { %v1759_v36 = vmax.f32 %v1681_v8, 0.0  ;;  %1544 = vmatmul.bf16.gmra.mxu1 %v6990_v17  ;;  %1633 = vmatmul.bf16.gmra.mxu2 %v6988_v7 }
 0x224   : > { %1722 = vmatmul.bf16.gmra.mxu3 %v6990_v17  ;;  %v1760_v51 = vmax.f32 %v1506_v32, 0.0  ;;  %2049 = vmatpush.bf16.msra.mxu0 %v5366_v21 }
 0x225   : > { %v7101_v37 = vpack.c.bf16 %v1759_v36, %v1757_v34  ;;  %2138 = vmatpush.bf16.msra.mxu1 %v5430_v28 }
 0x226   : > { %v1594_v38 = vpop.f32.mrf.mxu2 }
 0x227   : > { %v1595_v44 = vadd.f32 %v1594_v38, %v7048_v53  ;;  %v1683_v45 = vpop.f32.mrf.mxu3  ;;  %v1418_v39 = vpop.f32.mrf.mxu0 }
 0x228   : > { %v1419_v49 = vadd.f32 %v1418_v39, %v7040_v43  ;;  %v1507_v31 = vpop.f32.mrf.mxu1 }
 0x229   : > { %v1684_v46 = vadd.f32 %v1683_v45, %v1595_v44 }
 0x22a   : > { %v1508_v41 = vadd.f32 %v1507_v31, %v1419_v49 }
 0x22b   : > { %v1761_v57 = vmax.f32 %v1684_v46, 0.0 }
 0x22c   : > { %v1762_v54 = vmax.f32 %v1508_v41, 0.0 }
 0x22e   : > { %v1596_v55 = vpop.f32.mrf.mxu2  ;;  %v7105_v7 = vpack.c.bf16 %v1762_v54, %v1760_v51 }
 0x22f   : > { %v1597_v17 = vadd.f32 %v1596_v55, %v7048_v53  ;;  %v1685_v58 = vpop.f32.mrf.mxu3  ;;  %v1421_v60 = vpop.f32.mrf.mxu0 }
 0x230   : > { %v1422_v61 = vadd.f32 %v1421_v60, %v7040_v43  ;;  %v1510_v62 = vpop.f32.mrf.mxu1 }
 0x231   : > { %v1686_v0 = vadd.f32 %v1685_v58, %v1597_v17 }
 0x232   : > { %v1511_v42 = vadd.f32 %v1510_v62, %v1422_v61  ;;  %1460 = vmatmul.bf16.gmra.mxu0 %v7000_v59 }
 0x233   : > { %v1763_v2 = vmax.f32 %v1686_v0, 0.0  ;;  %1549 = vmatmul.bf16.gmra.mxu1 %v7006_v23  ;;  %1638 = vmatmul.bf16.gmra.mxu2 %v7000_v59 }
 0x234   : > { %1727 = vmatmul.bf16.gmra.mxu3 %v7006_v23  ;;  %v1764_v63 = vmax.f32 %v1511_v42, 0.0 }
 0x235   : > { %v7117_v47 = vpack.c.bf16 %v1763_v2, %v1761_v57 }
 0x236   : > { %v1599_v35 = vpop.f32.mrf.mxu2 }
 0x237   : > { %v1600_v10 = vadd.f32 %v1599_v35, %v7048_v53  ;;  %v1688_v12 = vpop.f32.mrf.mxu3  ;;  %v1423_v13 = vpop.f32.mrf.mxu0 }
 0x238   : > { %v1424_v59 = vadd.f32 %v1423_v13, %v7040_v43  ;;  %v1512_v23 = vpop.f32.mrf.mxu1 }
 0x239   : > { %v1689_v14 = vadd.f32 %v1688_v12, %v1600_v10 }
 0x23a   : > { %v1513_v30 = vadd.f32 %v1512_v23, %v1424_v59 }
 0x23b   : > { %v1765_v39 = vmax.f32 %v1689_v14, 0.0 }
 0x23c   : > { %v1766_v18 = vmax.f32 %v1513_v30, 0.0 }
 0x23e   : > { %v1601_v27 = vpop.f32.mrf.mxu2  ;;  %v7125_v33 = vpack.c.bf16 %v1766_v18, %v1764_v63 }
 0x23f   : > { %v1602_v8 = vadd.f32 %v1601_v27, %v7048_v53  ;;  %v1690_v32 = vpop.f32.mrf.mxu3  ;;  %v1426_v34 = vpop.f32.mrf.mxu0 }
 0x240   : > { %v1427_v36 = vadd.f32 %v1426_v34, %v7040_v43  ;;  %v1515_v38 = vpop.f32.mrf.mxu1 }
 0x241   : > { %v1691_v44 = vadd.f32 %v1690_v32, %v1602_v8 }
 0x242   : > { %v1516_v45 = vadd.f32 %v1515_v38, %v1427_v36  ;;  %1465 = vmatmul.bf16.gmra.mxu0 %v7012_v56 }
 0x243   : > { %v1767_v49 = vmax.f32 %v1691_v44, 0.0  ;;  %1554 = vmatmul.bf16.gmra.mxu1 %v7014_v52  ;;  %1643 = vmatmul.bf16.gmra.mxu2 %v7012_v56 }
 0x244   : > { %1732 = vmatmul.bf16.gmra.mxu3 %v7014_v52  ;;  %v1768_v61 = vmax.f32 %v1516_v45, 0.0 }
 0x245   : > { %v7133_v31 = vpack.c.bf16 %v1767_v49, %v1765_v39 }
 0x246   : > { %v1604_v46 = vpop.f32.mrf.mxu2 }
 0x247   : > { %v1605_v41 = vadd.f32 %v1604_v46, %v7048_v53  ;;  %v1693_v51 = vpop.f32.mrf.mxu3  ;;  %v1428_v54 = vpop.f32.mrf.mxu0 }
 0x248   : > { %v1429_v55 = vadd.f32 %v1428_v54, %v7040_v43  ;;  %v1517_v17 = vpop.f32.mrf.mxu1 }
 0x249   : > { %v1694_v58 = vadd.f32 %v1693_v51, %v1605_v41 }
 0x24a   : > { %v1518_v60 = vadd.f32 %v1517_v17, %v1429_v55 }
 0x24b   : > { %v1769_v5 = vmax.f32 %v1694_v58, 0.0 }
 0x24c   : > { %v1770_v62 = vmax.f32 %v1518_v60, 0.0 }
 0x24e   : > { %v1606_v0 = vpop.f32.mrf.mxu2  ;;  %v7137_v42 = vpack.c.bf16 %v1770_v62, %v1768_v61 }
 0x24f   : > { %v1607_v56 = vadd.f32 %v1606_v0, %v7048_v53  ;;  %v1695_v52 = vpop.f32.mrf.mxu3  ;;  %v1431_v57 = vpop.f32.mrf.mxu0 }
 0x250   : > { %v1432_v2 = vadd.f32 %v1431_v57, %v7040_v43  ;;  %v1520_v3 = vpop.f32.mrf.mxu1 }
 0x251   : > { %v1696_v16 = vadd.f32 %v1695_v52, %v1607_v56 }
 0x252   : > { %v1521_v4 = vadd.f32 %v1520_v3, %v1432_v2  ;;  %1470 = vmatmul.bf16.gmra.mxu0 %v7024_v48 }
 0x253   : > { %v1771_v6 = vmax.f32 %v1696_v16, 0.0  ;;  %1559 = vmatmul.bf16.gmra.mxu1 %v7030_v15  ;;  %1648 = vmatmul.bf16.gmra.mxu2 %v7024_v48 }
 0x254   : > { %1737 = vmatmul.bf16.gmra.mxu3 %v7030_v15  ;;  %v1772_v63 = vmax.f32 %v1521_v4, 0.0 }
 0x255   : > { %v7145_v35 = vpack.c.bf16 %v1771_v6, %v1769_v5 }
 0x256   : > { %v1609_v9 = vpop.f32.mrf.mxu2 }
 0x257   : > { %v1610_v10 = vadd.f32 %v1609_v9, %v7048_v53  ;;  %v1698_v12 = vpop.f32.mrf.mxu3  ;;  %v1433_v13 = vpop.f32.mrf.mxu0 }
 0x258   : > { %v1434_v59 = vadd.f32 %v1433_v13, %v7040_v43  ;;  %v1522_v23 = vpop.f32.mrf.mxu1 }
 0x259   : > { %v1699_v14 = vadd.f32 %v1698_v12, %v1610_v10 }
 0x25a   : > { %v1523_v30 = vadd.f32 %v1522_v23, %v1434_v59 }
 0x25b   : > { %v1773_v8 = vmax.f32 %v1699_v14, 0.0 }
 0x25c   : > { %v1774_v18 = vmax.f32 %v1523_v30, 0.0 }
 0x25e   : > { %v1611_v19 = vpop.f32.mrf.mxu2  ;;  %v7149_v20 = vpack.c.bf16 %v1774_v18, %v1772_v63 }
 0x25f   : > { %v1612_v48 = vadd.f32 %v1611_v19, %v7048_v53  ;;  %v1700_v15 = vpop.f32.mrf.mxu3  ;;  %v1436_v21 = vpop.f32.mrf.mxu0 }
 0x260   : > { %v1437_v25 = vadd.f32 %v1436_v21, %v7040_v43  ;;  %v1525_v26 = vpop.f32.mrf.mxu1 }
 0x261   : > { %v1701_v27 = vadd.f32 %v1700_v15, %v1612_v48 }
 0x262   : > { %v1526_v28 = vadd.f32 %v1525_v26, %v1437_v25  ;;  %1475 = vmatmul.bf16.gmra.mxu0 %v7038_v40 }
 0x263   : > { %v1775_v32 = vmax.f32 %v1701_v27, 0.0  ;;  %1564 = vmatmul.bf16.gmra.mxu1 %v7043_v50  ;;  %1653 = vmatmul.bf16.gmra.mxu2 %v7038_v40 }
 0x264   : > { %1742 = vmatmul.bf16.gmra.mxu3 %v7043_v50  ;;  %v1776_v51 = vmax.f32 %v1526_v28, 0.0 }
 0x265   : > { %v7157_v34 = vpack.c.bf16 %v1775_v32, %v1773_v8 }
 0x266   : > { %v1614_v36 = vpop.f32.mrf.mxu2 }
 0x267   : > { %v1615_v38 = vadd.f32 %v1614_v36, %v7048_v53  ;;  %v1703_v44 = vpop.f32.mrf.mxu3  ;;  %v1438_v45 = vpop.f32.mrf.mxu0 }
 0x268   : > { %v1439_v39 = vadd.f32 %v1438_v45, %v7040_v43  ;;  %v1527_v49 = vpop.f32.mrf.mxu1 }
 0x269   : > { %v1704_v46 = vadd.f32 %v1703_v44, %v1615_v38 }
 0x26a   : > { %v1528_v41 = vadd.f32 %v1527_v49, %v1439_v39 }
 0x26b   : > { %v1777_v56 = vmax.f32 %v1704_v46, 0.0 }
 0x26c   : > { %v1778_v54 = vmax.f32 %v1528_v41, 0.0 }
 0x26e   : > { %v1616_v55 = vpop.f32.mrf.mxu2  ;;  %v7161_v17 = vpack.c.bf16 %v1778_v54, %v1776_v51 }
 0x26f   : > { %v1617_v40 = vadd.f32 %v1616_v55, %v7048_v53  ;;  %v1705_v50 = vpop.f32.mrf.mxu3  ;;  %v1441_v58 = vpop.f32.mrf.mxu0 }
 0x270   : > { %v1442_v60 = vadd.f32 %v1441_v58, %v7040_v43  ;;  %v1530_v61 = vpop.f32.mrf.mxu1 }
 0x271   : > { %v1706_v62 = vadd.f32 %v1705_v50, %v1617_v40 }
 0x272   : > { %v1531_v0 = vadd.f32 %v1530_v61, %v1442_v60  ;;  %2050 = vmatmul.bf16.vlgmr.msra.gmra.mxu0 %v7061_v11 }
 0x273   : > { %v1779_v52 = vmax.f32 %v1706_v62, 0.0  ;;  %2139 = vmatmul.bf16.vlgmr.msra.gmra.mxu1 %v7069_v29  ;;  %2228 = vmatmul.bf16.vlgmr.msra.gmra.mxu2 %v7061_v11 }
 0x274   : > { %2317 = vmatmul.bf16.vlgmr.msra.gmra.mxu3 %v7069_v29  ;;  %v1780_v12 = vmax.f32 %v1531_v0, 0.0 }
 0x275   : > { %v7169_v57 = vpack.c.bf16 %v1779_v52, %v1777_v56 }
 0x276   : > { %v1619_v2 = vpop.f32.mrf.mxu2 }
 0x277   : > { %v1620_v3 = vadd.f32 %v1619_v2, %v7048_v53  ;;  %v1708_v16 = vpop.f32.mrf.mxu3  ;;  %v1443_v4 = vpop.f32.mrf.mxu0 }
 0x278   : > { %v1444_v5 = vadd.f32 %v1443_v4, %v7040_v43  ;;  %v1532_v6 = vpop.f32.mrf.mxu1 }
 0x279   : > { %v1709_v9 = vadd.f32 %v1708_v16, %v1620_v3 }
 0x27a   : > { %v1533_v10 = vadd.f32 %v1532_v6, %v1444_v5 }
 0x27b   : > { %v1781_v48 = vmax.f32 %v1709_v9, 0.0 }
 0x27c   : > { %v1782_v13 = vmax.f32 %v1533_v10, 0.0 }
 0x27e   : > { %v1621_v59 = vpop.f32.mrf.mxu2  ;;  %v7173_v23 = vpack.c.bf16 %v1782_v13, %v1780_v12 }
 0x27f   : > { %v1622_v11 = vadd.f32 %v1621_v59, %v7048_v53  ;;  %v1710_v29 = vpop.f32.mrf.mxu3  ;;  %v1446_v14 = vpop.f32.mrf.mxu0 }
 0x280   : > { %v1447_v30 = vadd.f32 %v1446_v14, %v7040_v43  ;;  %v1535_v63 = vpop.f32.mrf.mxu1 }
 0x281   : > { %v1711_v18 = vadd.f32 %v1710_v29, %v1622_v11 }
 0x282   : > { %v1536_v19 = vadd.f32 %v1535_v63, %v1447_v30  ;;  %2055 = vmatmul.bf16.gmra.mxu0 %v7073_v24 }
 0x283   : > { %v1783_v15 = vmax.f32 %v1711_v18, 0.0  ;;  %2144 = vmatmul.bf16.gmra.mxu1 %v7085_v1  ;;  %2233 = vmatmul.bf16.gmra.mxu2 %v7073_v24 }
 0x284   : > { %2322 = vmatmul.bf16.gmra.mxu3 %v7085_v1  ;;  %v1784_v44 = vmax.f32 %v1536_v19, 0.0 }
 0x285   : > { %v7181_v21 = vpack.c.bf16 %v1783_v15, %v1781_v48 }
 0x286   : > { %v1624_v25 = vpop.f32.mrf.mxu2 }
 0x287   : > { %v1625_v26 = vadd.f32 %v1624_v25, %v7048_v53  ;;  %v1713_v27 = vpop.f32.mrf.mxu3  ;;  %v1448_v28 = vpop.f32.mrf.mxu0 }
 0x288   : > { %v1449_v8 = vadd.f32 %v1448_v28, %v7040_v43  ;;  %v1537_v32 = vpop.f32.mrf.mxu1 }
 0x289   : > { %v1714_v36 = vadd.f32 %v1713_v27, %v1625_v26 }
 0x28a   : > { %v1538_v38 = vadd.f32 %v1537_v32, %v1449_v8 }
 0x28b   : > { %v1785_v40 = vmax.f32 %v1714_v36, 0.0 }
 0x28c   : > { %v1786_v45 = vmax.f32 %v1538_v38, 0.0 }
 0x28e   : > { %v1626_v39 = vpop.f32.mrf.mxu2  ;;  %v7185_v49 = vpack.c.bf16 %v1786_v45, %v1784_v44 }
 0x28f   : > { %v1627_v24 = vadd.f32 %v1626_v39, %v7048_v53  ;;  %v1715_v1 = vpop.f32.mrf.mxu3  ;;  %v1451_v46 = vpop.f32.mrf.mxu0 }
 0x290   : > { %v1452_v41 = vadd.f32 %v1451_v46, %v7040_v43  ;;  %v1540_v51 = vpop.f32.mrf.mxu1 }
 0x291   : > { %v1716_v54 = vadd.f32 %v1715_v1, %v1627_v24 }
 0x292   : > { %v1541_v55 = vadd.f32 %v1540_v51, %v1452_v41  ;;  %2060 = vmatmul.bf16.gmra.mxu0 %v7093_v22 }
 0x293   : > { %v1787_v50 = vmax.f32 %v1716_v54, 0.0  ;;  %2149 = vmatmul.bf16.gmra.mxu1 %v7101_v37  ;;  %2238 = vmatmul.bf16.gmra.mxu2 %v7093_v22 }
 0x294   : > { %2327 = vmatmul.bf16.gmra.mxu3 %v7101_v37  ;;  %v1788_v16 = vmax.f32 %v1541_v55, 0.0 }
 0x295   : > { %v7193_v58 = vpack.c.bf16 %v1787_v50, %v1785_v40 }
 0x296   : > { %v1629_v60 = vpop.f32.mrf.mxu2 }
 0x297   : > { %v1630_v61 = vadd.f32 %v1629_v60, %v7048_v53  ;;  %v1718_v62 = vpop.f32.mrf.mxu3  ;;  %v1453_v0 = vpop.f32.mrf.mxu0 }
 0x298   : > { %v1454_v56 = vadd.f32 %v1453_v0, %v7040_v43  ;;  %v1542_v52 = vpop.f32.mrf.mxu1 }
 0x299   : > { %v1719_v2 = vadd.f32 %v1718_v62, %v1630_v61 }
 0x29a   : > { %v1543_v3 = vadd.f32 %v1542_v52, %v1454_v56 }
 0x29b   : > { %v1789_v11 = vmax.f32 %v1719_v2, 0.0 }
 0x29c   : > { %v1790_v4 = vmax.f32 %v1543_v3, 0.0 }
 0x29e   : > { %v1631_v5 = vpop.f32.mrf.mxu2  ;;  %v7197_v6 = vpack.c.bf16 %v1790_v4, %v1788_v16 }
 0x29f   : > { %v1632_v22 = vadd.f32 %v1631_v5, %v7048_v53  ;;  %v1720_v37 = vpop.f32.mrf.mxu3  ;;  %v1456_v9 = vpop.f32.mrf.mxu0 }
 0x2a0   : > { %v1457_v10 = vadd.f32 %v1456_v9, %v7040_v43  ;;  %v1545_v12 = vpop.f32.mrf.mxu1 }
 0x2a1   : > { %v1721_v13 = vadd.f32 %v1720_v37, %v1632_v22 }
 0x2a2   : > { %v1546_v59 = vadd.f32 %v1545_v12, %v1457_v10  ;;  %2065 = vmatmul.bf16.gmra.mxu0 %v7105_v7 }
 0x2a3   : > { %v1791_v29 = vmax.f32 %v1721_v13, 0.0  ;;  %2154 = vmatmul.bf16.gmra.mxu1 %v7117_v47  ;;  %2243 = vmatmul.bf16.gmra.mxu2 %v7105_v7 }
 0x2a4   : > { %2332 = vmatmul.bf16.gmra.mxu3 %v7117_v47  ;;  %v1792_v27 = vmax.f32 %v1546_v59, 0.0 }
 0x2a5   : > { %v7205_v14 = vpack.c.bf16 %v1791_v29, %v1789_v11 }
 0x2a6   : > { %v1634_v30 = vpop.f32.mrf.mxu2 }
 0x2a7   : > { %v1635_v63 = vadd.f32 %v1634_v30, %v7048_v53  ;;  %v1723_v18 = vpop.f32.mrf.mxu3  ;;  %v1458_v19 = vpop.f32.mrf.mxu0 }
 0x2a8   : > { %v1459_v48 = vadd.f32 %v1458_v19, %v7040_v43  ;;  %v1547_v15 = vpop.f32.mrf.mxu1 }
 0x2a9   : > { %v1724_v25 = vadd.f32 %v1723_v18, %v1635_v63 }
 0x2aa   : > { %v1548_v26 = vadd.f32 %v1547_v15, %v1459_v48 }
 0x2ab   : > { %v1793_v24 = vmax.f32 %v1724_v25, 0.0 }
 0x2ac   : > { %v1794_v28 = vmax.f32 %v1548_v26, 0.0 }
 0x2ae   : > { %v1636_v8 = vpop.f32.mrf.mxu2  ;;  %v7209_v32 = vpack.c.bf16 %v1794_v28, %v1792_v27 }
 0x2af   : > { %v1637_v7 = vadd.f32 %v1636_v8, %v7048_v53  ;;  %v1725_v47 = vpop.f32.mrf.mxu3  ;;  %v1461_v36 = vpop.f32.mrf.mxu0 }
 0x2b0   : > { %v1462_v38 = vadd.f32 %v1461_v36, %v7040_v43  ;;  %v1550_v44 = vpop.f32.mrf.mxu1 }
 0x2b1   : > { %v1726_v45 = vadd.f32 %v1725_v47, %v1637_v7 }
 0x2b2   : > { %v1551_v39 = vadd.f32 %v1550_v44, %v1462_v38  ;;  %2070 = vmatmul.bf16.gmra.mxu0 %v7125_v33 }
 0x2b3   : > { %v1795_v1 = vmax.f32 %v1726_v45, 0.0  ;;  %2159 = vmatmul.bf16.gmra.mxu1 %v7133_v31  ;;  %2248 = vmatmul.bf16.gmra.mxu2 %v7125_v33 }
 0x2b4   : > { %2337 = vmatmul.bf16.gmra.mxu3 %v7133_v31  ;;  %v1796_v62 = vmax.f32 %v1551_v39, 0.0 }
 0x2b5   : > { %v7217_v46 = vpack.c.bf16 %v1795_v1, %v1793_v24 }
 0x2b6   : > { %v1639_v41 = vpop.f32.mrf.mxu2 }
 0x2b7   : > { %v1640_v51 = vadd.f32 %v1639_v41, %v7048_v53  ;;  %v1728_v54 = vpop.f32.mrf.mxu3  ;;  %v1463_v55 = vpop.f32.mrf.mxu0 }
 0x2b8   : > { %v1464_v40 = vadd.f32 %v1463_v55, %v7040_v43  ;;  %v1552_v50 = vpop.f32.mrf.mxu1 }
 0x2b9   : > { %v1729_v60 = vadd.f32 %v1728_v54, %v1640_v51 }
 0x2ba   : > { %v1553_v61 = vadd.f32 %v1552_v50, %v1464_v40 }
 0x2bb   : > { %v1797_v22 = vmax.f32 %v1729_v60, 0.0 }
 0x2bc   : > { %v1798_v0 = vmax.f32 %v1553_v61, 0.0 }
 0x2be   : > { %v1641_v56 = vpop.f32.mrf.mxu2  ;;  %v7221_v52 = vpack.c.bf16 %v1798_v0, %v1796_v62 }
 0x2bf   : > { %v1642_v33 = vadd.f32 %v1641_v56, %v7048_v53  ;;  %v1730_v31 = vpop.f32.mrf.mxu3  ;;  %v1466_v2 = vpop.f32.mrf.mxu0 }
 0x2c0   : > { %v1467_v3 = vadd.f32 %v1466_v2, %v7040_v43  ;;  %v1555_v16 = vpop.f32.mrf.mxu1 }
 0x2c1   : > { %v1731_v4 = vadd.f32 %v1730_v31, %v1642_v33 }
 0x2c2   : > { %v1556_v5 = vadd.f32 %v1555_v16, %v1467_v3  ;;  %2075 = vmatmul.bf16.gmra.mxu0 %v7137_v42 }
 0x2c3   : > { %v1799_v37 = vmax.f32 %v1731_v4, 0.0  ;;  %2164 = vmatmul.bf16.gmra.mxu1 %v7145_v35  ;;  %2253 = vmatmul.bf16.gmra.mxu2 %v7137_v42 }
 0x2c4   : > { %2342 = vmatmul.bf16.gmra.mxu3 %v7145_v35  ;;  %v1800_v18 = vmax.f32 %v1556_v5, 0.0 }
 0x2c5   : > { %v7229_v9 = vpack.c.bf16 %v1799_v37, %v1797_v22 }
 0x2c6   : > { %v1644_v10 = vpop.f32.mrf.mxu2 }
 0x2c7   : > { %v1645_v12 = vadd.f32 %v1644_v10, %v7048_v53  ;;  %v1733_v13 = vpop.f32.mrf.mxu3  ;;  %v1468_v59 = vpop.f32.mrf.mxu0 }
 0x2c8   : > { %v1469_v11 = vadd.f32 %v1468_v59, %v7040_v43  ;;  %v1557_v29 = vpop.f32.mrf.mxu1 }
 0x2c9   : > { %v1734_v30 = vadd.f32 %v1733_v13, %v1645_v12  ;;  %v1876_v12 = vld [vmem:[%s339_s21] sm:$0x3] }
 0x2ca   : > { %v1558_v63 = vadd.f32 %v1557_v29, %v1469_v11  ;;  %v7259_v29 = vperm.slane %v1876_v12, 0 }
 0x2cb   : > { %v1801_v7 = vmax.f32 %v1734_v30, 0.0 }
 0x2cc   : > { %v1802_v19 = vmax.f32 %v1558_v63, 0.0 }
 0x2ce   : > { %v1646_v48 = vpop.f32.mrf.mxu2  ;;  %v7233_v15 = vpack.c.bf16 %v1802_v19, %v1800_v18 }
 0x2cf   : > { %v1647_v42 = vadd.f32 %v1646_v48, %v7048_v53  ;;  %v1735_v35 = vpop.f32.mrf.mxu3  ;;  %v1471_v25 = vpop.f32.mrf.mxu0 }
 0x2d0   : > { %v1472_v26 = vadd.f32 %v1471_v25, %v7040_v43  ;;  %v1560_v27 = vpop.f32.mrf.mxu1 }
 0x2d1   : > { %v1736_v28 = vadd.f32 %v1735_v35, %v1647_v42 }
 0x2d2   : > { %v1561_v8 = vadd.f32 %v1560_v27, %v1472_v26  ;;  %2080 = vmatmul.bf16.gmra.mxu0 %v7149_v20  ;;  %v7270_v26 = vperm.slane %v1876_v12, 1 }
 0x2d3   : > { %v1803_v47 = vmax.f32 %v1736_v28, 0.0  ;;  %2169 = vmatmul.bf16.gmra.mxu1 %v7157_v34  ;;  %2258 = vmatmul.bf16.gmra.mxu2 %v7149_v20 }
 0x2d4   : > { %2347 = vmatmul.bf16.gmra.mxu3 %v7157_v34  ;;  %v1804_v54 = vmax.f32 %v1561_v8, 0.0 }
 0x2d5   : > { %v7241_v36 = vpack.c.bf16 %v1803_v47, %v1801_v7 }
 0x2d6   : > { %v1649_v38 = vpop.f32.mrf.mxu2 }
 0x2d7   : > { %v1650_v44 = vadd.f32 %v1649_v38, %v7048_v53  ;;  %v1738_v45 = vpop.f32.mrf.mxu3  ;;  %v1473_v39 = vpop.f32.mrf.mxu0 }
 0x2d8   : > { %v1474_v24 = vadd.f32 %v1473_v39, %v7040_v43  ;;  %v1562_v1 = vpop.f32.mrf.mxu1 }
 0x2d9   : > { %v1739_v41 = vadd.f32 %v1738_v45, %v1650_v44 }
 0x2da   : > { %v1563_v51 = vadd.f32 %v1562_v1, %v1474_v24 }
 0x2db   : > { %v1805_v33 = vmax.f32 %v1739_v41, 0.0 }
 0x2dc   : > { %v1806_v55 = vmax.f32 %v1563_v51, 0.0 }
 0x2de   : > { %v1651_v40 = vpop.f32.mrf.mxu2  ;;  %v7245_v50 = vpack.c.bf16 %v1806_v55, %v1804_v54 }
 0x2df   : > { %v1652_v20 = vadd.f32 %v1651_v40, %v7048_v53  ;;  %v1740_v34 = vpop.f32.mrf.mxu3  ;;  %v1476_v60 = vpop.f32.mrf.mxu0 }
 0x2e0   : > { %v1477_v61 = vadd.f32 %v1476_v60, %v7040_v43  ;;  %v1565_v62 = vpop.f32.mrf.mxu1 }
 0x2e1   : > { %v1741_v0 = vadd.f32 %v1740_v34, %v1652_v20 }
 0x2e2   : > { %v1566_v56 = vadd.f32 %v1565_v62, %v1477_v61  ;;  %2085 = vmatmul.bf16.gmra.mxu0 %v7161_v17 }
 0x2e3   : > { %v1807_v31 = vmax.f32 %v1741_v0, 0.0  ;;  %2174 = vmatmul.bf16.gmra.mxu1 %v7169_v57  ;;  %2263 = vmatmul.bf16.gmra.mxu2 %v7161_v17 }
 0x2e4   : > { %2352 = vmatmul.bf16.gmra.mxu3 %v7169_v57  ;;  %v1808_v59 = vmax.f32 %v1566_v56, 0.0 }
 0x2e5   : > { %v7253_v2 = vpack.c.bf16 %v1807_v31, %v1805_v33 }
 0x2e6   : > { %v1654_v3 = vpop.f32.mrf.mxu2 }
 0x2e7   : > { %v1655_v16 = vadd.f32 %v1654_v3, %v7048_v53  ;;  %v1743_v4 = vpop.f32.mrf.mxu3  ;;  %v1478_v5 = vpop.f32.mrf.mxu0 }
 0x2e8   : > { %v1479_v22 = vadd.f32 %v1478_v5, %v7040_v43  ;;  %v1567_v37 = vpop.f32.mrf.mxu1 }
 0x2e9   : > { %v1744_v10 = vadd.f32 %v1743_v4, %v1655_v16 }
 0x2ea   : > { %v1568_v13 = vadd.f32 %v1567_v37, %v1479_v22 }
 0x2eb   : > { %v1809_v35 = vmax.f32 %v1744_v10, 0.0 }
 0x2ec   : > { %v1810_v11 = vmax.f32 %v1568_v13, 0.0 }
 0x2ee   : > { %v1656_v17 = vpop.f32.mrf.mxu2  ;;  %v7261_v57 = vpack.c.bf16 %v1810_v11, %v1808_v59 }
 0x2ef   : > { %v1657_v30 = vadd.f32 %v1656_v17, %v7048_v53  ;;  %v1745_v63 = vpop.f32.mrf.mxu3  ;;  %v2051_v18 = vpop.f32.mrf.mxu0 }
 0x2f0   : > { %v2052_v19 = vadd.f32 %v2051_v18, %v7259_v29  ;;  %v2140_v48 = vpop.f32.mrf.mxu1 }
 0x2f1   : > { %v1746_v43 = vadd.f32 %v1745_v63, %v1657_v30 }
 0x2f2   : > { %v7265_v42 = vadd.f32 %v2140_v48, %v2052_v19  ;;  %2090 = vmatmul.bf16.gmra.mxu0 %v7173_v23 }
 0x2f3   : > { %v1811_v25 = vmax.f32 %v1746_v43, 0.0  ;;  %2179 = vmatmul.bf16.gmra.mxu1 %v7181_v21  ;;  %2268 = vmatmul.bf16.gmra.mxu2 %v7173_v23 }
 0x2f4   : > { %2357 = vmatmul.bf16.gmra.mxu3 %v7181_v21 }
 0x2f5   : > { %v7273_v53 = vpack.c.bf16 %v1811_v25, %v1809_v35 }
 0x2f6   : > { %v2229_v27 = vpop.f32.mrf.mxu2 }
 0x2f7   : > { %v2230_v28 = vadd.f32 %v2229_v27, %v7270_v26  ;;  %v2318_v8 = vpop.f32.mrf.mxu3  ;;  %v2053_v7 = vpop.f32.mrf.mxu0 }
 0x2f8   : > { %v2054_v47 = vadd.f32 %v2053_v7, %v7259_v29  ;;  %v2142_v38 = vpop.f32.mrf.mxu1 }
 0x2f9   : > { %v7277_v44 = vadd.f32 %v2318_v8, %v2230_v28 }
 0x2fa   : > { %v7279_v45 = vadd.f32 %v2142_v38, %v2054_v47 }
 0x2fc   : > { %8483 = vst [vmem:[#allocation27_spill] sm:$0xff] %v7279_v45 }
 0x2fe   : > { %v2231_v39 = vpop.f32.mrf.mxu2 }
 0x2ff   : > { %v2232_v23 = vadd.f32 %v2231_v39, %v7270_v26  ;;  %v2320_v24 = vpop.f32.mrf.mxu3  ;;  %v2056_v1 = vpop.f32.mrf.mxu0 }
 0x300   : > { %v2057_v21 = vadd.f32 %v2056_v1, %v7259_v29  ;;  %v2145_v41 = vpop.f32.mrf.mxu1 }
 0x301   : > { %v7283_v51 = vadd.f32 %v2320_v24, %v2232_v23 }
 0x302   : > { %v7285_v54 = vadd.f32 %v2145_v41, %v2057_v21  ;;  %2095 = vmatmul.bf16.gmra.mxu0 %v7185_v49 }
 0x303   : > { %8484 = vst [vmem:[#allocation28_spill] sm:$0xff] %v7283_v51  ;;  %2184 = vmatmul.bf16.gmra.mxu1 %v7193_v58  ;;  %2273 = vmatmul.bf16.gmra.mxu2 %v7185_v49 }
 0x304   : > { %8485 = vst [vmem:[#allocation29_spill] sm:$0xff] %v7285_v54  ;;  %2362 = vmatmul.bf16.gmra.mxu3 %v7193_v58 }
 0x306   : > { %v2234_v55 = vpop.f32.mrf.mxu2 }
 0x307   : > { %v2235_v40 = vadd.f32 %v2234_v55, %v7270_v26  ;;  %v2323_v20 = vpop.f32.mrf.mxu3  ;;  %v2058_v34 = vpop.f32.mrf.mxu0 }
 0x308   : > { %v2059_v60 = vadd.f32 %v2058_v34, %v7259_v29  ;;  %v2147_v61 = vpop.f32.mrf.mxu1 }
 0x309   : > { %v7293_v62 = vadd.f32 %v2323_v20, %v2235_v40 }
 0x30a   : > { %v7295_v0 = vadd.f32 %v2147_v61, %v2059_v60 }
 0x30b   : > { %8486 = vst [vmem:[#allocation30_spill] sm:$0xff] %v7293_v62 }
 0x30c   : > { %8487 = vst [vmem:[#allocation31_spill] sm:$0xff] %v7295_v0 }
 0x30e   : > { %v2236_v56 = vpop.f32.mrf.mxu2 }
 0x30f   : > { %v2237_v33 = vadd.f32 %v2236_v56, %v7270_v26  ;;  %v2325_v31 = vpop.f32.mrf.mxu3  ;;  %v2061_v3 = vpop.f32.mrf.mxu0 }
 0x310   : > { %v2062_v49 = vadd.f32 %v2061_v3, %v7259_v29  ;;  %v2150_v58 = vpop.f32.mrf.mxu1 }
 0x311   : > { %v7299_v16 = vadd.f32 %v2325_v31, %v2237_v33 }
 0x312   : > { %v7301_v4 = vadd.f32 %v2150_v58, %v2062_v49  ;;  %2100 = vmatmul.bf16.gmra.mxu0 %v7197_v6 }
 0x313   : > { %8488 = vst [vmem:[#allocation32_spill] sm:$0xff] %v7299_v16  ;;  %2189 = vmatmul.bf16.gmra.mxu1 %v7205_v14  ;;  %2278 = vmatmul.bf16.gmra.mxu2 %v7197_v6 }
 0x314   : > { %2367 = vmatmul.bf16.gmra.mxu3 %v7205_v14 }
 0x316   : > { %v2239_v5 = vpop.f32.mrf.mxu2 }
 0x317   : > { %v2240_v22 = vadd.f32 %v2239_v5, %v7270_v26  ;;  %v2328_v37 = vpop.f32.mrf.mxu3  ;;  %v2063_v10 = vpop.f32.mrf.mxu0 }
 0x318   : > { %v2064_v12 = vadd.f32 %v2063_v10, %v7259_v29  ;;  %v2152_v13 = vpop.f32.mrf.mxu1 }
 0x319   : > { %v7309_v59 = vadd.f32 %v2328_v37, %v2240_v22 }
 0x31a   : > { %v7311_v11 = vadd.f32 %v2152_v13, %v2064_v12 }
 0x31e   : > { %v2241_v17 = vpop.f32.mrf.mxu2 }
 0x31f   : > { %v2242_v30 = vadd.f32 %v2241_v17, %v7270_v26  ;;  %v2330_v63 = vpop.f32.mrf.mxu3  ;;  %v2066_v18 = vpop.f32.mrf.mxu0 }
 0x320   : > { %v2067_v6 = vadd.f32 %v2066_v18, %v7259_v29  ;;  %v2155_v14 = vpop.f32.mrf.mxu1 }
 0x321   : > { %v7315_v19 = vadd.f32 %v2330_v63, %v2242_v30 }
 0x322   : > { %v7317_v48 = vadd.f32 %v2155_v14, %v2067_v6  ;;  %2105 = vmatmul.bf16.gmra.mxu0 %v7209_v32 }
 0x323   : > { %2194 = vmatmul.bf16.gmra.mxu1 %v7217_v46  ;;  %2283 = vmatmul.bf16.gmra.mxu2 %v7209_v32 }
 0x324   : > { %2372 = vmatmul.bf16.gmra.mxu3 %v7217_v46 }
 0x326   : > { %v2244_v43 = vpop.f32.mrf.mxu2 }
 0x327   : > { %v2245_v35 = vadd.f32 %v2244_v43, %v7270_v26  ;;  %v2333_v25 = vpop.f32.mrf.mxu3  ;;  %v2068_v27 = vpop.f32.mrf.mxu0 }
 0x328   : > { %v2069_v28 = vadd.f32 %v2068_v27, %v7259_v29  ;;  %v2157_v8 = vpop.f32.mrf.mxu1 }
 0x329   : > { %v7325_v7 = vadd.f32 %v2333_v25, %v2245_v35 }
 0x32a   : > { %v7327_v47 = vadd.f32 %v2157_v8, %v2069_v28 }
 0x32e   : > { %v2246_v38 = vpop.f32.mrf.mxu2 }
 0x32f   : > { %v2247_v39 = vadd.f32 %v2246_v38, %v7270_v26  ;;  %v2335_v23 = vpop.f32.mrf.mxu3  ;;  %v2071_v24 = vpop.f32.mrf.mxu0 }
 0x330   : > { %v2072_v32 = vadd.f32 %v2071_v24, %v7259_v29  ;;  %v2160_v46 = vpop.f32.mrf.mxu1 }
 0x331   : > { %v7331_v1 = vadd.f32 %v2335_v23, %v2247_v39 }
 0x332   : > { %v7333_v21 = vadd.f32 %v2160_v46, %v2072_v32  ;;  %2110 = vmatmul.bf16.gmra.mxu0 %v7221_v52 }
 0x333   : > { %2199 = vmatmul.bf16.gmra.mxu1 %v7229_v9  ;;  %2288 = vmatmul.bf16.gmra.mxu2 %v7221_v52 }
 0x334   : > { %2377 = vmatmul.bf16.gmra.mxu3 %v7229_v9 }
 0x336   : > { %v2249_v41 = vpop.f32.mrf.mxu2 }
 0x337   : > { %v2250_v55 = vadd.f32 %v2249_v41, %v7270_v26  ;;  %v2338_v40 = vpop.f32.mrf.mxu3  ;;  %v2073_v20 = vpop.f32.mrf.mxu0 }
 0x338   : > { %v2074_v34 = vadd.f32 %v2073_v20, %v7259_v29  ;;  %v2162_v60 = vpop.f32.mrf.mxu1 }
 0x339   : > { %v7341_v61 = vadd.f32 %v2338_v40, %v2250_v55 }
 0x33a   : > { %v7343_v56 = vadd.f32 %v2162_v60, %v2074_v34 }
 0x33e   : > { %v2251_v33 = vpop.f32.mrf.mxu2 }
 0x33f   : > { %v2252_v31 = vadd.f32 %v2251_v33, %v7270_v26  ;;  %v2340_v3 = vpop.f32.mrf.mxu3  ;;  %v2076_v49 = vpop.f32.mrf.mxu0 }
 0x340   : > { %v2077_v52 = vadd.f32 %v2076_v49, %v7259_v29  ;;  %v2165_v9 = vpop.f32.mrf.mxu1 }
 0x341   : > { %v7347_v58 = vadd.f32 %v2340_v3, %v2252_v31 }
 0x342   : > { %v7349_v5 = vadd.f32 %v2165_v9, %v2077_v52  ;;  %2115 = vmatmul.bf16.gmra.mxu0 %v7233_v15 }
 0x343   : > { %2204 = vmatmul.bf16.gmra.mxu1 %v7241_v36  ;;  %2293 = vmatmul.bf16.gmra.mxu2 %v7233_v15 }
 0x344   : > { %8489 = vst [vmem:[#allocation33_spill] sm:$0xff] %v7349_v5  ;;  %2382 = vmatmul.bf16.gmra.mxu3 %v7241_v36 }
 0x346   : > { %v2254_v22 = vpop.f32.mrf.mxu2 }
 0x347   : > { %v2255_v37 = vadd.f32 %v2254_v22, %v7270_v26  ;;  %v2343_v10 = vpop.f32.mrf.mxu3  ;;  %v2078_v12 = vpop.f32.mrf.mxu0 }
 0x348   : > { %v2079_v13 = vadd.f32 %v2078_v12, %v7259_v29  ;;  %v2167_v17 = vpop.f32.mrf.mxu1 }
 0x349   : > { %v7357_v30 = vadd.f32 %v2343_v10, %v2255_v37 }
 0x34a   : > { %v7359_v63 = vadd.f32 %v2167_v17, %v2079_v13 }
 0x34e   : > { %v2256_v18 = vpop.f32.mrf.mxu2 }
 0x34f   : > { %v2257_v6 = vadd.f32 %v2256_v18, %v7270_v26  ;;  %v2345_v14 = vpop.f32.mrf.mxu3  ;;  %v2081_v43 = vpop.f32.mrf.mxu0 }
 0x350   : > { %v2082_v15 = vadd.f32 %v2081_v43, %v7259_v29  ;;  %v2170_v36 = vpop.f32.mrf.mxu1 }
 0x351   : > { %v7363_v35 = vadd.f32 %v2345_v14, %v2257_v6 }
 0x352   : > { %v7365_v25 = vadd.f32 %v2170_v36, %v2082_v15  ;;  %2120 = vmatmul.bf16.gmra.mxu0 %v7245_v50 }
 0x353   : > { %2209 = vmatmul.bf16.gmra.mxu1 %v7253_v2  ;;  %2298 = vmatmul.bf16.gmra.mxu2 %v7245_v50 }
 0x354   : > { %2387 = vmatmul.bf16.gmra.mxu3 %v7253_v2 }
 0x356   : > { %v2259_v27 = vpop.f32.mrf.mxu2 }
 0x357   : > { %v2260_v28 = vadd.f32 %v2259_v27, %v7270_v26  ;;  %v2348_v8 = vpop.f32.mrf.mxu3  ;;  %v2083_v38 = vpop.f32.mrf.mxu0 }
 0x358   : > { %v2084_v39 = vadd.f32 %v2083_v38, %v7259_v29  ;;  %v2172_v23 = vpop.f32.mrf.mxu1 }
 0x359   : > { %v7373_v24 = vadd.f32 %v2348_v8, %v2260_v28 }
 0x35a   : > { %v7375_v32 = vadd.f32 %v2172_v23, %v2084_v39 }
 0x35b   : > { %8490 = vst [vmem:[#allocation34_spill] sm:$0xff] %v7373_v24 }
 0x35e   : > { %v2261_v46 = vpop.f32.mrf.mxu2 }
 0x35f   : > { %v2262_v41 = vadd.f32 %v2261_v46, %v7270_v26  ;;  %v2350_v55 = vpop.f32.mrf.mxu3  ;;  %v2086_v40 = vpop.f32.mrf.mxu0 }
 0x360   : > { %v2087_v50 = vadd.f32 %v2086_v40, %v7259_v29  ;;  %v2175_v2 = vpop.f32.mrf.mxu1 }
 0x361   : > { %v7379_v20 = vadd.f32 %v2350_v55, %v2262_v41 }
 0x362   : > { %v7381_v34 = vadd.f32 %v2175_v2, %v2087_v50  ;;  %2125 = vmatmul.bf16.gmra.mxu0 %v7261_v57 }
 0x363   : > { %2214 = vmatmul.bf16.gmra.mxu1 %v7273_v53  ;;  %2303 = vmatmul.bf16.gmra.mxu2 %v7261_v57 }
 0x364   : > { %2392 = vmatmul.bf16.gmra.mxu3 %v7273_v53 }
 0x366   : > { %v2264_v60 = vpop.f32.mrf.mxu2 }
 0x367   : > { %v2265_v33 = vadd.f32 %v2264_v60, %v7270_v26  ;;  %v2353_v31 = vpop.f32.mrf.mxu3  ;;  %v2088_v3 = vpop.f32.mrf.mxu0 }
 0x368   : > { %v2089_v49 = vadd.f32 %v2088_v3, %v7259_v29  ;;  %v2177_v52 = vpop.f32.mrf.mxu1 }
 0x369   : > { %v7389_v9 = vadd.f32 %v2353_v31, %v2265_v33 }
 0x36a   : > { %v7391_v22 = vadd.f32 %v2177_v52, %v2089_v49 }
 0x36e   : > { %v2266_v37 = vpop.f32.mrf.mxu2 }
 0x36f   : > { %v2267_v10 = vadd.f32 %v2266_v37, %v7270_v26  ;;  %v2355_v12 = vpop.f32.mrf.mxu3  ;;  %v2091_v13 = vpop.f32.mrf.mxu0 }
 0x370   : > { %v2092_v57 = vadd.f32 %v2091_v13, %v7259_v29  ;;  %v2180_v53 = vpop.f32.mrf.mxu1 }
 0x371   : > { %v7395_v17 = vadd.f32 %v2355_v12, %v2267_v10 }
 0x372   : > { %v7397_v18 = vadd.f32 %v2180_v53, %v2092_v57 }
 0x376   : > { %v2269_v6 = vpop.f32.mrf.mxu2 }
 0x377   : > { %v2270_v14 = vadd.f32 %v2269_v6, %v7270_v26  ;;  %v2358_v43 = vpop.f32.mrf.mxu3  ;;  %v2093_v15 = vpop.f32.mrf.mxu0 }
 0x378   : > { %v2094_v36 = vadd.f32 %v2093_v15, %v7259_v29  ;;  %v2182_v27 = vpop.f32.mrf.mxu1 }
 0x379   : > { %v7401_v28 = vadd.f32 %v2358_v43, %v2270_v14 }
 0x37a   : > { %v7403_v8 = vadd.f32 %v2182_v27, %v2094_v36 }
 0x37e   : > { %v2271_v38 = vpop.f32.mrf.mxu2 }
 0x37f   : > { %v2272_v39 = vadd.f32 %v2271_v38, %v7270_v26  ;;  %v2360_v23 = vpop.f32.mrf.mxu3  ;;  %v2096_v46 = vpop.f32.mrf.mxu0 }
 0x380   : > { %v2097_v41 = vadd.f32 %v2096_v46, %v7259_v29  ;;  %v2185_v55 = vpop.f32.mrf.mxu1 }
 0x381   : > { %v7407_v40 = vadd.f32 %v2360_v23, %v2272_v39 }
 0x382   : > { %v7409_v50 = vadd.f32 %v2185_v55, %v2097_v41 }
 0x386   : > { %v2274_v2 = vpop.f32.mrf.mxu2 }
 0x387   : > { %v2275_v60 = vadd.f32 %v2274_v2, %v7270_v26  ;;  %v2363_v33 = vpop.f32.mrf.mxu3  ;;  %v2098_v31 = vpop.f32.mrf.mxu0 }
 0x388   : > { %v2099_v3 = vadd.f32 %v2098_v31, %v7259_v29  ;;  %v2187_v49 = vpop.f32.mrf.mxu1 }
 0x389   : > { %v7413_v52 = vadd.f32 %v2363_v33, %v2275_v60 }
 0x38a   : > { %v7415_v37 = vadd.f32 %v2187_v49, %v2099_v3 }
 0x38e   : > { %v2276_v10 = vpop.f32.mrf.mxu2 }
 0x38f   : > { %v2277_v12 = vadd.f32 %v2276_v10, %v7270_v26  ;;  %v2365_v13 = vpop.f32.mrf.mxu3  ;;  %v2101_v57 = vpop.f32.mrf.mxu0 }
 0x390   : > { %v2102_v53 = vadd.f32 %v2101_v57, %v7259_v29  ;;  %v2190_v6 = vpop.f32.mrf.mxu1 }
 0x391   : > { %v7419_v14 = vadd.f32 %v2365_v13, %v2277_v12 }
 0x392   : > { %v7421_v43 = vadd.f32 %v2190_v6, %v2102_v53 }
 0x393   : > { %8491 = vst [vmem:[#allocation35_spill] sm:$0xff] %v7419_v14 }
 0x394   : > { %8492 = vst [vmem:[#allocation36_spill] sm:$0xff] %v7421_v43 }
 0x396   : > { %v2279_v15 = vpop.f32.mrf.mxu2 }
 0x397   : > { %v2280_v36 = vadd.f32 %v2279_v15, %v7270_v26  ;;  %v2368_v27 = vpop.f32.mrf.mxu3  ;;  %v2103_v38 = vpop.f32.mrf.mxu0 }
 0x398   : > { %v2104_v39 = vadd.f32 %v2103_v38, %v7259_v29  ;;  %v2192_v23 = vpop.f32.mrf.mxu1 }
 0x399   : > { %v7425_v46 = vadd.f32 %v2368_v27, %v2280_v36 }
 0x39a   : > { %v7427_v41 = vadd.f32 %v2192_v23, %v2104_v39 }
 0x39b   : > { %8493 = vst [vmem:[#allocation37_spill] sm:$0xff] %v7425_v46 }
 0x39c   : > { %8494 = vst [vmem:[#allocation38_spill] sm:$0xff] %v7427_v41 }
 0x39e   : > { %v2281_v55 = vpop.f32.mrf.mxu2 }
 0x39f   : > { %v2282_v2 = vadd.f32 %v2281_v55, %v7270_v26  ;;  %v2370_v60 = vpop.f32.mrf.mxu3  ;;  %v2106_v33 = vpop.f32.mrf.mxu0 }
 0x3a0   : > { %v2107_v31 = vadd.f32 %v2106_v33, %v7259_v29  ;;  %v2195_v3 = vpop.f32.mrf.mxu1 }
 0x3a1   : > { %v7431_v49 = vadd.f32 %v2370_v60, %v2282_v2 }
 0x3a2   : > { %v7433_v10 = vadd.f32 %v2195_v3, %v2107_v31 }
 0x3a3   : > { %8495 = vst [vmem:[#allocation39_spill] sm:$0xff] %v7431_v49 }
 0x3a4   : > { %8496 = vst [vmem:[#allocation40_spill] sm:$0xff] %v7433_v10 }
 0x3a6   : > { %v2284_v12 = vpop.f32.mrf.mxu2 }
 0x3a7   : > { %v2285_v13 = vadd.f32 %v2284_v12, %v7270_v26  ;;  %v2373_v57 = vpop.f32.mrf.mxu3  ;;  %v2108_v53 = vpop.f32.mrf.mxu0 }
 0x3a8   : > { %v2109_v6 = vadd.f32 %v2108_v53, %v7259_v29  ;;  %v2197_v15 = vpop.f32.mrf.mxu1 }
 0x3a9   : > { %v7437_v36 = vadd.f32 %v2373_v57, %v2285_v13 }
 0x3aa   : > { %v7439_v27 = vadd.f32 %v2197_v15, %v2109_v6 }
 0x3ab   : > { %8497 = vst [vmem:[#allocation41_spill] sm:$0xff] %v7437_v36 }
 0x3ac   : > { %8498 = vst [vmem:[#allocation42_spill] sm:$0xff] %v7439_v27 }
 0x3ae   : > { %v2286_v38 = vpop.f32.mrf.mxu2 }
 0x3af   : > { %v2287_v39 = vadd.f32 %v2286_v38, %v7270_v26  ;;  %v2375_v23 = vpop.f32.mrf.mxu3  ;;  %v2111_v55 = vpop.f32.mrf.mxu0 }
 0x3b0   : > { %v2112_v2 = vadd.f32 %v2111_v55, %v7259_v29  ;;  %v2200_v60 = vpop.f32.mrf.mxu1 }
 0x3b1   : > { %v7443_v33 = vadd.f32 %v2375_v23, %v2287_v39 }
 0x3b2   : > { %v7445_v31 = vadd.f32 %v2200_v60, %v2112_v2 }
 0x3b3   : > { %8499 = vst [vmem:[#allocation43_spill] sm:$0xff] %v7443_v33 }
 0x3b4   : > { %8500 = vst [vmem:[#allocation44_spill] sm:$0xff] %v7445_v31 }
 0x3b6   : > { %v2289_v3 = vpop.f32.mrf.mxu2 }
 0x3b7   : > { %v2290_v12 = vadd.f32 %v2289_v3, %v7270_v26  ;;  %v2378_v53 = vpop.f32.mrf.mxu3  ;;  %v2113_v13 = vpop.f32.mrf.mxu0 }
 0x3b8   : > { %v2114_v57 = vadd.f32 %v2113_v13, %v7259_v29  ;;  %v2202_v6 = vpop.f32.mrf.mxu1 }
 0x3b9   : > { %v7449_v15 = vadd.f32 %v2378_v53, %v2290_v12 }
 0x3ba   : > { %v7451_v38 = vadd.f32 %v2202_v6, %v2114_v57 }
 0x3bb   : > { %8501 = vst [vmem:[#allocation45_spill] sm:$0xff] %v7449_v15 }
 0x3bc   : > { %8502 = vst [vmem:[#allocation46_spill] sm:$0xff] %v7451_v38 }
 0x3be   : > { %v2291_v27 = vpop.f32.mrf.mxu2 }
 0x3bf   : > { %v2292_v55 = vadd.f32 %v2291_v27, %v7270_v26  ;;  %v2380_v36 = vpop.f32.mrf.mxu3  ;;  %v2116_v39 = vpop.f32.mrf.mxu0 }
 0x3c0   : > { %v2117_v23 = vadd.f32 %v2116_v39, %v7259_v29  ;;  %v2205_v2 = vpop.f32.mrf.mxu1 }
 0x3c1   : > { %v7455_v60 = vadd.f32 %v2380_v36, %v2292_v55 }
 0x3c2   : > { %v7457_v3 = vadd.f32 %v2205_v2, %v2117_v23 }
 0x3c3   : > { %8503 = vst [vmem:[#allocation47_spill] sm:$0xff] %v7455_v60 }
 0x3c4   : > { %8504 = vst [vmem:[#allocation48_spill] sm:$0xff] %v7457_v3 }
 0x3c6   : > { %v2294_v31 = vpop.f32.mrf.mxu2 }
 0x3c7   : > { %v2295_v13 = vadd.f32 %v2294_v31, %v7270_v26  ;;  %v2383_v33 = vpop.f32.mrf.mxu3  ;;  %v2118_v12 = vpop.f32.mrf.mxu0 }
 0x3c8   : > { %v2119_v53 = vadd.f32 %v2118_v12, %v7259_v29  ;;  %v2207_v57 = vpop.f32.mrf.mxu1 }
 0x3c9   : > { %v7461_v6 = vadd.f32 %v2383_v33, %v2295_v13 }
 0x3ca   : > { %v7463_v27 = vadd.f32 %v2207_v57, %v2119_v53 }
 0x3cb   : > { %8505 = vst [vmem:[#allocation49_spill] sm:$0xff] %v7461_v6 }
 0x3cc   : > { %8506 = vst [vmem:[#allocation50_spill] sm:$0xff] %v7463_v27 }
 0x3ce   : > { %v2296_v38 = vpop.f32.mrf.mxu2 }
 0x3cf   : > { %v2297_v39 = vadd.f32 %v2296_v38, %v7270_v26  ;;  %v2385_v15 = vpop.f32.mrf.mxu3  ;;  %v2121_v36 = vpop.f32.mrf.mxu0 }
 0x3d0   : > { %v2122_v55 = vadd.f32 %v2121_v36, %v7259_v29  ;;  %v2210_v23 = vpop.f32.mrf.mxu1 }
 0x3d1   : > { %v7467_v2 = vadd.f32 %v2385_v15, %v2297_v39 }
 0x3d2   : > { %v7469_v31 = vadd.f32 %v2210_v23, %v2122_v55 }
 0x3d3   : > { %8507 = vst [vmem:[#allocation51_spill] sm:$0xff] %v7467_v2 }
 0x3d4   : > { %8508 = vst [vmem:[#allocation52_spill] sm:$0xff] %v7469_v31 }
 0x3d6   : > { %v2299_v3 = vpop.f32.mrf.mxu2 }
 0x3d7   : > { %v2300_v12 = vadd.f32 %v2299_v3, %v7270_v26  ;;  %v2388_v60 = vpop.f32.mrf.mxu3  ;;  %v2123_v33 = vpop.f32.mrf.mxu0 }
 0x3d8   : > { %v2124_v13 = vadd.f32 %v2123_v33, %v7259_v29  ;;  %v2212_v53 = vpop.f32.mrf.mxu1 }
 0x3d9   : > { %v7473_v57 = vadd.f32 %v2388_v60, %v2300_v12 }
 0x3da   : > { %v7475_v38 = vadd.f32 %v2212_v53, %v2124_v13 }
 0x3db   : > { %8509 = vst [vmem:[#allocation53_spill] sm:$0xff] %v7473_v57 }
 0x3dc   : > { %8510 = vst [vmem:[#allocation54_spill] sm:$0xff] %v7475_v38 }
 0x3de   : > { %v2301_v27 = vpop.f32.mrf.mxu2 }
 0x3df   : > { %v2302_v36 = vadd.f32 %v2301_v27, %v7270_v26  ;;  %v2390_v6 = vpop.f32.mrf.mxu3  ;;  %v2126_v15 = vpop.f32.mrf.mxu0 }
 0x3e0   : > { %v2127_v39 = vadd.f32 %v2126_v15, %v7259_v29  ;;  %v2215_v55 = vpop.f32.mrf.mxu1 }
 0x3e1   : > { %v7479_v23 = vadd.f32 %v2390_v6, %v2302_v36 }
 0x3e2   : > { %v7481_v3 = vadd.f32 %v2215_v55, %v2127_v39 }
 0x3e6   : > { %v2304_v31 = vpop.f32.mrf.mxu2 }
 0x3e7   : > { %v2305_v33 = vadd.f32 %v2304_v31, %v7270_v26  ;;  %v2393_v2 = vpop.f32.mrf.mxu3  ;;  %v2128_v60 = vpop.f32.mrf.mxu0 }
 0x3e8   : > { %v2129_v12 = vadd.f32 %v2128_v60, %v7259_v29  ;;  %v2217_v53 = vpop.f32.mrf.mxu1 }
 0x3e9   : > { %v7485_v13 = vadd.f32 %v2393_v2, %v2305_v33 }
 0x3ea   : > { %v7487_v27 = vadd.f32 %v2217_v53, %v2129_v12 }
 0x3ed   : > { %2401 = sbr.rel (%p5491_p5) target bundleno = 1046 (0x416), region = 76 }
 0x3ee   : > { %v2306_v38 = vpop.f32.mrf.mxu2 }
 0x3ef   : > { %v2307_v15 = vadd.f32 %v2306_v38, %v7270_v26  ;;  %v2395_v57 = vpop.f32.mrf.mxu3 }
 0x3f1   : > { %v7490_v6 = vadd.f32 %v2395_v57, %v2307_v15 }
 0x3f2   : > { %v2402_v31 = vmax.f32 %v7265_v42, 0.0  ;;  %v2403_v36 = vmax.f32 %v7277_v44, 0.0  ;;  %v2404_v29 = vmax.f32 %v7279_v45, 0.0  ;;  %v2405_v2 = vmax.f32 %v7283_v51, 0.0 }
 0x3f3   : > { %v2406_v39 = vmax.f32 %v7285_v54, 0.0  ;;  %v2407_v55 = vmax.f32 %v7293_v62, 0.0  ;;  %v2408_v26 = vmax.f32 %v7295_v0, 0.0  ;;  %v2409_v57 = vmax.f32 %v7299_v16, 0.0 }
 0x3f4   : > { %v2466_v38 = vpack.c.bf16 %v2403_v36, %v2402_v31  ;;  %v2467_v33 = vpack.c.bf16 %v2405_v2, %v2404_v29  ;;  %v2410_v60 = vmax.f32 %v7301_v4, 0.0  ;;  %v2411_v12 = vmax.f32 %v7309_v59, 0.0 }
 0x3f5   : > { %v2468_v53 = vpack.c.bf16 %v2407_v55, %v2406_v39  ;;  %v2469_v15 = vpack.c.bf16 %v2409_v57, %v2408_v26  ;;  %v2412_v45 = vmax.f32 %v7311_v11, 0.0  ;;  %v2413_v51 = vmax.f32 %v7315_v19, 0.0 }
 0x3f6   : > { %2500 = vst [vmem:[#allocation13] sm:$0xff] %v2466_v38  ;;  %v2470_v54 = vpack.c.bf16 %v2411_v12, %v2410_v60  ;;  %v2414_v62 = vmax.f32 %v7317_v48, 0.0  ;;  %v2415_v0 = vmax.f32 %v7325_v7, 0.0  ;;  %v2416_v16 = vmax.f32 %v7327_v47, 0.0 }
 0x3f7   : > { %2501 = vst [vmem:[#allocation13 + $0x8] sm:$0xff] %v2467_v33  ;;  %v2471_v31 = vpack.c.bf16 %v2413_v51, %v2412_v45  ;;  %v2417_v36 = vmax.f32 %v7331_v1, 0.0  ;;  %v2418_v29 = vmax.f32 %v7333_v21, 0.0  ;;  %v2419_v2 = vmax.f32 %v7341_v61, 0.0 }
 0x3f8   : > { %2502 = vst [vmem:[#allocation13 + $0x10] sm:$0xff] %v2468_v53  ;;  %v2472_v39 = vpack.c.bf16 %v2415_v0, %v2414_v62  ;;  %v2420_v55 = vmax.f32 %v7343_v56, 0.0  ;;  %v2421_v26 = vmax.f32 %v7347_v58, 0.0  ;;  %v2422_v57 = vmax.f32 %v7349_v5, 0.0 }
 0x3f9   : > { %2503 = vst [vmem:[#allocation13 + $0x18] sm:$0xff] %v2469_v15  ;;  %v2473_v38 = vpack.c.bf16 %v2417_v36, %v2416_v16  ;;  %v2423_v60 = vmax.f32 %v7357_v30, 0.0  ;;  %v2424_v45 = vmax.f32 %v7359_v63, 0.0  ;;  %v2474_v51 = vpack.c.bf16 %v2419_v2, %v2418_v29 }
 0x3fa   : > { %2504 = vst [vmem:[#allocation13 + $0x20] sm:$0xff] %v2470_v54  ;;  %v2425_v33 = vmax.f32 %v7363_v35, 0.0  ;;  %v2426_v12 = vmax.f32 %v7365_v25, 0.0  ;;  %v2427_v62 = vmax.f32 %v7373_v24, 0.0  ;;  %v2475_v0 = vpack.c.bf16 %v2421_v26, %v2420_v55 }
 0x3fb   : > { %2505 = vst [vmem:[#allocation13 + $0x28] sm:$0xff] %v2471_v31  ;;  %v2428_v53 = vmax.f32 %v7375_v32, 0.0  ;;  %v2429_v5 = vmax.f32 %v7379_v20, 0.0  ;;  %v2476_v16 = vpack.c.bf16 %v2423_v60, %v2422_v57  ;;  %v2430_v15 = vmax.f32 %v7381_v34, 0.0 }
 0x3fc   : > { %2506 = vst [vmem:[#allocation13 + $0x30] sm:$0xff] %v2472_v39  ;;  %v2431_v36 = vmax.f32 %v7389_v9, 0.0  ;;  %v2477_v54 = vpack.c.bf16 %v2425_v33, %v2424_v45  ;;  %v2432_v29 = vmax.f32 %v7391_v22, 0.0  ;;  %v2433_v2 = vmax.f32 %v7395_v17, 0.0 }
 0x3fd   : > { %2507 = vst [vmem:[#allocation13 + $0x38] sm:$0xff] %v2473_v38  ;;  %v2478_v24 = vpack.c.bf16 %v2427_v62, %v2426_v12  ;;  %v2434_v31 = vmax.f32 %v7397_v18, 0.0  ;;  %v2435_v55 = vmax.f32 %v7401_v28, 0.0  ;;  %v2479_v26 = vpack.c.bf16 %v2429_v5, %v2428_v53 }
 0x3fe   : > { %2508 = vst [vmem:[#allocation13 + $0x40] sm:$0xff] %v2474_v51  ;;  %v2436_v39 = vmax.f32 %v7403_v8, 0.0  ;;  %v2437_v57 = vmax.f32 %v7407_v40, 0.0  ;;  %v2480_v60 = vpack.c.bf16 %v2431_v36, %v2430_v15  ;;  %v2438_v38 = vmax.f32 %v7409_v50, 0.0 }
 0x3ff   : > { %2509 = vst [vmem:[#allocation13 + $0x48] sm:$0xff] %v2475_v0  ;;  %v2439_v45 = vmax.f32 %v7413_v52, 0.0  ;;  %v2481_v33 = vpack.c.bf16 %v2433_v2, %v2432_v29  ;;  %v2440_v51 = vmax.f32 %v7415_v37, 0.0  ;;  %v2441_v12 = vmax.f32 %v7419_v14, 0.0  ;;  %v8511_v29 = vld [vmem:[#allocation41_spill] sm:$0xff] }
 0x400   : > { %2510 = vst [vmem:[#allocation13 + $0x50] sm:$0xff] %v2476_v16  ;;  %v2482_v62 = vpack.c.bf16 %v2435_v55, %v2434_v31  ;;  %v2442_v5 = vmax.f32 %v7421_v43, 0.0  ;;  %v2443_v0 = vmax.f32 %v7425_v46, 0.0  ;;  %v2483_v53 = vpack.c.bf16 %v2437_v57, %v2436_v39  ;;  %v8513_v55 = vld [vmem:[#allocation43_spill] sm:$0xff]  ;;  %v8515_v57 = vld [vmem:[#allocation45_spill] sm:$0xff] }
 0x401   : > { %2511 = vst [vmem:[#allocation13 + $0x58] sm:$0xff] %v2477_v54  ;;  %v2444_v16 = vmax.f32 %v7427_v41, 0.0  ;;  %v2445_v15 = vmax.f32 %v7431_v49, 0.0  ;;  %v2484_v36 = vpack.c.bf16 %v2439_v45, %v2438_v38  ;;  %v2446_v54 = vmax.f32 %v7433_v10, 0.0  ;;  %v8517_v45 = vld [vmem:[#allocation47_spill] sm:$0xff] }
 0x402   : > { %2512 = vst [vmem:[#allocation13 + $0x60] sm:$0xff] %v2478_v24  ;;  %v2447_v2 = vmax.f32 %v8511_v29, 0.0  ;;  %v2485_v14 = vpack.c.bf16 %v2441_v12, %v2440_v51  ;;  %v8512_v24 = vld [vmem:[#allocation42_spill] sm:$0xff]  ;;  %v2449_v43 = vmax.f32 %v8513_v55, 0.0  ;;  %v2486_v46 = vpack.c.bf16 %v2443_v0, %v2442_v5  ;;  %v8519_v12 = vld [vmem:[#allocation49_spill] sm:$0xff]  ;;  %v8521_v0 = vld [vmem:[#allocation51_spill] sm:$0xff] }
 0x403   : > { %2513 = vst [vmem:[#allocation13 + $0x68] sm:$0xff] %v2479_v26  ;;  %v2448_v31 = vmax.f32 %v8512_v24, 0.0  ;;  %v8514_v26 = vld [vmem:[#allocation44_spill] sm:$0xff]  ;;  %v2451_v41 = vmax.f32 %v8515_v57, 0.0  ;;  %v2487_v49 = vpack.c.bf16 %v2445_v15, %v2444_v16  ;;  %v2453_v10 = vmax.f32 %v8517_v45, 0.0  ;;  %v8523_v15 = vld [vmem:[#allocation53_spill] sm:$0xff] }
 0x404   : > { %2514 = vst [vmem:[#allocation13 + $0x70] sm:$0xff] %v2480_v60  ;;  %v2450_v39 = vmax.f32 %v8514_v26, 0.0  ;;  %v8516_v60 = vld [vmem:[#allocation46_spill] sm:$0xff]  ;;  %v2488_v29 = vpack.c.bf16 %v2447_v2, %v2446_v54  ;;  %v2455_v24 = vmax.f32 %v8519_v12, 0.0  ;;  %v2457_v26 = vmax.f32 %v8521_v0, 0.0 }
 0x405   : > { %2515 = vst [vmem:[#allocation13 + $0x78] sm:$0xff] %v2481_v33  ;;  %v2452_v38 = vmax.f32 %v8516_v60, 0.0  ;;  %v8518_v33 = vld [vmem:[#allocation48_spill] sm:$0xff]  ;;  %v2489_v55 = vpack.c.bf16 %v2449_v43, %v2448_v31  ;;  %v2459_v60 = vmax.f32 %v8523_v15, 0.0  ;;  %v2461_v2 = vmax.f32 %v7479_v23, 0.0 }
 0x406   : > { %2516 = vst [vmem:[#allocation13 + $0x80] sm:$0xff] %v2482_v62  ;;  %v2454_v51 = vmax.f32 %v8518_v33, 0.0  ;;  %v8520_v62 = vld [vmem:[#allocation50_spill] sm:$0xff]  ;;  %v2490_v57 = vpack.c.bf16 %v2451_v41, %v2450_v39  ;;  %v2463_v43 = vmax.f32 %v7485_v13, 0.0  ;;  %v2465_v41 = vmax.f32 %v7490_v6, 0.0 }
 0x407   : > { %2517 = vst [vmem:[#allocation13 + $0x88] sm:$0xff] %v2483_v53  ;;  %v2456_v5 = vmax.f32 %v8520_v62, 0.0  ;;  %v8522_v53 = vld [vmem:[#allocation52_spill] sm:$0xff]  ;;  %v2491_v45 = vpack.c.bf16 %v2453_v10, %v2452_v38 }
 0x408   : > { %2518 = vst [vmem:[#allocation13 + $0x90] sm:$0xff] %v2484_v36  ;;  %v2458_v16 = vmax.f32 %v8522_v53, 0.0  ;;  %v8524_v36 = vld [vmem:[#allocation54_spill] sm:$0xff]  ;;  %v2492_v33 = vpack.c.bf16 %v2455_v24, %v2454_v51 }
 0x409   : > { %2519 = vst [vmem:[#allocation13 + $0x98] sm:$0xff] %v2485_v14  ;;  %v2460_v54 = vmax.f32 %v8524_v36, 0.0  ;;  %v2462_v14 = vmax.f32 %v7481_v3, 0.0  ;;  %v2493_v31 = vpack.c.bf16 %v2457_v26, %v2456_v5 }
 0x40a   : > { %2520 = vst [vmem:[#allocation13 + $0xa0] sm:$0xff] %v2486_v46  ;;  %v2464_v46 = vmax.f32 %v7487_v27, 0.0  ;;  %v2494_v39 = vpack.c.bf16 %v2459_v60, %v2458_v16 }
 0x40b   : > { %2521 = vst [vmem:[#allocation13 + $0xa8] sm:$0xff] %v2487_v49  ;;  %v2495_v49 = vpack.c.bf16 %v2461_v2, %v2460_v54  ;;  %v2496_v10 = vpack.c.bf16 %v2463_v43, %v2462_v14 }
 0x40c   : > { %2522 = vst [vmem:[#allocation13 + $0xb0] sm:$0xff] %v2488_v29  ;;  %v2497_v38 = vpack.c.bf16 %v2465_v41, %v2464_v46 }
 0x40d   : > { %2523 = vst [vmem:[#allocation13 + $0xb8] sm:$0xff] %v2489_v55 }
 0x40e   : > { %2524 = vst [vmem:[#allocation13 + $0xc0] sm:$0xff] %v2490_v57 }
 0x40f   : > { %2525 = vst [vmem:[#allocation13 + $0xc8] sm:$0xff] %v2491_v45 }
 0x410   : > { %2526 = vst [vmem:[#allocation13 + $0xd0] sm:$0xff] %v2492_v33 }
 0x411   : > { %2527 = vst [vmem:[#allocation13 + $0xd8] sm:$0xff] %v2493_v31 }
 0x412   : > { %2528 = vst [vmem:[#allocation13 + $0xe0] sm:$0xff] %v2494_v39 }
 0x413   : > { %2529 = vst [vmem:[#allocation13 + $0xe8] sm:$0xff] %v2495_v49 }
 0x414   : > { %2530 = vst [vmem:[#allocation13 + $0xf0] sm:$0xff] %v2496_v10 }
 0x415   : > { %2531 = vst [vmem:[#allocation13 + $0xf8] sm:$0xff] %v2497_v38 }
 0x416 PF: > { %p5492_p6 = scmp.ne.s32.totalorder %s6631_s24, 4 }
 0x418   : > { %2535 = sbr.rel (%p5492_p6) target bundleno = 1087 (0x43f), region = 80 }
 0x41d   : > { %v2536_v29 = vpack.c.bf16 %v7277_v44, %v7265_v42  ;;  %v8525_v51 = vld [vmem:[#allocation27_spill] sm:$0xff]  ;;  %v8526_v12 = vld [vmem:[#allocation28_spill] sm:$0xff]  ;;  %v8527_v55 = vld [vmem:[#allocation29_spill] sm:$0xff]  ;;  %v2540_v53 = vpack.c.bf16 %v7309_v59, %v7301_v4  ;;  %v2541_v16 = vpack.c.bf16 %v7315_v19, %v7311_v11  ;;  %v2542_v42 = vpack.c.bf16 %v7325_v7, %v7317_v48 }
 0x41e   : > { %v2537_v24 = vpack.c.bf16 %v8526_v12, %v8525_v51  ;;  %v8528_v62 = vld [vmem:[#allocation30_spill] sm:$0xff]  ;;  %v8529_v0 = vld [vmem:[#allocation31_spill] sm:$0xff]  ;;  %v8530_v26 = vld [vmem:[#allocation32_spill] sm:$0xff]  ;;  %v2543_v44 = vpack.c.bf16 %v7331_v1, %v7327_v47  ;;  %v2544_v15 = vpack.c.bf16 %v7341_v61, %v7333_v21  ;;  %v2545_v4 = vpack.c.bf16 %v7347_v58, %v7343_v56 }
 0x41f   : > { %v2538_v5 = vpack.c.bf16 %v8528_v62, %v8527_v55  ;;  %v2539_v57 = vpack.c.bf16 %v8530_v26, %v8529_v0  ;;  %2570 = vst [vmem:[#allocation13] sm:$0xff] %v2536_v29  ;;  %v8531_v59 = vld [vmem:[#allocation33_spill] sm:$0xff]  ;;  %v2547_v19 = vpack.c.bf16 %v7363_v35, %v7359_v63  ;;  %v8532_v48 = vld [vmem:[#allocation34_spill] sm:$0xff]  ;;  %v2549_v47 = vpack.c.bf16 %v7379_v20, %v7375_v32  ;;  %v8534_v35 = vld [vmem:[#allocation36_spill] sm:$0xff] }
 0x420   : > { %2571 = vst [vmem:[#allocation13 + $0x8] sm:$0xff] %v2537_v24  ;;  %v2546_v11 = vpack.c.bf16 %v7357_v30, %v8531_v59  ;;  %v2548_v7 = vpack.c.bf16 %v8532_v48, %v7365_v25  ;;  %v2550_v1 = vpack.c.bf16 %v7389_v9, %v7381_v34  ;;  %v2551_v21 = vpack.c.bf16 %v7395_v17, %v7391_v22  ;;  %v8533_v30 = vld [vmem:[#allocation35_spill] sm:$0xff]  ;;  %v8535_v25 = vld [vmem:[#allocation37_spill] sm:$0xff]  ;;  %v8536_v20 = vld [vmem:[#allocation38_spill] sm:$0xff] }
 0x421   : > { %2572 = vst [vmem:[#allocation13 + $0x10] sm:$0xff] %v2538_v5  ;;  %v2552_v61 = vpack.c.bf16 %v7401_v28, %v7397_v18  ;;  %v2553_v56 = vpack.c.bf16 %v7407_v40, %v7403_v8  ;;  %v2554_v58 = vpack.c.bf16 %v7413_v52, %v7409_v50  ;;  %v2555_v63 = vpack.c.bf16 %v8533_v30, %v7415_v37  ;;  %v8537_v34 = vld [vmem:[#allocation39_spill] sm:$0xff]  ;;  %v8538_v22 = vld [vmem:[#allocation40_spill] sm:$0xff]  ;;  %v8539_v17 = vld [vmem:[#allocation41_spill] sm:$0xff] }
 0x422   : > { %2573 = vst [vmem:[#allocation13 + $0x18] sm:$0xff] %v2539_v57  ;;  %v2556_v32 = vpack.c.bf16 %v8535_v25, %v8534_v35  ;;  %v2557_v9 = vpack.c.bf16 %v8537_v34, %v8536_v20  ;;  %v2558_v18 = vpack.c.bf16 %v8539_v17, %v8538_v22  ;;  %v8540_v28 = vld [vmem:[#allocation42_spill] sm:$0xff]  ;;  %v8541_v8 = vld [vmem:[#allocation43_spill] sm:$0xff]  ;;  %v8542_v50 = vld [vmem:[#allocation44_spill] sm:$0xff]  ;;  %v2566_v38 = vpack.c.bf16 %v7485_v13, %v7481_v3 }
 0x423   : > { %2574 = vst [vmem:[#allocation13 + $0x20] sm:$0xff] %v2540_v53  ;;  %v2559_v40 = vpack.c.bf16 %v8541_v8, %v8540_v28  ;;  %v8543_v52 = vld [vmem:[#allocation45_spill] sm:$0xff]  ;;  %v8544_v60 = vld [vmem:[#allocation46_spill] sm:$0xff]  ;;  %v8545_v45 = vld [vmem:[#allocation47_spill] sm:$0xff]  ;;  %v2567_v29 = vpack.c.bf16 %v7490_v6, %v7487_v27 }
 0x424   : > { %2575 = vst [vmem:[#allocation13 + $0x28] sm:$0xff] %v2541_v16  ;;  %v2560_v37 = vpack.c.bf16 %v8543_v52, %v8542_v50  ;;  %v2561_v36 = vpack.c.bf16 %v8545_v45, %v8544_v60  ;;  %v8546_v54 = vld [vmem:[#allocation48_spill] sm:$0xff]  ;;  %v8547_v2 = vld [vmem:[#allocation49_spill] sm:$0xff]  ;;  %v8548_v14 = vld [vmem:[#allocation50_spill] sm:$0xff] }
 0x425   : > { %2576 = vst [vmem:[#allocation13 + $0x30] sm:$0xff] %v2542_v42  ;;  %v2562_v33 = vpack.c.bf16 %v8547_v2, %v8546_v54  ;;  %v8549_v43 = vld [vmem:[#allocation51_spill] sm:$0xff]  ;;  %v8550_v46 = vld [vmem:[#allocation52_spill] sm:$0xff]  ;;  %v8551_v41 = vld [vmem:[#allocation53_spill] sm:$0xff] }
 0x426   : > { %2577 = vst [vmem:[#allocation13 + $0x38] sm:$0xff] %v2543_v44  ;;  %v2563_v31 = vpack.c.bf16 %v8549_v43, %v8548_v14  ;;  %v2564_v39 = vpack.c.bf16 %v8551_v41, %v8550_v46  ;;  %v8552_v49 = vld [vmem:[#allocation54_spill] sm:$0xff] }
 0x427   : > { %2578 = vst [vmem:[#allocation13 + $0x40] sm:$0xff] %v2544_v15  ;;  %v2565_v10 = vpack.c.bf16 %v7479_v23, %v8552_v49 }
 0x428   : > { %2579 = vst [vmem:[#allocation13 + $0x48] sm:$0xff] %v2545_v4 }
 0x429   : > { %2580 = vst [vmem:[#allocation13 + $0x50] sm:$0xff] %v2546_v11 }
 0x42a   : > { %2581 = vst [vmem:[#allocation13 + $0x58] sm:$0xff] %v2547_v19 }
 0x42b   : > { %2582 = vst [vmem:[#allocation13 + $0x60] sm:$0xff] %v2548_v7 }
 0x42c   : > { %2583 = vst [vmem:[#allocation13 + $0x68] sm:$0xff] %v2549_v47 }
 0x42d   : > { %2584 = vst [vmem:[#allocation13 + $0x70] sm:$0xff] %v2550_v1 }
 0x42e   : > { %2585 = vst [vmem:[#allocation13 + $0x78] sm:$0xff] %v2551_v21 }
 0x42f   : > { %2586 = vst [vmem:[#allocation13 + $0x80] sm:$0xff] %v2552_v61 }
 0x430   : > { %2587 = vst [vmem:[#allocation13 + $0x88] sm:$0xff] %v2553_v56 }
 0x431   : > { %2588 = vst [vmem:[#allocation13 + $0x90] sm:$0xff] %v2554_v58 }
 0x432   : > { %2589 = vst [vmem:[#allocation13 + $0x98] sm:$0xff] %v2555_v63 }
 0x433   : > { %2590 = vst [vmem:[#allocation13 + $0xa0] sm:$0xff] %v2556_v32 }
 0x434   : > { %2591 = vst [vmem:[#allocation13 + $0xa8] sm:$0xff] %v2557_v9 }
 0x435   : > { %2592 = vst [vmem:[#allocation13 + $0xb0] sm:$0xff] %v2558_v18 }
 0x436   : > { %2593 = vst [vmem:[#allocation13 + $0xb8] sm:$0xff] %v2559_v40 }
 0x437   : > { %2594 = vst [vmem:[#allocation13 + $0xc0] sm:$0xff] %v2560_v37 }
 0x438   : > { %2595 = vst [vmem:[#allocation13 + $0xc8] sm:$0xff] %v2561_v36 }
 0x439   : > { %2596 = vst [vmem:[#allocation13 + $0xd0] sm:$0xff] %v2562_v33 }
 0x43a   : > { %2597 = vst [vmem:[#allocation13 + $0xd8] sm:$0xff] %v2563_v31 }
 0x43b   : > { %2598 = vst [vmem:[#allocation13 + $0xe0] sm:$0xff] %v2564_v39 }
 0x43c   : > { %2599 = vst [vmem:[#allocation13 + $0xe8] sm:$0xff] %v2565_v10 }
 0x43d   : > { %2600 = vst [vmem:[#allocation13 + $0xf0] sm:$0xff] %v2566_v38 }
 0x43e   : > { %2601 = vst [vmem:[#allocation13 + $0xf8] sm:$0xff] %v2567_v29 }
 0x43f PF: > { %p5493_p7 = scmp.eq.s32.totalorder %s8634_s10, 0 }
 0x441   : > { %2605 = sbr.rel (%p5493_p7) target bundleno = 2101 (0x835), region = 84 }
 0x446   : > { %v5680_v51 = vld [vmem:[#allocation13 + $0x70] sm:$0xf]  ;;  %v6191_v12 = vld [vmem:[#allocation13 + $0x74] sm:$0xf0]  ;;  %v6190_v62 = vld [vmem:[#allocation13 + $0x74] sm:$0xf] }
 0x447   : > { %v5744_v23 = vld [vmem:[#allocation13 + $0xf0] sm:$0xf]  ;;  %v5681_v24 = vor.u32 %v6191_v12, %v5680_v51  ;;  %v6207_v55 = vld [vmem:[#allocation13 + $0xf4] sm:$0xf0]  ;;  %v5682_v3 = vld [vmem:[#allocation13 + $0x78] sm:$0xf0] }
 0x448   : > { %v5745_v13 = vor.u32 %v6207_v55, %v5744_v23  ;;  %v5685_v5 = vor.u32 %v6190_v62, %v5682_v3  ;;  %v6206_v0 = vld [vmem:[#allocation13 + $0xf4] sm:$0xf]  ;;  %v5746_v27 = vld [vmem:[#allocation13 + $0xf8] sm:$0xf0]  ;;  %v5672_v6 = vld [vmem:[#allocation13 + $0x60] sm:$0xf] }
 0x449   : > { %2995 = vmatpush.bf16.msra.mxu0 %v5681_v24  ;;  %v5749_v26 = vor.u32 %v6206_v0, %v5746_v27  ;;  %v6189_v57 = vld [vmem:[#allocation13 + $0x64] sm:$0xf0]  ;;  %v5736_v53 = vld [vmem:[#allocation13 + $0xe0] sm:$0xf]  ;;  %v6188_v15 = vld [vmem:[#allocation13 + $0x64] sm:$0xf] }
 0x44a   : > { %v6205_v16 = vld [vmem:[#allocation13 + $0xe4] sm:$0xf0]  ;;  %3084 = vmatpush.bf16.msra.mxu1 %v5745_v13  ;;  %3173 = vmatpush.bf16.msra.mxu2 %v5685_v5  ;;  %v5673_v42 = vor.u32 %v6189_v57, %v5672_v6  ;;  %v5674_v4 = vld [vmem:[#allocation13 + $0x68] sm:$0xf0]  ;;  %v6204_v59 = vld [vmem:[#allocation13 + $0xe4] sm:$0xf] }
 0x44b   : > { %v5737_v44 = vor.u32 %v6205_v16, %v5736_v53  ;;  %3262 = vmatpush.bf16.msra.mxu3 %v5749_v26  ;;  %v5677_v11 = vor.u32 %v6188_v15, %v5674_v4  ;;  %v5738_v19 = vld [vmem:[#allocation13 + $0xe8] sm:$0xf0]  ;;  %v5664_v48 = vld [vmem:[#allocation13 + $0x50] sm:$0xf]  ;;  %v6187_v7 = vld [vmem:[#allocation13 + $0x54] sm:$0xf0] }
 0x44c   : > { %v5741_v47 = vor.u32 %v6204_v59, %v5738_v19  ;;  %v5728_v1 = vld [vmem:[#allocation13 + $0xd0] sm:$0xf]  ;;  %v6203_v21 = vld [vmem:[#allocation13 + $0xd4] sm:$0xf0]  ;;  %v6186_v61 = vld [vmem:[#allocation13 + $0x54] sm:$0xf]  ;;  %v5665_v56 = vor.u32 %v6187_v7, %v5664_v48 }
 0x44d   : > { %2996 = vmatpush.bf16.msra.mxu0 %v5673_v42  ;;  %v5666_v58 = vld [vmem:[#allocation13 + $0x58] sm:$0xf0]  ;;  %v6202_v30 = vld [vmem:[#allocation13 + $0xd4] sm:$0xf]  ;;  %v5729_v35 = vor.u32 %v6203_v21, %v5728_v1  ;;  %v5656_v32 = vld [vmem:[#allocation13 + $0x40] sm:$0xf] }
 0x44e   : > { %v5730_v63 = vld [vmem:[#allocation13 + $0xd8] sm:$0xf0]  ;;  %3085 = vmatpush.bf16.msra.mxu1 %v5737_v44  ;;  %3174 = vmatpush.bf16.msra.mxu2 %v5677_v11  ;;  %v5669_v25 = vor.u32 %v6186_v61, %v5666_v58  ;;  %v6185_v20 = vld [vmem:[#allocation13 + $0x44] sm:$0xf0]  ;;  %v5720_v34 = vld [vmem:[#allocation13 + $0xc0] sm:$0xf] }
 0x44f   : > { %3263 = vmatpush.bf16.msra.mxu3 %v5741_v47  ;;  %v5733_v9 = vor.u32 %v6202_v30, %v5730_v63  ;;  %v6201_v22 = vld [vmem:[#allocation13 + $0xc4] sm:$0xf0]  ;;  %v6184_v17 = vld [vmem:[#allocation13 + $0x44] sm:$0xf]  ;;  %v5658_v18 = vld [vmem:[#allocation13 + $0x48] sm:$0xf0]  ;;  %v5657_v40 = vor.u32 %v6185_v20, %v5656_v32 }
 0x450   : > { %v6200_v28 = vld [vmem:[#allocation13 + $0xc4] sm:$0xf]  ;;  %v5722_v8 = vld [vmem:[#allocation13 + $0xc8] sm:$0xf0]  ;;  %v5721_v50 = vor.u32 %v6201_v22, %v5720_v34  ;;  %v5661_v52 = vor.u32 %v6184_v17, %v5658_v18  ;;  %v5648_v37 = vld [vmem:[#allocation13 + $0x30] sm:$0xf] }
 0x451   : > { %2997 = vmatpush.bf16.msra.mxu0 %v5665_v56  ;;  %v6183_v60 = vld [vmem:[#allocation13 + $0x34] sm:$0xf0]  ;;  %v5712_v45 = vld [vmem:[#allocation13 + $0xb0] sm:$0xf]  ;;  %v5725_v36 = vor.u32 %v6200_v28, %v5722_v8  ;;  %v6182_v2 = vld [vmem:[#allocation13 + $0x34] sm:$0xf] }
 0x452   : > { %3086 = vmatpush.bf16.msra.mxu1 %v5729_v35  ;;  %3175 = vmatpush.bf16.msra.mxu2 %v5669_v25  ;;  %v6199_v54 = vld [vmem:[#allocation13 + $0xb4] sm:$0xf0]  ;;  %v5650_v33 = vld [vmem:[#allocation13 + $0x38] sm:$0xf0]  ;;  %v6198_v14 = vld [vmem:[#allocation13 + $0xb4] sm:$0xf]  ;;  %v5649_v31 = vor.u32 %v6183_v60, %v5648_v37 }
 0x453   : > { %3264 = vmatpush.bf16.msra.mxu3 %v5733_v9  ;;  %v5714_v43 = vld [vmem:[#allocation13 + $0xb8] sm:$0xf0]  ;;  %v5713_v46 = vor.u32 %v6199_v54, %v5712_v45  ;;  %v5653_v41 = vor.u32 %v6182_v2, %v5650_v33  ;;  %v5640_v39 = vld [vmem:[#allocation13 + $0x20] sm:$0xf]  ;;  %v6181_v49 = vld [vmem:[#allocation13 + $0x24] sm:$0xf0] }
 0x454   : > { %v5704_v10 = vld [vmem:[#allocation13 + $0xa0] sm:$0xf]  ;;  %v5717_v38 = vor.u32 %v6198_v14, %v5714_v43  ;;  %v6197_v29 = vld [vmem:[#allocation13 + $0xa4] sm:$0xf0]  ;;  %v6180_v51 = vld [vmem:[#allocation13 + $0x24] sm:$0xf]  ;;  %v5641_v55 = vor.u32 %v6181_v49, %v5640_v39 }
 0x455   : > { %2998 = vmatpush.bf16.msra.mxu0 %v5657_v40  ;;  %v5642_v12 = vld [vmem:[#allocation13 + $0x28] sm:$0xf0]  ;;  %v6196_v23 = vld [vmem:[#allocation13 + $0xa4] sm:$0xf]  ;;  %v5705_v62 = vor.u32 %v6197_v29, %v5704_v10  ;;  %v5632_v13 = vld [vmem:[#allocation13 + $0x10] sm:$0xf] }
 0x456   : > { %3087 = vmatpush.bf16.msra.mxu1 %v5721_v50  ;;  %3176 = vmatpush.bf16.msra.mxu2 %v5661_v52  ;;  %v5706_v24 = vld [vmem:[#allocation13 + $0xa8] sm:$0xf0]  ;;  %v5645_v3 = vor.u32 %v6180_v51, %v5642_v12  ;;  %v6179_v5 = vld [vmem:[#allocation13 + $0x14] sm:$0xf0]  ;;  %v5696_v0 = vld [vmem:[#allocation13 + $0x90] sm:$0xf] }
 0x457   : > { %3265 = vmatpush.bf16.msra.mxu3 %v5725_v36  ;;  %v5709_v27 = vor.u32 %v6196_v23, %v5706_v24  ;;  %v6195_v6 = vld [vmem:[#allocation13 + $0x94] sm:$0xf0]  ;;  %v6178_v26 = vld [vmem:[#allocation13 + $0x14] sm:$0xf]  ;;  %v5634_v57 = vld [vmem:[#allocation13 + $0x18] sm:$0xf0]  ;;  %v5633_v42 = vor.u32 %v6179_v5, %v5632_v13 }
 0x458   : > { %v6194_v53 = vld [vmem:[#allocation13 + $0x94] sm:$0xf]  ;;  %v5698_v16 = vld [vmem:[#allocation13 + $0x98] sm:$0xf0]  ;;  %v5624_v44 = vld [vmem:[#allocation13] sm:$0xf]  ;;  %v5697_v4 = vor.u32 %v6195_v6, %v5696_v0  ;;  %v5637_v59 = vor.u32 %v6178_v26, %v5634_v57 }
 0x459   : > { %2999 = vmatpush.bf16.msra.mxu0 %v5649_v31  ;;  %v6177_v15 = vld [vmem:[#allocation13 + $0x4] sm:$0xf0]  ;;  %v5688_v11 = vld [vmem:[#allocation13 + $0x80] sm:$0xf]  ;;  %v6176_v48 = vld [vmem:[#allocation13 + $0x4] sm:$0xf]  ;;  %v5701_v7 = vor.u32 %v6194_v53, %v5698_v16 }
 0x45a   : > { %3088 = vmatpush.bf16.msra.mxu1 %v5713_v46  ;;  %3177 = vmatpush.bf16.msra.mxu2 %v5653_v41  ;;  %v6193_v19 = vld [vmem:[#allocation13 + $0x84] sm:$0xf0]  ;;  %v5626_v47 = vld [vmem:[#allocation13 + $0x8] sm:$0xf0]  ;;  %v6192_v1 = vld [vmem:[#allocation13 + $0x84] sm:$0xf]  ;;  %v5625_v30 = vor.u32 %v6177_v15, %v5624_v44 }
 0x45b   : > { %3266 = vmatpush.bf16.msra.mxu3 %v5717_v38  ;;  %v5690_v21 = vld [vmem:[#allocation13 + $0x88] sm:$0xf0]  ;;  %v5496_v61 = vld [vmem:[#allocation4] sm:$0xf]  ;;  %v5810_v58 = vld [vmem:[%s6814_s9 + $0x78] sm:$0xf0]  ;;  %v5689_v32 = vor.u32 %v6193_v19, %v5688_v11  ;;  %v5629_v20 = vor.u32 %v6176_v48, %v5626_v47 }
 0x45c   : > { %v6222_v56 = vld [vmem:[%s6814_s9 + $0x74] sm:$0xf]  ;;  %v6145_v63 = vld [vmem:[#allocation4 + $0x4] sm:$0xf0]  ;;  %v5874_v25 = vld [vmem:[%s6814_s9 + $0xf8] sm:$0xf0]  ;;  %v5693_v22 = vor.u32 %v6192_v1, %v5690_v21 }
 0x45d   : > { %3000 = vmatpush.bf16.msra.mxu0 %v5641_v55  ;;  %v6238_v35 = vld [vmem:[%s6814_s9 + $0xf4] sm:$0xf]  ;;  %v6144_v34 = vld [vmem:[#allocation4 + $0x4] sm:$0xf]  ;;  %v5498_v9 = vld [vmem:[#allocation4 + $0x8] sm:$0xf0]  ;;  %v5813_v17 = vor.u32 %v6222_v56, %v5810_v58  ;;  %v5497_v8 = vor.u32 %v6145_v63, %v5496_v61 }
 0x45e   : > { %3089 = vmatpush.bf16.msra.mxu1 %v5705_v62  ;;  %3178 = vmatpush.bf16.msra.mxu2 %v5645_v3  ;;  %v5808_v18 = vld [vmem:[%s6814_s9 + $0x70] sm:$0xf]  ;;  %v6223_v28 = vld [vmem:[%s6814_s9 + $0x74] sm:$0xf0]  ;;  %v5877_v40 = vor.u32 %v6238_v35, %v5874_v25  ;;  %v5501_v37 = vor.u32 %v6144_v34, %v5498_v9  ;;  %v6220_v36 = vld [vmem:[%s6814_s9 + $0x64] sm:$0xf] }
 0x45f   : > { %3267 = vmatpush.bf16.msra.mxu3 %v5709_v27  ;;  %v5872_v50 = vld [vmem:[%s6814_s9 + $0xf0] sm:$0xf]  ;;  %v6239_v52 = vld [vmem:[%s6814_s9 + $0xf4] sm:$0xf0]  ;;  %v5809_v60 = vor.u32 %v6223_v28, %v5808_v18  ;;  %v5802_v54 = vld [vmem:[%s6814_s9 + $0x68] sm:$0xf0] }
 0x460   : > { %v5873_v45 = vor.u32 %v6239_v52, %v5872_v50  ;;  %v6236_v2 = vld [vmem:[%s6814_s9 + $0xe4] sm:$0xf]  ;;  %v5805_v33 = vor.u32 %v6220_v36, %v5802_v54  ;;  %v5866_v14 = vld [vmem:[%s6814_s9 + $0xe8] sm:$0xf0]  ;;  %v5800_v43 = vld [vmem:[%s6814_s9 + $0x60] sm:$0xf] }
 0x461   : > { %3001 = vmatpush.bf16.msra.mxu0 %v5633_v42  ;;  %v6221_v31 = vld [vmem:[%s6814_s9 + $0x64] sm:$0xf0]  ;;  %v5869_v46 = vor.u32 %v6236_v2, %v5866_v14  ;;  %v5864_v39 = vld [vmem:[%s6814_s9 + $0xe0] sm:$0xf]  ;;  %v5504_v38 = vld [vmem:[#allocation4 + $0x10] sm:$0xf] }
 0x462   : > { %3090 = vmatpush.bf16.msra.mxu1 %v5697_v4  ;;  %3179 = vmatpush.bf16.msra.mxu2 %v5637_v59  ;;  %v5801_v41 = vor.u32 %v6221_v31, %v5800_v43  ;;  %v6237_v49 = vld [vmem:[%s6814_s9 + $0xe4] sm:$0xf0]  ;;  %v6147_v29 = vld [vmem:[#allocation4 + $0x14] sm:$0xf0]  ;;  %v6146_v51 = vld [vmem:[#allocation4 + $0x14] sm:$0xf] }
 0x463   : > { %3268 = vmatpush.bf16.msra.mxu3 %v5701_v7  ;;  %v5865_v10 = vor.u32 %v6237_v49, %v5864_v39  ;;  %v5506_v12 = vld [vmem:[#allocation4 + $0x18] sm:$0xf0]  ;;  %v5505_v23 = vor.u32 %v6147_v29, %v5504_v38  ;;  %v5512_v55 = vld [vmem:[#allocation4 + $0x20] sm:$0xf]  ;;  %v6149_v62 = vld [vmem:[#allocation4 + $0x24] sm:$0xf0] }
 0x464   : > { %v5509_v24 = vor.u32 %v6146_v51, %v5506_v12  ;;  %v6148_v3 = vld [vmem:[#allocation4 + $0x24] sm:$0xf]  ;;  %v5514_v13 = vld [vmem:[#allocation4 + $0x28] sm:$0xf0]  ;;  %v5513_v5 = vor.u32 %v6149_v62, %v5512_v55  ;;  %v6218_v27 = vld [vmem:[%s6814_s9 + $0x54] sm:$0xf] }
 0x465   : > { %3002 = vmatpush.bf16.msra.mxu0 %v5625_v30  ;;  %v5517_v0 = vor.u32 %v6148_v3, %v5514_v13  ;;  %v5794_v6 = vld [vmem:[%s6814_s9 + $0x58] sm:$0xf0]  ;;  %v6234_v26 = vld [vmem:[%s6814_s9 + $0xd4] sm:$0xf]  ;;  %v5792_v16 = vld [vmem:[%s6814_s9 + $0x50] sm:$0xf] }
 0x466   : > { %3091 = vmatpush.bf16.msra.mxu1 %v5689_v32  ;;  %3180 = vmatpush.bf16.msra.mxu2 %v5629_v20  ;;  %v5797_v57 = vor.u32 %v6218_v27, %v5794_v6  ;;  %v5858_v53 = vld [vmem:[%s6814_s9 + $0xd8] sm:$0xf0]  ;;  %v6219_v42 = vld [vmem:[%s6814_s9 + $0x54] sm:$0xf0]  ;;  %v5856_v4 = vld [vmem:[%s6814_s9 + $0xd0] sm:$0xf] }
 0x467   : > { %3269 = vmatpush.bf16.msra.mxu3 %v5693_v22  ;;  %v5861_v44 = vor.u32 %v6234_v26, %v5858_v53  ;;  %v5793_v15 = vor.u32 %v6219_v42, %v5792_v16  ;;  %v6235_v59 = vld [vmem:[%s6814_s9 + $0xd4] sm:$0xf0]  ;;  %v5520_v19 = vld [vmem:[#allocation4 + $0x30] sm:$0xf]  ;;  %v6150_v7 = vld [vmem:[#allocation4 + $0x34] sm:$0xf] }
 0x468   : > { %3003 = vmatmul.bf16.vlgmr.msra.gmra.mxu0 %v5497_v8  ;;  %v5857_v11 = vor.u32 %v6235_v59, %v5856_v4  ;;  %v6151_v48 = vld [vmem:[#allocation4 + $0x34] sm:$0xf0]  ;;  %v5522_v47 = vld [vmem:[#allocation4 + $0x38] sm:$0xf0]  ;;  %v5528_v61 = vld [vmem:[#allocation4 + $0x40] sm:$0xf] }
 0x469   : > { %3092 = vmatmul.bf16.vlgmr.msra.gmra.mxu1 %v5501_v37  ;;  %3181 = vmatmul.bf16.vlgmr.msra.gmra.mxu2 %v5497_v8  ;;  %v5521_v1 = vor.u32 %v6151_v48, %v5520_v19  ;;  %v5525_v21 = vor.u32 %v6150_v7, %v5522_v47  ;;  %v6153_v56 = vld [vmem:[#allocation4 + $0x44] sm:$0xf0]  ;;  %v6152_v58 = vld [vmem:[#allocation4 + $0x44] sm:$0xf]  ;;  %v5530_v30 = vld [vmem:[#allocation4 + $0x48] sm:$0xf0] }
 0x46a   : > { %3759 = vmatpush.bf16.msrb.mxu2 %v5813_v17  ;;  %3270 = vmatmul.bf16.vlgmr.msra.gmra.mxu3 %v5501_v37  ;;  %v5529_v63 = vor.u32 %v6153_v56, %v5528_v61  ;;  %v5533_v35 = vor.u32 %v6152_v58, %v5530_v30  ;;  %v6216_v25 = vld [vmem:[%s6814_s9 + $0x44] sm:$0xf]  ;;  %v5786_v32 = vld [vmem:[%s6814_s9 + $0x48] sm:$0xf0]  ;;  %v5784_v22 = vld [vmem:[%s6814_s9 + $0x40] sm:$0xf] }
 0x46b   : > { %3848 = vmatpush.bf16.msrb.mxu3 %v5877_v40  ;;  %3581 = vmatpush.bf16.msrb.mxu0 %v5809_v60  ;;  %v6232_v20 = vld [vmem:[%s6814_s9 + $0xc4] sm:$0xf]  ;;  %v5789_v34 = vor.u32 %v6216_v25, %v5786_v32  ;;  %v5850_v9 = vld [vmem:[%s6814_s9 + $0xc8] sm:$0xf0]  ;;  %v6217_v17 = vld [vmem:[%s6814_s9 + $0x44] sm:$0xf0] }
 0x46c   : > { %3670 = vmatpush.bf16.msrb.mxu1 %v5873_v45  ;;  %v5853_v18 = vor.u32 %v6232_v20, %v5850_v9  ;;  %v5785_v28 = vor.u32 %v6217_v17, %v5784_v22  ;;  %v5848_v8 = vld [vmem:[%s6814_s9 + $0xc0] sm:$0xf]  ;;  %v6233_v40 = vld [vmem:[%s6814_s9 + $0xc4] sm:$0xf0]  ;;  %v5536_v52 = vld [vmem:[#allocation4 + $0x50] sm:$0xf] }
 0x46d   : > { %v5849_v50 = vor.u32 %v6233_v40, %v5848_v8  ;;  %v6155_v37 = vld [vmem:[#allocation4 + $0x54] sm:$0xf0]  ;;  %v6154_v60 = vld [vmem:[#allocation4 + $0x54] sm:$0xf]  ;;  %v5538_v45 = vld [vmem:[#allocation4 + $0x58] sm:$0xf0] }
 0x46e   : > { %3760 = vmatpush.bf16.msrb.mxu2 %v5805_v33  ;;  %v5537_v36 = vor.u32 %v6155_v37, %v5536_v52  ;;  %v5541_v54 = vor.u32 %v6154_v60, %v5538_v45  ;;  %v5544_v2 = vld [vmem:[#allocation4 + $0x60] sm:$0xf]  ;;  %v6157_v33 = vld [vmem:[#allocation4 + $0x64] sm:$0xf0]  ;;  %v6156_v14 = vld [vmem:[#allocation4 + $0x64] sm:$0xf] }
 0x46f   : > { %3849 = vmatpush.bf16.msrb.mxu3 %v5869_v46  ;;  %3582 = vmatpush.bf16.msrb.mxu0 %v5801_v41  ;;  %v5546_v43 = vld [vmem:[#allocation4 + $0x68] sm:$0xf0]  ;;  %v5545_v31 = vor.u32 %v6157_v33, %v5544_v2  ;;  %v6214_v41 = vld [vmem:[%s6814_s9 + $0x34] sm:$0xf]  ;;  %v5778_v39 = vld [vmem:[%s6814_s9 + $0x38] sm:$0xf0] }
 0x470   : > { %3671 = vmatpush.bf16.msrb.mxu1 %v5865_v10  ;;  %v5549_v46 = vor.u32 %v6156_v14, %v5546_v43  ;;  %v6230_v49 = vld [vmem:[%s6814_s9 + $0xb4] sm:$0xf]  ;;  %v5781_v10 = vor.u32 %v6214_v41, %v5778_v39  ;;  %v5842_v38 = vld [vmem:[%s6814_s9 + $0xb8] sm:$0xf0]  ;;  %v5552_v51 = vld [vmem:[#allocation4 + $0x70] sm:$0xf] }
 0x471   : > { %v5845_v29 = vor.u32 %v6230_v49, %v5842_v38  ;;  %v6159_v12 = vld [vmem:[#allocation4 + $0x74] sm:$0xf0]  ;;  %v5840_v55 = vld [vmem:[%s6814_s9 + $0xb0] sm:$0xf]  ;;  %v6158_v62 = vld [vmem:[#allocation4 + $0x74] sm:$0xf] }
 0x472   : > { %3761 = vmatpush.bf16.msrb.mxu2 %v5797_v57  ;;  %v5554_v3 = vld [vmem:[#allocation4 + $0x78] sm:$0xf0]  ;;  %v5553_v27 = vor.u32 %v6159_v12, %v5552_v51  ;;  %v5560_v26 = vld [vmem:[#allocation4 + $0x80] sm:$0xf]  ;;  %v6161_v57 = vld [vmem:[#allocation4 + $0x84] sm:$0xf0] }
 0x473   : > { %3850 = vmatpush.bf16.msrb.mxu3 %v5861_v44  ;;  %3583 = vmatpush.bf16.msrb.mxu0 %v5793_v15  ;;  %v5557_v6 = vor.u32 %v6158_v62, %v5554_v3  ;;  %v6160_v53 = vld [vmem:[#allocation4 + $0x84] sm:$0xf]  ;;  %v5562_v16 = vld [vmem:[#allocation4 + $0x88] sm:$0xf0]  ;;  %v5561_v42 = vor.u32 %v6161_v57, %v5560_v26  ;;  %v6163_v25 = vld [vmem:[#allocation4 + $0x94] sm:$0xf0] }
 0x474   : > { %3672 = vmatpush.bf16.msrb.mxu1 %v5857_v11  ;;  %v5565_v15 = vor.u32 %v6160_v53, %v5562_v16  ;;  %v6212_v11 = vld [vmem:[%s6814_s9 + $0x24] sm:$0xf]  ;;  %v5770_v19 = vld [vmem:[%s6814_s9 + $0x28] sm:$0xf0]  ;;  %v5768_v20 = vld [vmem:[%s6814_s9 + $0x20] sm:$0xf] }
 0x475   : > { %v6228_v48 = vld [vmem:[%s6814_s9 + $0xa4] sm:$0xf]  ;;  %v5773_v7 = vor.u32 %v6212_v11, %v5770_v19  ;;  %v5834_v47 = vld [vmem:[%s6814_s9 + $0xa8] sm:$0xf0]  ;;  %v5832_v9 = vld [vmem:[%s6814_s9 + $0xa0] sm:$0xf] }
 0x476   : > { %3762 = vmatpush.bf16.msrb.mxu2 %v5789_v34  ;;  %v6213_v34 = vld [vmem:[%s6814_s9 + $0x24] sm:$0xf0]  ;;  %v6162_v22 = vld [vmem:[#allocation4 + $0x94] sm:$0xf]  ;;  %v5570_v17 = vld [vmem:[#allocation4 + $0x98] sm:$0xf0] }
 0x477   : > { %3851 = vmatpush.bf16.msrb.mxu3 %v5853_v18  ;;  %3584 = vmatpush.bf16.msrb.mxu0 %v5785_v28  ;;  %v5769_v18 = vor.u32 %v6213_v34, %v5768_v20  ;;  %v6229_v28 = vld [vmem:[%s6814_s9 + $0xa4] sm:$0xf0]  ;;  %v5573_v60 = vor.u32 %v6162_v22, %v5570_v17  ;;  %v5576_v49 = vld [vmem:[#allocation4 + $0xa0] sm:$0xf]  ;;  %v6164_v38 = vld [vmem:[#allocation4 + $0xa4] sm:$0xf] }
 0x478   : > { %3008 = vmatmul.bf16.gmra.mxu0 %v5505_v23  ;;  %3673 = vmatpush.bf16.msrb.mxu1 %v5849_v50  ;;  %v5833_v8 = vor.u32 %v6229_v28, %v5832_v9  ;;  %v5826_v57 = vld [vmem:[%s6814_s9 + $0x98] sm:$0xf0]  ;;  %v5584_v11 = vld [vmem:[#allocation4 + $0xb0] sm:$0xf]  ;;  %v6167_v19 = vld [vmem:[#allocation4 + $0xb4] sm:$0xf0] }
 0x479   : > { %3097 = vmatmul.bf16.gmra.mxu1 %v5509_v24  ;;  %3186 = vmatmul.bf16.gmra.mxu2 %v5505_v23  ;;  %v5776_v23 = vld [vmem:[%s6814_s9 + $0x30] sm:$0xf]  ;;  %p6006_p8 = scmp.ge.s32.totalorder %s6631_s24, 4 }
 0x47a   : > { %3275 = vmatmul.bf16.gmra.mxu3 %v5509_v24  ;;  %3763 = vmatpush.bf16.msrb.mxu2 %v5781_v10  ;;  %v6215_v24 = vld [vmem:[%s6814_s9 + $0x34] sm:$0xf0]  ;;  %v6165_v10 = vld [vmem:[#allocation4 + $0xa4] sm:$0xf0] }
 0x47b   : > { %3852 = vmatpush.bf16.msrb.mxu3 %v5845_v29  ;;  %v5777_v13 = vor.u32 %v6215_v24, %v5776_v23  ;;  %v5578_v29 = vld [vmem:[#allocation4 + $0xa8] sm:$0xf0]  ;;  %v5577_v12 = vor.u32 %v6165_v10, %v5576_v49 }
 0x47d   : > { %3585 = vmatpush.bf16.msrb.mxu0 %v5777_v13 }
 0x47e   : > { %3764 = vmatpush.bf16.msrb.mxu2 %v5773_v7  ;;  %v5760_v7 = vld [vmem:[%s6814_s9 + $0x10] sm:$0xf] }
 0x481   : > { %3586 = vmatpush.bf16.msrb.mxu0 %v5769_v18 }
 0x488   : > { %3013 = vmatmul.bf16.gmra.mxu0 %v5513_v5 }
 0x489   : > { %3102 = vmatmul.bf16.gmra.mxu1 %v5517_v0  ;;  %3191 = vmatmul.bf16.gmra.mxu2 %v5513_v5  ;;  %v6231_v5 = vld [vmem:[%s6814_s9 + $0xb4] sm:$0xf0] }
 0x48a   : > { %3280 = vmatmul.bf16.gmra.mxu3 %v5517_v0  ;;  %v5841_v0 = vor.u32 %v6231_v5, %v5840_v55  ;;  %v5581_v55 = vor.u32 %v6164_v38, %v5578_v29 }
 0x48c   : > { %3674 = vmatpush.bf16.msrb.mxu1 %v5841_v0  ;;  %v6210_v0 = vld [vmem:[%s6814_s9 + $0x14] sm:$0xf] }
 0x490   : > { %3675 = vmatpush.bf16.msrb.mxu1 %v5833_v8 }
 0x498   : > { %3018 = vmatmul.bf16.gmra.mxu0 %v5521_v1 }
 0x499   : > { %3107 = vmatmul.bf16.gmra.mxu1 %v5525_v21  ;;  %3196 = vmatmul.bf16.gmra.mxu2 %v5521_v1 }
 0x49a   : > { %3285 = vmatmul.bf16.gmra.mxu3 %v5525_v21  ;;  %v5837_v21 = vor.u32 %v6228_v48, %v5834_v47  ;;  %v6211_v47 = vld [vmem:[%s6814_s9 + $0x14] sm:$0xf0] }
 0x49c   : > { %3853 = vmatpush.bf16.msrb.mxu3 %v5837_v21  ;;  %v6166_v21 = vld [vmem:[#allocation4 + $0xb4] sm:$0xf] }
 0x4a8   : > { %3023 = vmatmul.bf16.gmra.mxu0 %v5529_v63 }
 0x4a9   : > { %3112 = vmatmul.bf16.gmra.mxu1 %v5533_v35  ;;  %3201 = vmatmul.bf16.gmra.mxu2 %v5529_v63 }
 0x4aa   : > { %3290 = vmatmul.bf16.gmra.mxu3 %v5533_v35  ;;  %v5568_v35 = vld [vmem:[#allocation4 + $0x90] sm:$0xf] }
 0x4ab   : > { %v5569_v50 = vor.u32 %v6163_v25, %v5568_v35  ;;  %v5585_v35 = vor.u32 %v6167_v19, %v5584_v11  ;;  %v6225_v19 = vld [vmem:[%s6814_s9 + $0x84] sm:$0xf0] }
 0x4b8   : > { %3028 = vmatmul.bf16.gmra.mxu0 %v5537_v36 }
 0x4b9   : > { %3117 = vmatmul.bf16.gmra.mxu1 %v5541_v54  ;;  %3206 = vmatmul.bf16.gmra.mxu2 %v5537_v36 }
 0x4ba   : > { %3295 = vmatmul.bf16.gmra.mxu3 %v5541_v54 }
 0x4c8   : > { %3033 = vmatmul.bf16.gmra.mxu0 %v5545_v31 }
 0x4c9   : > { %3122 = vmatmul.bf16.gmra.mxu1 %v5549_v46  ;;  %3211 = vmatmul.bf16.gmra.mxu2 %v5545_v31 }
 0x4ca   : > { %3300 = vmatmul.bf16.gmra.mxu3 %v5549_v46 }
 0x4d8   : > { %3038 = vmatmul.bf16.gmra.mxu0 %v5553_v27 }
 0x4d9   : > { %3127 = vmatmul.bf16.gmra.mxu1 %v5557_v6  ;;  %3216 = vmatmul.bf16.gmra.mxu2 %v5553_v27  ;;  %v5762_v27 = vld [vmem:[%s6814_s9 + $0x18] sm:$0xf0] }
 0x4da   : > { %3305 = vmatmul.bf16.gmra.mxu3 %v5557_v6  ;;  %v6226_v6 = vld [vmem:[%s6814_s9 + $0x94] sm:$0xf]  ;;  %v5765_v26 = vor.u32 %v6210_v0, %v5762_v27 }
 0x4db   : > { %v5829_v16 = vor.u32 %v6226_v6, %v5826_v57  ;;  %v5600_v57 = vld [vmem:[#allocation4 + $0xd0] sm:$0xf] }
 0x4dc   : > { %3765 = vmatpush.bf16.msrb.mxu2 %v5765_v26 }
 0x4dd   : > { %3854 = vmatpush.bf16.msrb.mxu3 %v5829_v16 }
 0x4e5   : > { %v3004_v44 = vpop.f32.mrf.mxu0 }
 0x4e6   : > { %v3093_v4 = vpop.f32.mrf.mxu1 }
 0x4e7   : > { %v3094_v59 = vadd.f32 %v3093_v4, %v3004_v44 }
 0x4e8   : > { %3043 = vmatmul.bf16.gmra.mxu0 %v5561_v42 }
 0x4e9   : > { %3132 = vmatmul.bf16.gmra.mxu1 %v5565_v15  ;;  %3221 = vmatmul.bf16.gmra.mxu2 %v5561_v42 }
 0x4ea   : > { %3310 = vmatmul.bf16.gmra.mxu3 %v5565_v15 }
 0x4ec   : > { %v3182_v1 = vpop.f32.mrf.mxu2 }
 0x4ed   : > { %v3271_v61 = vpop.f32.mrf.mxu3  ;;  %v3006_v56 = vpop.f32.mrf.mxu0 }
 0x4ee   : > { %v3272_v58 = vadd.f32 %v3271_v61, %v3182_v1  ;;  %v3095_v30 = vpop.f32.mrf.mxu1  ;;  %v5824_v1 = vld [vmem:[%s6814_s9 + $0x90] sm:$0xf]  ;;  %v5586_v61 = vld [vmem:[#allocation4 + $0xb8] sm:$0xf0] }
 0x4ef   : > { %v3096_v63 = vadd.f32 %v3095_v30, %v3006_v56  ;;  %v5761_v56 = vor.u32 %v6211_v47, %v5760_v7  ;;  %v5589_v34 = vor.u32 %v6166_v21, %v5586_v61 }
 0x4f1   : > { %v7667_v32 = vpack.c.bf16 %v3096_v63, %v3094_v59  ;;  %3587 = vmatpush.bf16.msrb.mxu0 %v5761_v56 }
 0x4f4   : > { %v3184_v40 = vpop.f32.mrf.mxu2 }
 0x4f5   : > { %v3273_v52 = vpop.f32.mrf.mxu3  ;;  %v3009_v37 = vpop.f32.mrf.mxu0 }
 0x4f6   : > { %v3274_v45 = vadd.f32 %v3273_v52, %v3184_v40  ;;  %v3098_v36 = vpop.f32.mrf.mxu1 }
 0x4f7   : > { %v3099_v54 = vadd.f32 %v3098_v36, %v3009_v37  ;;  %v6169_v36 = vld [vmem:[#allocation4 + $0xc4] sm:$0xf0] }
 0x4f8   : > { %v7673_v2 = vpack.c.bf16 %v3274_v45, %v3272_v58  ;;  %3048 = vmatmul.bf16.gmra.mxu0 %v5569_v50  ;;  %v6227_v58 = vld [vmem:[%s6814_s9 + $0x94] sm:$0xf0]  ;;  %v5592_v45 = vld [vmem:[#allocation4 + $0xc0] sm:$0xf] }
 0x4f9   : > { %3137 = vmatmul.bf16.gmra.mxu1 %v5573_v60  ;;  %3226 = vmatmul.bf16.gmra.mxu2 %v5569_v50  ;;  %v5825_v30 = vor.u32 %v6227_v58, %v5824_v1 }
 0x4fa   : > { %3315 = vmatmul.bf16.gmra.mxu3 %v5573_v60 }
 0x4fb   : > { %3676 = vmatpush.bf16.msrb.mxu1 %v5825_v30 }
 0x4fc   : > { %v3187_v33 = vpop.f32.mrf.mxu2 }
 0x4fd   : > { %v3276_v14 = vpop.f32.mrf.mxu3  ;;  %v3011_v43 = vpop.f32.mrf.mxu0 }
 0x4fe   : > { %v3277_v31 = vadd.f32 %v3276_v14, %v3187_v33  ;;  %v3100_v46 = vpop.f32.mrf.mxu1  ;;  %v5594_v33 = vld [vmem:[#allocation4 + $0xc8] sm:$0xf0] }
 0x4ff   : > { %v3101_v41 = vadd.f32 %v3100_v46, %v3011_v43  ;;  %v5593_v43 = vor.u32 %v6169_v36, %v5592_v45 }
 0x501   : > { %v7675_v39 = vpack.c.bf16 %v3101_v41, %v3099_v54  ;;  %v6168_v54 = vld [vmem:[#allocation4 + $0xc4] sm:$0xf] }
 0x502   : > { %v5597_v41 = vor.u32 %v6168_v54, %v5594_v33 }
 0x504   : > { %v3189_v51 = vpop.f32.mrf.mxu2 }
 0x505   : > { %v3278_v23 = vpop.f32.mrf.mxu3  ;;  %v3014_v24 = vpop.f32.mrf.mxu0 }
 0x506   : > { %v3279_v62 = vadd.f32 %v3278_v23, %v3189_v51  ;;  %v3103_v3 = vpop.f32.mrf.mxu1  ;;  %v6208_v51 = vld [vmem:[%s6814_s9 + $0x4] sm:$0xf] }
 0x507   : > { %v3104_v13 = vadd.f32 %v3103_v3, %v3014_v24  ;;  %v6224_v23 = vld [vmem:[%s6814_s9 + $0x84] sm:$0xf] }
 0x508   : > { %v7677_v5 = vpack.c.bf16 %v3279_v62, %v3277_v31  ;;  %3053 = vmatmul.bf16.gmra.mxu0 %v5577_v12 }
 0x509   : > { %3142 = vmatmul.bf16.gmra.mxu1 %v5581_v55  ;;  %3231 = vmatmul.bf16.gmra.mxu2 %v5577_v12  ;;  %v5754_v12 = vld [vmem:[%s6814_s9 + $0x8] sm:$0xf0] }
 0x50a   : > { %3320 = vmatmul.bf16.gmra.mxu3 %v5581_v55  ;;  %v5757_v24 = vor.u32 %v6208_v51, %v5754_v12  ;;  %v5818_v55 = vld [vmem:[%s6814_s9 + $0x88] sm:$0xf0]  ;;  %v6002_v51 = vld [vmem:[%s6823_s30 + $0xf8] sm:$0xf0] }
 0x50b   : > { %v5821_v3 = vor.u32 %v6224_v23, %v5818_v55 }
 0x50c   : > { %v3192_v53 = vpop.f32.mrf.mxu2  ;;  %3766 = vmatpush.bf16.msrb.mxu2 %v5757_v24 }
 0x50d   : > { %v3281_v42 = vpop.f32.mrf.mxu3  ;;  %v3016_v44 = vpop.f32.mrf.mxu0  ;;  %3855 = vmatpush.bf16.msrb.mxu3 %v5821_v3 }
 0x50e   : > { %v3282_v15 = vadd.f32 %v3281_v42, %v3192_v53  ;;  %v3105_v4 = vpop.f32.mrf.mxu1  ;;  %v6171_v53 = vld [vmem:[#allocation4 + $0xd4] sm:$0xf0]  ;;  %v5752_v42 = vld [vmem:[%s6814_s9] sm:$0xf] }
 0x50f   : > { %v3106_v59 = vadd.f32 %v3105_v4, %v3016_v44  ;;  %v6209_v44 = vld [vmem:[%s6814_s9 + $0x4] sm:$0xf0]  ;;  %v6170_v4 = vld [vmem:[#allocation4 + $0xd4] sm:$0xf]  ;;  %v5601_v1 = vor.u32 %v6171_v53, %v5600_v57  ;;  %v6255_v57 = vld [vmem:[%s6823_s30 + $0x74] sm:$0xf0] }
 0x510   : > { %v5753_v11 = vor.u32 %v6209_v44, %v5752_v42  ;;  %v6000_v53 = vld [vmem:[%s6823_s30 + $0xf0] sm:$0xf]  ;;  %v5618_v44 = vld [vmem:[#allocation4 + $0xf8] sm:$0xf0] }
 0x511   : > { %v7683_v48 = vpack.c.bf16 %v3106_v59, %v3104_v13  ;;  %v5602_v59 = vld [vmem:[#allocation4 + $0xd8] sm:$0xf0]  ;;  %v6174_v42 = vld [vmem:[#allocation4 + $0xf4] sm:$0xf] }
 0x512   : > { %3588 = vmatpush.bf16.msrb.mxu0 %v5753_v11  ;;  %v5605_v56 = vor.u32 %v6170_v4, %v5602_v59  ;;  %v6271_v4 = vld [vmem:[%s6823_s30 + $0xf4] sm:$0xf0] }
 0x513   : > { %v6001_v59 = vor.u32 %v6271_v4, %v6000_v53 }
 0x514   : > { %v3194_v63 = vpop.f32.mrf.mxu2 }
 0x515   : > { %v3283_v25 = vpop.f32.mrf.mxu3  ;;  %v3019_v20 = vpop.f32.mrf.mxu0 }
 0x516   : > { %v3284_v9 = vadd.f32 %v3283_v25, %v3194_v63  ;;  %v3108_v22 = vpop.f32.mrf.mxu1 }
 0x517   : > { %v3109_v17 = vadd.f32 %v3108_v22, %v3019_v20 }
 0x518   : > { %v7689_v18 = vpack.c.bf16 %v3284_v9, %v3282_v15  ;;  %3058 = vmatmul.bf16.gmra.mxu0 %v5585_v35  ;;  %v5816_v15 = vld [vmem:[%s6814_s9 + $0x80] sm:$0xf] }
 0x519   : > { %3147 = vmatmul.bf16.gmra.mxu1 %v5589_v34  ;;  %3236 = vmatmul.bf16.gmra.mxu2 %v5585_v35  ;;  %v5817_v7 = vor.u32 %v6225_v19, %v5816_v15 }
 0x51a   : > { %3325 = vmatmul.bf16.gmra.mxu3 %v5589_v34 }
 0x51b   : > { %3677 = vmatpush.bf16.msrb.mxu1 %v5817_v7 }
 0x51c   : > { %v3197_v28 = vpop.f32.mrf.mxu2 }
 0x51d   : > { %v3286_v8 = vpop.f32.mrf.mxu3  ;;  %v3021_v40 = vpop.f32.mrf.mxu0 }
 0x51e   : > { %v3287_v50 = vadd.f32 %v3286_v8, %v3197_v28  ;;  %v3110_v52 = vpop.f32.mrf.mxu1  ;;  %v5608_v8 = vld [vmem:[#allocation4 + $0xe0] sm:$0xf] }
 0x51f   : > { %v3111_v37 = vadd.f32 %v3110_v52, %v3021_v40  ;;  %v6173_v40 = vld [vmem:[#allocation4 + $0xe4] sm:$0xf0]  ;;  %v5610_v52 = vld [vmem:[#allocation4 + $0xe8] sm:$0xf0]  ;;  %4320 = vmatpush.bf16.msra.mxu1 %v6001_v59 }
 0x520   : > { %v5609_v45 = vor.u32 %v6173_v40, %v5608_v8 }
 0x521   : > { %v7691_v60 = vpack.c.bf16 %v3111_v37, %v3109_v17 }
 0x524   : > { %v3199_v14 = vpop.f32.mrf.mxu2 }
 0x525   : > { %v3288_v31 = vpop.f32.mrf.mxu3  ;;  %v3024_v46 = vpop.f32.mrf.mxu0 }
 0x526   : > { %v3289_v49 = vadd.f32 %v3288_v31, %v3199_v14  ;;  %v3113_v10 = vpop.f32.mrf.mxu1 }
 0x527   : > { %v3114_v38 = vadd.f32 %v3113_v10, %v3024_v46  ;;  %v6270_v10 = vld [vmem:[%s6823_s30 + $0xf4] sm:$0xf] }
 0x528   : > { %v7693_v29 = vpack.c.bf16 %v3289_v49, %v3287_v50  ;;  %3063 = vmatmul.bf16.gmra.mxu0 %v5593_v43  ;;  %v6172_v50 = vld [vmem:[#allocation4 + $0xe4] sm:$0xf]  ;;  %v5938_v49 = vld [vmem:[%s6823_s30 + $0x78] sm:$0xf0]  ;;  %v6005_v23 = vor.u32 %v6270_v10, %v6002_v51 }
 0x529   : > { %3152 = vmatmul.bf16.gmra.mxu1 %v5597_v41  ;;  %3241 = vmatmul.bf16.gmra.mxu2 %v5593_v43  ;;  %v5613_v33 = vor.u32 %v6172_v50, %v5610_v52 }
 0x52a   : > { %3330 = vmatmul.bf16.gmra.mxu3 %v5597_v41  ;;  %v6254_v41 = vld [vmem:[%s6823_s30 + $0x74] sm:$0xf] }
 0x52b   : > { %4498 = vmatpush.bf16.msra.mxu3 %v6005_v23  ;;  %v6253_v23 = vld [vmem:[%s6823_s30 + $0x64] sm:$0xf0] }
 0x52c   : > { %v3202_v62 = vpop.f32.mrf.mxu2 }
 0x52d   : > { %v3291_v13 = vpop.f32.mrf.mxu3  ;;  %v3026_v0 = vpop.f32.mrf.mxu0 }
 0x52e   : > { %v3292_v27 = vadd.f32 %v3291_v13, %v3202_v62  ;;  %v3115_v6 = vpop.f32.mrf.mxu1 }
 0x52f   : > { %v3116_v26 = vadd.f32 %v3115_v6, %v3026_v0  ;;  %v5616_v0 = vld [vmem:[#allocation4 + $0xf0] sm:$0xf] }
 0x531   : > { %v7699_v16 = vpack.c.bf16 %v3116_v26, %v3114_v38  ;;  %v5941_v38 = vor.u32 %v6254_v41, %v5938_v49  ;;  %v5936_v26 = vld [vmem:[%s6823_s30 + $0x70] sm:$0xf] }
 0x532   : > { %v5937_v15 = vor.u32 %v6255_v57, %v5936_v26 }
 0x533   : > { %4409 = vmatpush.bf16.msra.mxu2 %v5941_v38 }
 0x534   : > { %v3204_v47 = vpop.f32.mrf.mxu2  ;;  %4231 = vmatpush.bf16.msra.mxu0 %v5937_v15 }
 0x535   : > { %v3293_v21 = vpop.f32.mrf.mxu3  ;;  %v3029_v61 = vpop.f32.mrf.mxu0 }
 0x536   : > { %v3294_v58 = vadd.f32 %v3293_v21, %v3204_v47  ;;  %v3118_v30 = vpop.f32.mrf.mxu1 }
 0x537   : > { %v3119_v63 = vadd.f32 %v3118_v30, %v3029_v61 }
 0x538   : > { %v7705_v35 = vpack.c.bf16 %v3294_v58, %v3292_v27  ;;  %3068 = vmatmul.bf16.gmra.mxu0 %v5601_v1  ;;  %v6175_v27 = vld [vmem:[#allocation4 + $0xf4] sm:$0xf0] }
 0x539   : > { %3157 = vmatmul.bf16.gmra.mxu1 %v5605_v56  ;;  %3246 = vmatmul.bf16.gmra.mxu2 %v5601_v1  ;;  %v5617_v19 = vor.u32 %v6175_v27, %v5616_v0  ;;  %v5621_v1 = vor.u32 %v6174_v42, %v5618_v44 }
 0x53a   : > { %3335 = vmatmul.bf16.gmra.mxu3 %v5605_v56 }
 0x53c   : > { %v3207_v25 = vpop.f32.mrf.mxu2 }
 0x53d   : > { %v3296_v20 = vpop.f32.mrf.mxu3  ;;  %v3031_v34 = vpop.f32.mrf.mxu0 }
 0x53e   : > { %v3297_v9 = vadd.f32 %v3296_v20, %v3207_v25  ;;  %v3120_v22 = vpop.f32.mrf.mxu1 }
 0x53f   : > { %v3121_v17 = vadd.f32 %v3120_v22, %v3031_v34 }
 0x541   : > { %v7707_v28 = vpack.c.bf16 %v3121_v17, %v3119_v63 }
 0x544   : > { %v3209_v37 = vpop.f32.mrf.mxu2 }
 0x545   : > { %v3298_v36 = vpop.f32.mrf.mxu3  ;;  %v3034_v54 = vpop.f32.mrf.mxu0 }
 0x546   : > { %v3299_v14 = vadd.f32 %v3298_v36, %v3209_v37  ;;  %v3123_v43 = vpop.f32.mrf.mxu1  ;;  %v6252_v36 = vld [vmem:[%s6823_s30 + $0x64] sm:$0xf] }
 0x547   : > { %v3124_v31 = vadd.f32 %v3123_v43, %v3034_v54  ;;  %v5930_v54 = vld [vmem:[%s6823_s30 + $0x68] sm:$0xf0] }
 0x548   : > { %v7709_v46 = vpack.c.bf16 %v3299_v14, %v3297_v9  ;;  %3073 = vmatmul.bf16.gmra.mxu0 %v5609_v45  ;;  %v5933_v14 = vor.u32 %v6252_v36, %v5930_v54  ;;  %v5994_v43 = vld [vmem:[%s6823_s30 + $0xe8] sm:$0xf0]  ;;  %v6251_v36 = vld [vmem:[%s6823_s30 + $0x54] sm:$0xf0]  ;;  %v5984_v54 = vld [vmem:[%s6823_s30 + $0xd0] sm:$0xf] }
 0x549   : > { %3162 = vmatmul.bf16.gmra.mxu1 %v5613_v33  ;;  %3251 = vmatmul.bf16.gmra.mxu2 %v5609_v45 }
 0x54a   : > { %3340 = vmatmul.bf16.gmra.mxu3 %v5613_v33  ;;  %v6268_v33 = vld [vmem:[%s6823_s30 + $0xe4] sm:$0xf]  ;;  %4410 = vmatpush.bf16.msra.mxu2 %v5933_v14  ;;  %v6267_v14 = vld [vmem:[%s6823_s30 + $0xd4] sm:$0xf0] }
 0x54b   : > { %v5997_v41 = vor.u32 %v6268_v33, %v5994_v43  ;;  %v5985_v43 = vor.u32 %v6267_v14, %v5984_v54 }
 0x54c   : > { %v3212_v12 = vpop.f32.mrf.mxu2 }
 0x54d   : > { %v3301_v24 = vpop.f32.mrf.mxu3  ;;  %v3036_v55 = vpop.f32.mrf.mxu0  ;;  %4499 = vmatpush.bf16.msra.mxu3 %v5997_v41 }
 0x54e   : > { %v3302_v62 = vadd.f32 %v3301_v24, %v3212_v12  ;;  %v3125_v3 = vpop.f32.mrf.mxu1  ;;  %v5992_v24 = vld [vmem:[%s6823_s30 + $0xe0] sm:$0xf] }
 0x54f   : > { %v3126_v13 = vadd.f32 %v3125_v3, %v3036_v55 }
 0x551   : > { %v7715_v6 = vpack.c.bf16 %v3126_v13, %v3124_v31 }
 0x554   : > { %v3214_v11 = vpop.f32.mrf.mxu2 }
 0x555   : > { %v3303_v7 = vpop.f32.mrf.mxu3  ;;  %v3039_v47 = vpop.f32.mrf.mxu0 }
 0x556   : > { %v3304_v21 = vadd.f32 %v3303_v7, %v3214_v11  ;;  %v3128_v61 = vpop.f32.mrf.mxu1 }
 0x557   : > { %v3129_v56 = vadd.f32 %v3128_v61, %v3039_v47 }
 0x558   : > { %v7721_v58 = vpack.c.bf16 %v3304_v21, %v3302_v62  ;;  %3078 = vmatmul.bf16.gmra.mxu0 %v5617_v19  ;;  %v6269_v62 = vld [vmem:[%s6823_s30 + $0xe4] sm:$0xf0] }
 0x559   : > { %3167 = vmatmul.bf16.gmra.mxu1 %v5621_v1  ;;  %3256 = vmatmul.bf16.gmra.mxu2 %v5617_v19  ;;  %v5993_v3 = vor.u32 %v6269_v62, %v5992_v24 }
 0x55a   : > { %3345 = vmatmul.bf16.gmra.mxu3 %v5621_v1 }
 0x55b   : > { %4321 = vmatpush.bf16.msra.mxu1 %v5993_v3 }
 0x55c   : > { %v3217_v30 = vpop.f32.mrf.mxu2 }
 0x55d   : > { %v3306_v63 = vpop.f32.mrf.mxu3  ;;  %v3041_v25 = vpop.f32.mrf.mxu0 }
 0x55e   : > { %v3307_v20 = vadd.f32 %v3306_v63, %v3217_v30  ;;  %v3130_v34 = vpop.f32.mrf.mxu1  ;;  %v5922_v63 = vld [vmem:[%s6823_s30 + $0x58] sm:$0xf0] }
 0x55f   : > { %v3131_v9 = vadd.f32 %v3130_v34, %v3041_v25  ;;  %v6266_v25 = vld [vmem:[%s6823_s30 + $0xd4] sm:$0xf]  ;;  %v5986_v34 = vld [vmem:[%s6823_s30 + $0xd8] sm:$0xf0]  ;;  %4322 = vmatpush.bf16.msra.mxu1 %v5985_v43 }
 0x561   : > { %v7723_v22 = vpack.c.bf16 %v3131_v9, %v3129_v56 }
 0x564   : > { %v3219_v17 = vpop.f32.mrf.mxu2 }
 0x565   : > { %v3308_v8 = vpop.f32.mrf.mxu3  ;;  %v3044_v40 = vpop.f32.mrf.mxu0 }
 0x566   : > { %v3309_v50 = vadd.f32 %v3308_v8, %v3219_v17  ;;  %v3133_v52 = vpop.f32.mrf.mxu1  ;;  %v5989_v17 = vor.u32 %v6266_v25, %v5986_v34 }
 0x567   : > { %v3134_v37 = vadd.f32 %v3133_v52, %v3044_v40 }
 0x568   : > { %v7725_v45 = vpack.c.bf16 %v3309_v50, %v3307_v20  ;;  %3589 = vmatmul.bf16.vlgmr.msrb.gmra.mxu0 %v7667_v32  ;;  %4500 = vmatpush.bf16.msra.mxu3 %v5989_v17 }
 0x569   : > { %3678 = vmatmul.bf16.vlgmr.msrb.gmra.mxu1 %v7673_v2  ;;  %3767 = vmatmul.bf16.vlgmr.msrb.gmra.mxu2 %v7667_v32 }
 0x56a   : > { %3856 = vmatmul.bf16.vlgmr.msrb.gmra.mxu3 %v7673_v2  ;;  %v5928_v2 = vld [vmem:[%s6823_s30 + $0x60] sm:$0xf] }
 0x56b   : > { %v5929_v55 = vor.u32 %v6253_v23, %v5928_v2 }
 0x56c   : > { %v3222_v31 = vpop.f32.mrf.mxu2 }
 0x56d   : > { %v3311_v49 = vpop.f32.mrf.mxu3  ;;  %v3046_v10 = vpop.f32.mrf.mxu0  ;;  %4232 = vmatpush.bf16.msra.mxu0 %v5929_v55 }
 0x56e   : > { %v3312_v38 = vadd.f32 %v3311_v49, %v3222_v31  ;;  %v3135_v51 = vpop.f32.mrf.mxu1 }
 0x56f   : > { %v3136_v32 = vadd.f32 %v3135_v51, %v3046_v10 }
 0x571   : > { %v7735_v12 = vpack.c.bf16 %v3136_v32, %v3134_v37 }
 0x574   : > { %v3224_v13 = vpop.f32.mrf.mxu2 }
 0x575   : > { %v3313_v0 = vpop.f32.mrf.mxu3  ;;  %v3049_v27 = vpop.f32.mrf.mxu0 }
 0x576   : > { %v3314_v26 = vadd.f32 %v3313_v0, %v3224_v13  ;;  %v3138_v57 = vpop.f32.mrf.mxu1 }
 0x577   : > { %v3139_v53 = vadd.f32 %v3138_v57, %v3049_v27 }
 0x578   : > { %v7741_v42 = vpack.c.bf16 %v3314_v26, %v3312_v38  ;;  %3594 = vmatmul.bf16.gmra.mxu0 %v7675_v39 }
 0x579   : > { %3683 = vmatmul.bf16.gmra.mxu1 %v7677_v5  ;;  %3772 = vmatmul.bf16.gmra.mxu2 %v7675_v39 }
 0x57a   : > { %3861 = vmatmul.bf16.gmra.mxu3 %v7677_v5  ;;  %v6250_v5 = vld [vmem:[%s6823_s30 + $0x54] sm:$0xf] }
 0x57b   : > { %v5925_v20 = vor.u32 %v6250_v5, %v5922_v63  ;;  %v6249_v5 = vld [vmem:[%s6823_s30 + $0x44] sm:$0xf0]  ;;  %v5976_v63 = vld [vmem:[%s6823_s30 + $0xc0] sm:$0xf] }
 0x57c   : > { %v3227_v44 = vpop.f32.mrf.mxu2 }
 0x57d   : > { %v3316_v15 = vpop.f32.mrf.mxu3  ;;  %v3051_v4 = vpop.f32.mrf.mxu0  ;;  %4411 = vmatpush.bf16.msra.mxu2 %v5925_v20  ;;  %v6265_v20 = vld [vmem:[%s6823_s30 + $0xc4] sm:$0xf0] }
 0x57e   : > { %v3317_v59 = vadd.f32 %v3316_v15, %v3227_v44  ;;  %v3140_v11 = vpop.f32.mrf.mxu1  ;;  %v5914_v15 = vld [vmem:[%s6823_s30 + $0x48] sm:$0xf0]  ;;  %v5977_v34 = vor.u32 %v6265_v20, %v5976_v63 }
 0x57f   : > { %v3141_v19 = vadd.f32 %v3140_v11, %v3051_v4  ;;  %v6264_v4 = vld [vmem:[%s6823_s30 + $0xc4] sm:$0xf]  ;;  %v5978_v11 = vld [vmem:[%s6823_s30 + $0xc8] sm:$0xf0] }
 0x580   : > { %4323 = vmatpush.bf16.msra.mxu1 %v5977_v34 }
 0x581   : > { %v7747_v7 = vpack.c.bf16 %v3141_v19, %v3139_v53 }
 0x584   : > { %v3229_v47 = vpop.f32.mrf.mxu2 }
 0x585   : > { %v3318_v1 = vpop.f32.mrf.mxu3  ;;  %v3054_v21 = vpop.f32.mrf.mxu0 }
 0x586   : > { %v3319_v61 = vadd.f32 %v3318_v1, %v3229_v47  ;;  %v3143_v56 = vpop.f32.mrf.mxu1  ;;  %v5981_v47 = vor.u32 %v6264_v4, %v5978_v11  ;;  %v5968_v4 = vld [vmem:[%s6823_s30 + $0xb0] sm:$0xf] }
 0x587   : > { %v3144_v39 = vadd.f32 %v3143_v56, %v3054_v21 }
 0x588   : > { %v7749_v30 = vpack.c.bf16 %v3319_v61, %v3317_v59  ;;  %3599 = vmatmul.bf16.gmra.mxu0 %v7683_v48  ;;  %4501 = vmatpush.bf16.msra.mxu3 %v5981_v47  ;;  %v6263_v47 = vld [vmem:[%s6823_s30 + $0xb4] sm:$0xf0] }
 0x589   : > { %3688 = vmatmul.bf16.gmra.mxu1 %v7689_v18  ;;  %3777 = vmatmul.bf16.gmra.mxu2 %v7683_v48 }
 0x58a   : > { %3866 = vmatmul.bf16.gmra.mxu3 %v7689_v18  ;;  %v5920_v18 = vld [vmem:[%s6823_s30 + $0x50] sm:$0xf] }
 0x58b   : > { %v5921_v33 = vor.u32 %v6251_v36, %v5920_v18 }
 0x58c   : > { %v3232_v9 = vpop.f32.mrf.mxu2 }
 0x58d   : > { %v3321_v8 = vpop.f32.mrf.mxu3  ;;  %v3056_v40 = vpop.f32.mrf.mxu0  ;;  %4233 = vmatpush.bf16.msra.mxu0 %v5921_v33 }
 0x58e   : > { %v3322_v50 = vadd.f32 %v3321_v8, %v3232_v9  ;;  %v3145_v52 = vpop.f32.mrf.mxu1 }
 0x58f   : > { %v3146_v48 = vadd.f32 %v3145_v52, %v3056_v40 }
 0x591   : > { %v7759_v37 = vpack.c.bf16 %v3146_v48, %v3144_v39 }
 0x594   : > { %v3234_v31 = vpop.f32.mrf.mxu2 }
 0x595   : > { %v3323_v41 = vpop.f32.mrf.mxu3  ;;  %v3059_v49 = vpop.f32.mrf.mxu0 }
 0x596   : > { %v3324_v10 = vadd.f32 %v3323_v41, %v3234_v31  ;;  %v3148_v38 = vpop.f32.mrf.mxu1 }
 0x597   : > { %v3149_v51 = vadd.f32 %v3148_v38, %v3059_v49 }
 0x598   : > { %v7765_v32 = vpack.c.bf16 %v3324_v10, %v3322_v50  ;;  %3604 = vmatmul.bf16.gmra.mxu0 %v7691_v60 }
 0x599   : > { %3693 = vmatmul.bf16.gmra.mxu1 %v7693_v29  ;;  %3782 = vmatmul.bf16.gmra.mxu2 %v7691_v60 }
 0x59a   : > { %3871 = vmatmul.bf16.gmra.mxu3 %v7693_v29  ;;  %v6248_v29 = vld [vmem:[%s6823_s30 + $0x44] sm:$0xf] }
 0x59b   : > { %v5917_v59 = vor.u32 %v6248_v29, %v5914_v15  ;;  %v5904_v29 = vld [vmem:[%s6823_s30 + $0x30] sm:$0xf]  ;;  %v6247_v15 = vld [vmem:[%s6823_s30 + $0x34] sm:$0xf0] }
 0x59c   : > { %v3237_v2 = vpop.f32.mrf.mxu2 }
 0x59d   : > { %v3326_v23 = vpop.f32.mrf.mxu3  ;;  %v3061_v24 = vpop.f32.mrf.mxu0  ;;  %4412 = vmatpush.bf16.msra.mxu2 %v5917_v59 }
 0x59e   : > { %v3327_v55 = vadd.f32 %v3326_v23, %v3237_v2  ;;  %v3150_v62 = vpop.f32.mrf.mxu1  ;;  %v5906_v23 = vld [vmem:[%s6823_s30 + $0x38] sm:$0xf0] }
 0x59f   : > { %v3151_v3 = vadd.f32 %v3150_v62, %v3061_v24  ;;  %v6262_v24 = vld [vmem:[%s6823_s30 + $0xb4] sm:$0xf]  ;;  %v5970_v62 = vld [vmem:[%s6823_s30 + $0xb8] sm:$0xf0] }
 0x5a1   : > { %v7771_v13 = vpack.c.bf16 %v3151_v3, %v3149_v51 }
 0x5a4   : > { %v3239_v0 = vpop.f32.mrf.mxu2 }
 0x5a5   : > { %v3328_v27 = vpop.f32.mrf.mxu3  ;;  %v3064_v26 = vpop.f32.mrf.mxu0 }
 0x5a6   : > { %v3329_v57 = vadd.f32 %v3328_v27, %v3239_v0  ;;  %v3153_v53 = vpop.f32.mrf.mxu1  ;;  %v5973_v0 = vor.u32 %v6262_v24, %v5970_v62 }
 0x5a7   : > { %v3154_v60 = vadd.f32 %v3153_v53, %v3064_v26 }
 0x5a8   : > { %v7773_v44 = vpack.c.bf16 %v3329_v57, %v3327_v55  ;;  %3609 = vmatmul.bf16.gmra.mxu0 %v7699_v16  ;;  %4502 = vmatpush.bf16.msra.mxu3 %v5973_v0  ;;  %v5896_v0 = vld [vmem:[%s6823_s30 + $0x20] sm:$0xf] }
 0x5a9   : > { %3698 = vmatmul.bf16.gmra.mxu1 %v7705_v35  ;;  %3787 = vmatmul.bf16.gmra.mxu2 %v7699_v16 }
 0x5aa   : > { %3876 = vmatmul.bf16.gmra.mxu3 %v7705_v35  ;;  %v5912_v35 = vld [vmem:[%s6823_s30 + $0x40] sm:$0xf] }
 0x5ab   : > { %v5913_v25 = vor.u32 %v6249_v5, %v5912_v35 }
 0x5ac   : > { %v3242_v19 = vpop.f32.mrf.mxu2 }
 0x5ad   : > { %v3331_v1 = vpop.f32.mrf.mxu3  ;;  %v3066_v21 = vpop.f32.mrf.mxu0  ;;  %4234 = vmatpush.bf16.msra.mxu0 %v5913_v25 }
 0x5ae   : > { %v3332_v61 = vadd.f32 %v3331_v1, %v3242_v19  ;;  %v3155_v56 = vpop.f32.mrf.mxu1  ;;  %v5905_v19 = vor.u32 %v6247_v15, %v5904_v29 }
 0x5af   : > { %v3156_v16 = vadd.f32 %v3155_v56, %v3066_v21 }
 0x5b1   : > { %v7783_v39 = vpack.c.bf16 %v3156_v16, %v3154_v60  ;;  %4235 = vmatpush.bf16.msra.mxu0 %v5905_v19 }
 0x5b4   : > { %v3244_v9 = vpop.f32.mrf.mxu2 }
 0x5b5   : > { %v3333_v17 = vpop.f32.mrf.mxu3  ;;  %v3069_v8 = vpop.f32.mrf.mxu0 }
 0x5b6   : > { %v3334_v40 = vadd.f32 %v3333_v17, %v3244_v9  ;;  %v3158_v50 = vpop.f32.mrf.mxu1  ;;  %v3415_v9 = vld [vmem:[%s319_s25] sm:$0x3] }
 0x5b7   : > { %v3159_v52 = vadd.f32 %v3158_v50, %v3069_v8  ;;  %v7823_v8 = vperm.slane %v3415_v9, 0 }
 0x5b8   : > { %v7789_v48 = vpack.c.bf16 %v3334_v40, %v3332_v61  ;;  %3614 = vmatmul.bf16.gmra.mxu0 %v7707_v28  ;;  %v5969_v61 = vor.u32 %v6263_v47, %v5968_v4 }
 0x5b9   : > { %3703 = vmatmul.bf16.gmra.mxu1 %v7709_v46  ;;  %3792 = vmatmul.bf16.gmra.mxu2 %v7707_v28 }
 0x5ba   : > { %3881 = vmatmul.bf16.gmra.mxu3 %v7709_v46  ;;  %v6246_v46 = vld [vmem:[%s6823_s30 + $0x34] sm:$0xf]  ;;  %4324 = vmatpush.bf16.msra.mxu1 %v5969_v61 }
 0x5bb   : > { %v5909_v55 = vor.u32 %v6246_v46, %v5906_v23 }
 0x5bc   : > { %v3247_v18 = vpop.f32.mrf.mxu2 }
 0x5bd   : > { %v3336_v36 = vpop.f32.mrf.mxu3  ;;  %v3071_v54 = vpop.f32.mrf.mxu0  ;;  %4413 = vmatpush.bf16.msra.mxu2 %v5909_v55 }
 0x5be   : > { %v3337_v33 = vadd.f32 %v3336_v36, %v3247_v18  ;;  %v3160_v14 = vpop.f32.mrf.mxu1 }
 0x5bf   : > { %v3161_v43 = vadd.f32 %v3160_v14, %v3071_v54  ;;  %v6244_v14 = vld [vmem:[%s6823_s30 + $0x24] sm:$0xf] }
 0x5c1   : > { %v7795_v31 = vpack.c.bf16 %v3161_v43, %v3159_v52  ;;  %v5898_v43 = vld [vmem:[%s6823_s30 + $0x28] sm:$0xf0] }
 0x5c4   : > { %v3249_v41 = vpop.f32.mrf.mxu2 }
 0x5c5   : > { %v3338_v49 = vpop.f32.mrf.mxu3  ;;  %v3074_v10 = vpop.f32.mrf.mxu0 }
 0x5c6   : > { %v3339_v38 = vadd.f32 %v3338_v49, %v3249_v41  ;;  %v3163_v51 = vpop.f32.mrf.mxu1  ;;  %v5901_v41 = vor.u32 %v6244_v14, %v5898_v43  ;;  %v6260_v49 = vld [vmem:[%s6823_s30 + $0xa4] sm:$0xf] }
 0x5c7   : > { %v3164_v28 = vadd.f32 %v3163_v51, %v3074_v10  ;;  %v5962_v10 = vld [vmem:[%s6823_s30 + $0xa8] sm:$0xf0] }
 0x5c8   : > { %v7797_v2 = vpack.c.bf16 %v3339_v38, %v3337_v33  ;;  %3619 = vmatmul.bf16.gmra.mxu0 %v7715_v6  ;;  %v7831_v33 = vperm.slane %v3415_v9, 1  ;;  %v5965_v51 = vor.u32 %v6260_v49, %v5962_v10  ;;  %4414 = vmatpush.bf16.msra.mxu2 %v5901_v41 }
 0x5c9   : > { %3708 = vmatmul.bf16.gmra.mxu1 %v7721_v58  ;;  %3797 = vmatmul.bf16.gmra.mxu2 %v7715_v6 }
 0x5ca   : > { %3886 = vmatmul.bf16.gmra.mxu3 %v7721_v58 }
 0x5cb   : > { %4503 = vmatpush.bf16.msra.mxu3 %v5965_v51  ;;  %v5890_v51 = vld [vmem:[%s6823_s30 + $0x18] sm:$0xf0] }
 0x5cc   : > { %v3252_v3 = vpop.f32.mrf.mxu2 }
 0x5cd   : > { %v3341_v27 = vpop.f32.mrf.mxu3  ;;  %v3076_v26 = vpop.f32.mrf.mxu0 }
 0x5ce   : > { %v3342_v57 = vadd.f32 %v3341_v27, %v3252_v3  ;;  %v3165_v53 = vpop.f32.mrf.mxu1  ;;  %v6245_v27 = vld [vmem:[%s6823_s30 + $0x24] sm:$0xf0] }
 0x5cf   : > { %v3166_v6 = vadd.f32 %v3165_v53, %v3076_v26  ;;  %v5897_v26 = vor.u32 %v6245_v27, %v5896_v0  ;;  %v6261_v53 = vld [vmem:[%s6823_s30 + $0xa4] sm:$0xf0] }
 0x5d1   : > { %v7807_v60 = vpack.c.bf16 %v3166_v6, %v3164_v28  ;;  %4236 = vmatpush.bf16.msra.mxu0 %v5897_v26 }
 0x5d4   : > { %v3254_v58 = vpop.f32.mrf.mxu2 }
 0x5d5   : > { %v3343_v59 = vpop.f32.mrf.mxu3  ;;  %v3079_v11 = vpop.f32.mrf.mxu0 }
 0x5d6   : > { %v3344_v1 = vadd.f32 %v3343_v59, %v3254_v58  ;;  %v3168_v21 = vpop.f32.mrf.mxu1 }
 0x5d7   : > { %v3169_v56 = vadd.f32 %v3168_v21, %v3079_v11 }
 0x5d8   : > { %v7813_v16 = vpack.c.bf16 %v3344_v1, %v3342_v57  ;;  %3624 = vmatmul.bf16.gmra.mxu0 %v7723_v22  ;;  %v5960_v57 = vld [vmem:[%s6823_s30 + $0xa0] sm:$0xf] }
 0x5d9   : > { %3713 = vmatmul.bf16.gmra.mxu1 %v7725_v45  ;;  %3802 = vmatmul.bf16.gmra.mxu2 %v7723_v22  ;;  %v5961_v29 = vor.u32 %v6261_v53, %v5960_v57  ;;  %v5888_v53 = vld [vmem:[%s6823_s30 + $0x10] sm:$0xf] }
 0x5da   : > { %3891 = vmatmul.bf16.gmra.mxu3 %v7725_v45 }
 0x5db   : > { %4325 = vmatpush.bf16.msra.mxu1 %v5961_v29 }
 0x5dc   : > { %v3257_v35 = vpop.f32.mrf.mxu2 }
 0x5dd   : > { %v3346_v5 = vpop.f32.mrf.mxu3  ;;  %v3081_v63 = vpop.f32.mrf.mxu0 }
 0x5de   : > { %v3347_v25 = vadd.f32 %v3346_v5, %v3257_v35  ;;  %v3170_v20 = vpop.f32.mrf.mxu1 }
 0x5df   : > { %v3171_v34 = vadd.f32 %v3170_v20, %v3081_v63 }
 0x5e1   : > { %v7821_v17 = vpack.c.bf16 %v3171_v34, %v3169_v56 }
 0x5e4   : > { %v3259_v40 = vpop.f32.mrf.mxu2 }
 0x5e5   : > { %v3348_v50 = vpop.f32.mrf.mxu3  ;;  %v3590_v22 = vpop.f32.mrf.mxu0 }
 0x5e6   : > { %v3349_v45 = vadd.f32 %v3348_v50, %v3259_v40  ;;  %v3591_v52 = vadd.f32 %v3590_v22, %v7823_v8  ;;  %v3679_v18 = vpop.f32.mrf.mxu1 }
 0x5e8   : > { %v7826_v36 = vpack.c.bf16 %v3349_v45, %v3347_v25  ;;  %v3680_v54 = vadd.f32 %v3679_v18, %v3591_v52  ;;  %3629 = vmatmul.bf16.gmra.mxu0 %v7735_v12 }
 0x5e9   : > { %3718 = vmatmul.bf16.gmra.mxu1 %v7741_v42  ;;  %3807 = vmatmul.bf16.gmra.mxu2 %v7735_v12 }
 0x5ea   : > { %3896 = vmatmul.bf16.gmra.mxu3 %v7741_v42  ;;  %v3937_v62 = vmax.f32 %v3680_v54, 0.0 }
 0x5ec   : > { %v3768_v38 = vpop.f32.mrf.mxu2 }
 0x5ed   : > { %v3769_v28 = vadd.f32 %v3768_v38, %v7831_v33  ;;  %v3857_v46 = vpop.f32.mrf.mxu3  ;;  %v3592_v23 = vpop.f32.mrf.mxu0  ;;  %v6242_v38 = vld [vmem:[%s6823_s30 + $0x14] sm:$0xf] }
 0x5ee   : > { %v3593_v12 = vadd.f32 %v3592_v23, %v7823_v8  ;;  %v3681_v24 = vpop.f32.mrf.mxu1  ;;  %v5954_v23 = vld [vmem:[%s6823_s30 + $0x98] sm:$0xf0] }
 0x5ef   : > { %v3858_v42 = vadd.f32 %v3857_v46, %v3769_v28  ;;  %v5893_v28 = vor.u32 %v6242_v38, %v5890_v51  ;;  %v6258_v46 = vld [vmem:[%s6823_s30 + $0x94] sm:$0xf] }
 0x5f0   : > { %v3682_v55 = vadd.f32 %v3681_v24, %v3593_v12 }
 0x5f1   : > { %v3938_v21 = vmax.f32 %v3858_v42, 0.0  ;;  %v5957_v42 = vor.u32 %v6258_v46, %v5954_v23  ;;  %4415 = vmatpush.bf16.msra.mxu2 %v5893_v28 }
 0x5f2   : > { %v3939_v3 = vmax.f32 %v3682_v55, 0.0 }
 0x5f3   : > { %4504 = vmatpush.bf16.msra.mxu3 %v5957_v42  ;;  %v5882_v42 = vld [vmem:[%s6823_s30 + $0x8] sm:$0xf0] }
 0x5f4   : > { %v7844_v6 = vpack.c.bf16 %v3939_v3, %v3937_v62  ;;  %v3770_v58 = vpop.f32.mrf.mxu2 }
 0x5f5   : > { %v3771_v15 = vadd.f32 %v3770_v58, %v7831_v33  ;;  %v3859_v4 = vpop.f32.mrf.mxu3  ;;  %v3595_v59 = vpop.f32.mrf.mxu0  ;;  %v6243_v58 = vld [vmem:[%s6823_s30 + $0x14] sm:$0xf0] }
 0x5f6   : > { %v3596_v11 = vadd.f32 %v3595_v59, %v7823_v8  ;;  %v3684_v19 = vpop.f32.mrf.mxu1  ;;  %v5889_v29 = vor.u32 %v6243_v58, %v5888_v53 }
 0x5f7   : > { %v3860_v47 = vadd.f32 %v3859_v4, %v3771_v15  ;;  %v5952_v15 = vld [vmem:[%s6823_s30 + $0x90] sm:$0xf]  ;;  %v6259_v4 = vld [vmem:[%s6823_s30 + $0x94] sm:$0xf0] }
 0x5f8   : > { %v3685_v1 = vadd.f32 %v3684_v19, %v3596_v11  ;;  %3634 = vmatmul.bf16.gmra.mxu0 %v7747_v7  ;;  %v5953_v11 = vor.u32 %v6259_v4, %v5952_v15  ;;  %v5880_v4 = vld [vmem:[%s6823_s30] sm:$0xf] }
 0x5f9   : > { %v3940_v61 = vmax.f32 %v3860_v47, 0.0  ;;  %3723 = vmatmul.bf16.gmra.mxu1 %v7749_v30  ;;  %3812 = vmatmul.bf16.gmra.mxu2 %v7747_v7 }
 0x5fa   : > { %3901 = vmatmul.bf16.gmra.mxu3 %v7749_v30  ;;  %v3941_v50 = vmax.f32 %v3685_v1, 0.0  ;;  %4237 = vmatpush.bf16.msra.mxu0 %v5889_v29 }
 0x5fb   : > { %v7852_v56 = vpack.c.bf16 %v3940_v61, %v3938_v21  ;;  %4326 = vmatpush.bf16.msra.mxu1 %v5953_v11 }
 0x5fc   : > { %v3773_v35 = vpop.f32.mrf.mxu2 }
 0x5fd   : > { %v3774_v5 = vadd.f32 %v3773_v35, %v7831_v33  ;;  %v3862_v63 = vpop.f32.mrf.mxu3  ;;  %v3597_v25 = vpop.f32.mrf.mxu0 }
 0x5fe   : > { %v3598_v20 = vadd.f32 %v3597_v25, %v7823_v8  ;;  %v3686_v34 = vpop.f32.mrf.mxu1 }
 0x5ff   : > { %v3863_v9 = vadd.f32 %v3862_v63, %v3774_v5 }
 0x600   : > { %v3687_v40 = vadd.f32 %v3686_v34, %v3598_v20 }
 0x601   : > { %v3942_v49 = vmax.f32 %v3863_v9, 0.0 }
 0x602   : > { %v3943_v22 = vmax.f32 %v3687_v40, 0.0 }
 0x604   : > { %v3775_v45 = vpop.f32.mrf.mxu2  ;;  %v7856_v7 = vpack.c.bf16 %v3943_v22, %v3941_v50 }
 0x605   : > { %v3776_v30 = vadd.f32 %v3775_v45, %v7831_v33  ;;  %v3864_v52 = vpop.f32.mrf.mxu3  ;;  %v3600_v18 = vpop.f32.mrf.mxu0 }
 0x606   : > { %v3601_v54 = vadd.f32 %v3600_v18, %v7823_v8  ;;  %v3689_v14 = vpop.f32.mrf.mxu1 }
 0x607   : > { %v3865_v43 = vadd.f32 %v3864_v52, %v3776_v30 }
 0x608   : > { %v3690_v41 = vadd.f32 %v3689_v14, %v3601_v54  ;;  %3639 = vmatmul.bf16.gmra.mxu0 %v7759_v37 }
 0x609   : > { %v3944_v10 = vmax.f32 %v3865_v43, 0.0  ;;  %3728 = vmatmul.bf16.gmra.mxu1 %v7765_v32  ;;  %3817 = vmatmul.bf16.gmra.mxu2 %v7759_v37 }
 0x60a   : > { %3906 = vmatmul.bf16.gmra.mxu3 %v7765_v32  ;;  %v3945_v26 = vmax.f32 %v3690_v41, 0.0 }
 0x60b   : > { %v7868_v12 = vpack.c.bf16 %v3944_v10, %v3942_v49 }
 0x60c   : > { %v3778_v24 = vpop.f32.mrf.mxu2 }
 0x60d   : > { %v3779_v55 = vadd.f32 %v3778_v24, %v7831_v33  ;;  %v3867_v62 = vpop.f32.mrf.mxu3  ;;  %v3602_v3 = vpop.f32.mrf.mxu0  ;;  %v6240_v24 = vld [vmem:[%s6823_s30 + $0x4] sm:$0xf] }
 0x60e   : > { %v3603_v37 = vadd.f32 %v3602_v3, %v7823_v8  ;;  %v3691_v32 = vpop.f32.mrf.mxu1  ;;  %v5946_v3 = vld [vmem:[%s6823_s30 + $0x88] sm:$0xf0] }
 0x60f   : > { %v3868_v0 = vadd.f32 %v3867_v62, %v3779_v55  ;;  %v5885_v55 = vor.u32 %v6240_v24, %v5882_v42  ;;  %v6256_v62 = vld [vmem:[%s6823_s30 + $0x84] sm:$0xf] }
 0x610   : > { %v3692_v27 = vadd.f32 %v3691_v32, %v3603_v37 }
 0x611   : > { %v3946_v25 = vmax.f32 %v3868_v0, 0.0  ;;  %v5949_v0 = vor.u32 %v6256_v62, %v5946_v3  ;;  %4416 = vmatpush.bf16.msra.mxu2 %v5885_v55 }
 0x612   : > { %v3947_v57 = vmax.f32 %v3692_v27, 0.0 }
 0x613   : > { %4505 = vmatpush.bf16.msra.mxu3 %v5949_v0 }
 0x614   : > { %v3780_v59 = vpop.f32.mrf.mxu2  ;;  %v7876_v19 = vpack.c.bf16 %v3947_v57, %v3945_v26 }
 0x615   : > { %v3781_v47 = vadd.f32 %v3780_v59, %v7831_v33  ;;  %v3869_v1 = vpop.f32.mrf.mxu3  ;;  %v3605_v21 = vpop.f32.mrf.mxu0  ;;  %v6241_v59 = vld [vmem:[%s6823_s30 + $0x4] sm:$0xf0] }
 0x616   : > { %v3606_v61 = vadd.f32 %v3605_v21, %v7823_v8  ;;  %v3694_v35 = vpop.f32.mrf.mxu1  ;;  %v5881_v11 = vor.u32 %v6241_v59, %v5880_v4 }
 0x617   : > { %v3870_v5 = vadd.f32 %v3869_v1, %v3781_v47  ;;  %v5944_v47 = vld [vmem:[%s6823_s30 + $0x80] sm:$0xf]  ;;  %v6257_v1 = vld [vmem:[%s6823_s30 + $0x84] sm:$0xf0] }
 0x618   : > { %v3695_v63 = vadd.f32 %v3694_v35, %v3606_v61  ;;  %3644 = vmatmul.bf16.gmra.mxu0 %v7771_v13  ;;  %v5945_v61 = vor.u32 %v6257_v1, %v5944_v47 }
 0x619   : > { %v3948_v20 = vmax.f32 %v3870_v5, 0.0  ;;  %3733 = vmatmul.bf16.gmra.mxu1 %v7773_v44  ;;  %3822 = vmatmul.bf16.gmra.mxu2 %v7771_v13 }
 0x61a   : > { %3911 = vmatmul.bf16.gmra.mxu3 %v7773_v44  ;;  %v3949_v54 = vmax.f32 %v3695_v63, 0.0  ;;  %4238 = vmatpush.bf16.msra.mxu0 %v5881_v11 }
 0x61b   : > { %v7884_v34 = vpack.c.bf16 %v3948_v20, %v3946_v25  ;;  %4327 = vmatpush.bf16.msra.mxu1 %v5945_v61 }
 0x61c   : > { %v3783_v9 = vpop.f32.mrf.mxu2 }
 0x61d   : > { %v3784_v40 = vadd.f32 %v3783_v9, %v7831_v33  ;;  %v3872_v50 = vpop.f32.mrf.mxu3  ;;  %v3607_v22 = vpop.f32.mrf.mxu0 }
 0x61e   : > { %v3608_v45 = vadd.f32 %v3607_v22, %v7823_v8  ;;  %v3696_v30 = vpop.f32.mrf.mxu1 }
 0x61f   : > { %v3873_v52 = vadd.f32 %v3872_v50, %v3784_v40 }
 0x620   : > { %v3697_v18 = vadd.f32 %v3696_v30, %v3608_v45 }
 0x621   : > { %v3950_v46 = vmax.f32 %v3873_v52, 0.0 }
 0x622   : > { %v3951_v14 = vmax.f32 %v3697_v18, 0.0 }
 0x624   : > { %v3785_v43 = vpop.f32.mrf.mxu2  ;;  %v7888_v13 = vpack.c.bf16 %v3951_v14, %v3949_v54 }
 0x625   : > { %v3786_v44 = vadd.f32 %v3785_v43, %v7831_v33  ;;  %v3874_v41 = vpop.f32.mrf.mxu3  ;;  %v3610_v49 = vpop.f32.mrf.mxu0 }
 0x626   : > { %v3611_v10 = vadd.f32 %v3610_v49, %v7823_v8  ;;  %v3699_v38 = vpop.f32.mrf.mxu1 }
 0x627   : > { %v3875_v51 = vadd.f32 %v3874_v41, %v3786_v44 }
 0x628   : > { %v3700_v28 = vadd.f32 %v3699_v38, %v3611_v10  ;;  %3649 = vmatmul.bf16.gmra.mxu0 %v7783_v39 }
 0x629   : > { %v3952_v23 = vmax.f32 %v3875_v51, 0.0  ;;  %3738 = vmatmul.bf16.gmra.mxu1 %v7789_v48  ;;  %3827 = vmatmul.bf16.gmra.mxu2 %v7783_v39 }
 0x62a   : > { %3916 = vmatmul.bf16.gmra.mxu3 %v7789_v48  ;;  %v3953_v29 = vmax.f32 %v3700_v28, 0.0 }
 0x62b   : > { %v7900_v37 = vpack.c.bf16 %v3952_v23, %v3950_v46 }
 0x62c   : > { %v3788_v32 = vpop.f32.mrf.mxu2 }
 0x62d   : > { %v3789_v27 = vadd.f32 %v3788_v32, %v7831_v33  ;;  %v3877_v26 = vpop.f32.mrf.mxu3  ;;  %v3612_v57 = vpop.f32.mrf.mxu0 }
 0x62e   : > { %v3613_v39 = vadd.f32 %v3612_v57, %v7823_v8  ;;  %v3701_v48 = vpop.f32.mrf.mxu1 }
 0x62f   : > { %v3878_v53 = vadd.f32 %v3877_v26, %v3789_v27 }
 0x630   : > { %v3702_v58 = vadd.f32 %v3701_v48, %v3613_v39 }
 0x631   : > { %v3954_v22 = vmax.f32 %v3878_v53, 0.0 }
 0x632   : > { %v3955_v15 = vmax.f32 %v3702_v58, 0.0 }
 0x634   : > { %v3790_v21 = vpop.f32.mrf.mxu2  ;;  %v7908_v35 = vpack.c.bf16 %v3955_v15, %v3953_v29 }
 0x635   : > { %v3791_v5 = vadd.f32 %v3790_v21, %v7831_v33  ;;  %v3879_v63 = vpop.f32.mrf.mxu3  ;;  %v3615_v25 = vpop.f32.mrf.mxu0 }
 0x636   : > { %v3616_v20 = vadd.f32 %v3615_v25, %v7823_v8  ;;  %v3704_v9 = vpop.f32.mrf.mxu1 }
 0x637   : > { %v3880_v40 = vadd.f32 %v3879_v63, %v3791_v5 }
 0x638   : > { %v3705_v50 = vadd.f32 %v3704_v9, %v3616_v20  ;;  %3654 = vmatmul.bf16.gmra.mxu0 %v7795_v31 }
 0x639   : > { %v3956_v45 = vmax.f32 %v3880_v40, 0.0  ;;  %3743 = vmatmul.bf16.gmra.mxu1 %v7797_v2  ;;  %3832 = vmatmul.bf16.gmra.mxu2 %v7795_v31 }
 0x63a   : > { %3921 = vmatmul.bf16.gmra.mxu3 %v7797_v2  ;;  %v3957_v10 = vmax.f32 %v3705_v50, 0.0 }
 0x63b   : > { %v7916_v30 = vpack.c.bf16 %v3956_v45, %v3954_v22 }
 0x63c   : > { %v3793_v52 = vpop.f32.mrf.mxu2 }
 0x63d   : > { %v3794_v18 = vadd.f32 %v3793_v52, %v7831_v33  ;;  %v3882_v54 = vpop.f32.mrf.mxu3  ;;  %v3617_v14 = vpop.f32.mrf.mxu0 }
 0x63e   : > { %v3618_v43 = vadd.f32 %v3617_v14, %v7823_v8  ;;  %v3706_v44 = vpop.f32.mrf.mxu1 }
 0x63f   : > { %v3883_v41 = vadd.f32 %v3882_v54, %v3794_v18 }
 0x640   : > { %v3707_v49 = vadd.f32 %v3706_v44, %v3618_v43 }
 0x641   : > { %v3958_v62 = vmax.f32 %v3883_v41, 0.0 }
 0x642   : > { %v3959_v38 = vmax.f32 %v3707_v49, 0.0 }
 0x644   : > { %v3795_v51 = vpop.f32.mrf.mxu2  ;;  %v7920_v28 = vpack.c.bf16 %v3959_v38, %v3957_v10 }
 0x645   : > { %v3796_v31 = vadd.f32 %v3795_v51, %v7831_v33  ;;  %v3884_v2 = vpop.f32.mrf.mxu3  ;;  %v3620_v46 = vpop.f32.mrf.mxu0 }
 0x646   : > { %v3621_v23 = vadd.f32 %v3620_v46, %v7823_v8  ;;  %v3709_v24 = vpop.f32.mrf.mxu1 }
 0x647   : > { %v3885_v42 = vadd.f32 %v3884_v2, %v3796_v31 }
 0x648   : > { %v3710_v55 = vadd.f32 %v3709_v24, %v3621_v23  ;;  %3659 = vmatmul.bf16.gmra.mxu0 %v7807_v60 }
 0x649   : > { %v3960_v3 = vmax.f32 %v3885_v42, 0.0  ;;  %3748 = vmatmul.bf16.gmra.mxu1 %v7813_v16  ;;  %3837 = vmatmul.bf16.gmra.mxu2 %v7807_v60 }
 0x64a   : > { %3926 = vmatmul.bf16.gmra.mxu3 %v7813_v16  ;;  %v3961_v29 = vmax.f32 %v3710_v55, 0.0 }
 0x64b   : > { %v7928_v32 = vpack.c.bf16 %v3960_v3, %v3958_v62 }
 0x64c   : > { %v3798_v0 = vpop.f32.mrf.mxu2 }
 0x64d   : > { %v3799_v27 = vadd.f32 %v3798_v0, %v7831_v33  ;;  %v3887_v26 = vpop.f32.mrf.mxu3  ;;  %v3622_v57 = vpop.f32.mrf.mxu0 }
 0x64e   : > { %v3623_v39 = vadd.f32 %v3622_v57, %v7823_v8  ;;  %v3711_v48 = vpop.f32.mrf.mxu1 }
 0x64f   : > { %v3888_v53 = vadd.f32 %v3887_v26, %v3799_v27 }
 0x650   : > { %v3712_v58 = vadd.f32 %v3711_v48, %v3623_v39 }
 0x651   : > { %v3962_v5 = vmax.f32 %v3888_v53, 0.0 }
 0x652   : > { %v3963_v15 = vmax.f32 %v3712_v58, 0.0 }
 0x654   : > { %v3800_v4 = vpop.f32.mrf.mxu2  ;;  %v7932_v59 = vpack.c.bf16 %v3963_v15, %v3961_v29 }
 0x655   : > { %v3801_v60 = vadd.f32 %v3800_v4, %v7831_v33  ;;  %v3889_v16 = vpop.f32.mrf.mxu3  ;;  %v3625_v11 = vpop.f32.mrf.mxu0 }
 0x656   : > { %v3626_v47 = vadd.f32 %v3625_v11, %v7823_v8  ;;  %v3714_v1 = vpop.f32.mrf.mxu1 }
 0x657   : > { %v3890_v21 = vadd.f32 %v3889_v16, %v3801_v60 }
 0x658   : > { %v3715_v61 = vadd.f32 %v3714_v1, %v3626_v47  ;;  %3664 = vmatmul.bf16.gmra.mxu0 %v7821_v17 }
 0x659   : > { %v3964_v63 = vmax.f32 %v3890_v21, 0.0  ;;  %3753 = vmatmul.bf16.gmra.mxu1 %v7826_v36  ;;  %3842 = vmatmul.bf16.gmra.mxu2 %v7821_v17 }
 0x65a   : > { %3931 = vmatmul.bf16.gmra.mxu3 %v7826_v36  ;;  %v3965_v54 = vmax.f32 %v3715_v61, 0.0 }
 0x65b   : > { %v7940_v25 = vpack.c.bf16 %v3964_v63, %v3962_v5 }
 0x65c   : > { %v3803_v20 = vpop.f32.mrf.mxu2 }
 0x65d   : > { %v3804_v9 = vadd.f32 %v3803_v20, %v7831_v33  ;;  %v3892_v40 = vpop.f32.mrf.mxu3  ;;  %v3627_v50 = vpop.f32.mrf.mxu0 }
 0x65e   : > { %v3628_v22 = vadd.f32 %v3627_v50, %v7823_v8  ;;  %v3716_v45 = vpop.f32.mrf.mxu1 }
 0x65f   : > { %v3893_v52 = vadd.f32 %v3892_v40, %v3804_v9 }
 0x660   : > { %v3717_v18 = vadd.f32 %v3716_v45, %v3628_v22 }
 0x661   : > { %v3966_v31 = vmax.f32 %v3893_v52, 0.0 }
 0x662   : > { %v3967_v14 = vmax.f32 %v3717_v18, 0.0 }
 0x664   : > { %v3805_v43 = vpop.f32.mrf.mxu2  ;;  %v7944_v44 = vpack.c.bf16 %v3967_v14, %v3965_v54 }
 0x665   : > { %v3806_v17 = vadd.f32 %v3805_v43, %v7831_v33  ;;  %v3894_v36 = vpop.f32.mrf.mxu3  ;;  %v3630_v41 = vpop.f32.mrf.mxu0 }
 0x666   : > { %v3631_v49 = vadd.f32 %v3630_v41, %v7823_v8  ;;  %v3719_v10 = vpop.f32.mrf.mxu1 }
 0x667   : > { %v3895_v38 = vadd.f32 %v3894_v36, %v3806_v17 }
 0x668   : > { %v3720_v51 = vadd.f32 %v3719_v10, %v3631_v49  ;;  %4239 = vmatmul.bf16.vlgmr.msra.gmra.mxu0 %v7844_v6 }
 0x669   : > { %v3968_v2 = vmax.f32 %v3895_v38, 0.0  ;;  %4328 = vmatmul.bf16.vlgmr.msra.gmra.mxu1 %v7852_v56  ;;  %4417 = vmatmul.bf16.vlgmr.msra.gmra.mxu2 %v7844_v6 }
 0x66a   : > { %4506 = vmatmul.bf16.vlgmr.msra.gmra.mxu3 %v7852_v56  ;;  %v3969_v26 = vmax.f32 %v3720_v51, 0.0 }
 0x66b   : > { %v7952_v46 = vpack.c.bf16 %v3968_v2, %v3966_v31 }
 0x66c   : > { %v3808_v23 = vpop.f32.mrf.mxu2 }
 0x66d   : > { %v3809_v24 = vadd.f32 %v3808_v23, %v7831_v33  ;;  %v3897_v42 = vpop.f32.mrf.mxu3  ;;  %v3632_v55 = vpop.f32.mrf.mxu0 }
 0x66e   : > { %v3633_v62 = vadd.f32 %v3632_v55, %v7823_v8  ;;  %v3721_v3 = vpop.f32.mrf.mxu1 }
 0x66f   : > { %v3898_v0 = vadd.f32 %v3897_v42, %v3809_v24 }
 0x670   : > { %v3722_v27 = vadd.f32 %v3721_v3, %v3633_v62 }
 0x671   : > { %v3970_v60 = vmax.f32 %v3898_v0, 0.0 }
 0x672   : > { %v3971_v57 = vmax.f32 %v3722_v27, 0.0 }
 0x674   : > { %v3810_v39 = vpop.f32.mrf.mxu2  ;;  %v7956_v48 = vpack.c.bf16 %v3971_v57, %v3969_v26 }
 0x675   : > { %v3811_v6 = vadd.f32 %v3810_v39, %v7831_v33  ;;  %v3899_v56 = vpop.f32.mrf.mxu3  ;;  %v3635_v53 = vpop.f32.mrf.mxu0 }
 0x676   : > { %v3636_v58 = vadd.f32 %v3635_v53, %v7823_v8  ;;  %v3724_v29 = vpop.f32.mrf.mxu1 }
 0x677   : > { %v3900_v15 = vadd.f32 %v3899_v56, %v3811_v6 }
 0x678   : > { %v3725_v4 = vadd.f32 %v3724_v29, %v3636_v58  ;;  %4244 = vmatmul.bf16.gmra.mxu0 %v7856_v7 }
 0x679   : > { %v3972_v16 = vmax.f32 %v3900_v15, 0.0  ;;  %4333 = vmatmul.bf16.gmra.mxu1 %v7868_v12  ;;  %4422 = vmatmul.bf16.gmra.mxu2 %v7856_v7 }
 0x67a   : > { %4511 = vmatmul.bf16.gmra.mxu3 %v7868_v12  ;;  %v3973_v40 = vmax.f32 %v3725_v4, 0.0 }
 0x67b   : > { %v7964_v11 = vpack.c.bf16 %v3972_v16, %v3970_v60 }
 0x67c   : > { %v3813_v47 = vpop.f32.mrf.mxu2 }
 0x67d   : > { %v3814_v1 = vadd.f32 %v3813_v47, %v7831_v33  ;;  %v3902_v21 = vpop.f32.mrf.mxu3  ;;  %v3637_v61 = vpop.f32.mrf.mxu0 }
 0x67e   : > { %v3638_v5 = vadd.f32 %v3637_v61, %v7823_v8  ;;  %v3726_v63 = vpop.f32.mrf.mxu1 }
 0x67f   : > { %v3903_v20 = vadd.f32 %v3902_v21, %v3814_v1 }
 0x680   : > { %v3727_v9 = vadd.f32 %v3726_v63, %v3638_v5 }
 0x681   : > { %v3974_v17 = vmax.f32 %v3903_v20, 0.0 }
 0x682   : > { %v3975_v50 = vmax.f32 %v3727_v9, 0.0 }
 0x684   : > { %v3815_v22 = vpop.f32.mrf.mxu2  ;;  %v7968_v45 = vpack.c.bf16 %v3975_v50, %v3973_v40 }
 0x685   : > { %v3816_v7 = vadd.f32 %v3815_v22, %v7831_v33  ;;  %v3904_v12 = vpop.f32.mrf.mxu3  ;;  %v3640_v52 = vpop.f32.mrf.mxu0 }
 0x686   : > { %v3641_v18 = vadd.f32 %v3640_v52, %v7823_v8  ;;  %v3729_v54 = vpop.f32.mrf.mxu1 }
 0x687   : > { %v3905_v14 = vadd.f32 %v3904_v12, %v3816_v7 }
 0x688   : > { %v3730_v43 = vadd.f32 %v3729_v54, %v3641_v18  ;;  %4249 = vmatmul.bf16.gmra.mxu0 %v7876_v19 }
 0x689   : > { %v3976_v36 = vmax.f32 %v3905_v14, 0.0  ;;  %4338 = vmatmul.bf16.gmra.mxu1 %v7884_v34  ;;  %4427 = vmatmul.bf16.gmra.mxu2 %v7876_v19 }
 0x68a   : > { %4516 = vmatmul.bf16.gmra.mxu3 %v7884_v34  ;;  %v3977_v42 = vmax.f32 %v3730_v43, 0.0 }
 0x68b   : > { %v7976_v41 = vpack.c.bf16 %v3976_v36, %v3974_v17 }
 0x68c   : > { %v3818_v49 = vpop.f32.mrf.mxu2 }
 0x68d   : > { %v3819_v10 = vadd.f32 %v3818_v49, %v7831_v33  ;;  %v3907_v38 = vpop.f32.mrf.mxu3  ;;  %v3642_v51 = vpop.f32.mrf.mxu0 }
 0x68e   : > { %v3643_v31 = vadd.f32 %v3642_v51, %v7823_v8  ;;  %v3731_v2 = vpop.f32.mrf.mxu1 }
 0x68f   : > { %v3908_v23 = vadd.f32 %v3907_v38, %v3819_v10 }
 0x690   : > { %v3732_v24 = vadd.f32 %v3731_v2, %v3643_v31 }
 0x691   : > { %v3978_v6 = vmax.f32 %v3908_v23, 0.0 }
 0x692   : > { %v3979_v55 = vmax.f32 %v3732_v24, 0.0 }
 0x694   : > { %v3820_v62 = vpop.f32.mrf.mxu2  ;;  %v7980_v3 = vpack.c.bf16 %v3979_v55, %v3977_v42 }
 0x695   : > { %v3821_v19 = vadd.f32 %v3820_v62, %v7831_v33  ;;  %v3909_v34 = vpop.f32.mrf.mxu3  ;;  %v3645_v0 = vpop.f32.mrf.mxu0 }
 0x696   : > { %v3646_v27 = vadd.f32 %v3645_v0, %v7823_v8  ;;  %v3734_v26 = vpop.f32.mrf.mxu1 }
 0x697   : > { %v3910_v57 = vadd.f32 %v3909_v34, %v3821_v19 }
 0x698   : > { %v3735_v39 = vadd.f32 %v3734_v26, %v3646_v27  ;;  %4254 = vmatmul.bf16.gmra.mxu0 %v7888_v13 }
 0x699   : > { %v3980_v56 = vmax.f32 %v3910_v57, 0.0  ;;  %4343 = vmatmul.bf16.gmra.mxu1 %v7900_v37  ;;  %4432 = vmatmul.bf16.gmra.mxu2 %v7888_v13 }
 0x69a   : > { %4521 = vmatmul.bf16.gmra.mxu3 %v7900_v37  ;;  %v3981_v21 = vmax.f32 %v3735_v39, 0.0 }
 0x69b   : > { %v7988_v53 = vpack.c.bf16 %v3980_v56, %v3978_v6 }
 0x69c   : > { %v3823_v58 = vpop.f32.mrf.mxu2 }
 0x69d   : > { %v3824_v29 = vadd.f32 %v3823_v58, %v7831_v33  ;;  %v3912_v15 = vpop.f32.mrf.mxu3  ;;  %v3647_v4 = vpop.f32.mrf.mxu0 }
 0x69e   : > { %v3648_v60 = vadd.f32 %v3647_v4, %v7823_v8  ;;  %v3736_v16 = vpop.f32.mrf.mxu1 }
 0x69f   : > { %v3913_v47 = vadd.f32 %v3912_v15, %v3824_v29 }
 0x6a0   : > { %v3737_v1 = vadd.f32 %v3736_v16, %v3648_v60 }
 0x6a1   : > { %v3982_v7 = vmax.f32 %v3913_v47, 0.0 }
 0x6a2   : > { %v3983_v61 = vmax.f32 %v3737_v1, 0.0 }
 0x6a4   : > { %v3825_v5 = vpop.f32.mrf.mxu2  ;;  %v7992_v63 = vpack.c.bf16 %v3983_v61, %v3981_v21 }
 0x6a5   : > { %v3826_v13 = vadd.f32 %v3825_v5, %v7831_v33  ;;  %v3914_v37 = vpop.f32.mrf.mxu3  ;;  %v3650_v20 = vpop.f32.mrf.mxu0 }
 0x6a6   : > { %v3651_v9 = vadd.f32 %v3650_v20, %v7823_v8  ;;  %v3739_v40 = vpop.f32.mrf.mxu1 }
 0x6a7   : > { %v3915_v50 = vadd.f32 %v3914_v37, %v3826_v13 }
 0x6a8   : > { %v3740_v22 = vadd.f32 %v3739_v40, %v3651_v9  ;;  %4259 = vmatmul.bf16.gmra.mxu0 %v7908_v35 }
 0x6a9   : > { %v3984_v12 = vmax.f32 %v3915_v50, 0.0  ;;  %4348 = vmatmul.bf16.gmra.mxu1 %v7916_v30  ;;  %4437 = vmatmul.bf16.gmra.mxu2 %v7908_v35 }
 0x6aa   : > { %4526 = vmatmul.bf16.gmra.mxu3 %v7916_v30  ;;  %v3985_v38 = vmax.f32 %v3740_v22, 0.0 }
 0x6ab   : > { %v8000_v52 = vpack.c.bf16 %v3984_v12, %v3982_v7 }
 0x6ac   : > { %v3828_v18 = vpop.f32.mrf.mxu2 }
 0x6ad   : > { %v3829_v54 = vadd.f32 %v3828_v18, %v7831_v33  ;;  %v3917_v14 = vpop.f32.mrf.mxu3  ;;  %v3652_v43 = vpop.f32.mrf.mxu0 }
 0x6ae   : > { %v3653_v17 = vadd.f32 %v3652_v43, %v7823_v8  ;;  %v3741_v36 = vpop.f32.mrf.mxu1 }
 0x6af   : > { %v3918_v49 = vadd.f32 %v3917_v14, %v3829_v54 }
 0x6b0   : > { %v3742_v10 = vadd.f32 %v3741_v36, %v3653_v17 }
 0x6b1   : > { %v3986_v19 = vmax.f32 %v3918_v49, 0.0 }
 0x6b2   : > { %v3987_v51 = vmax.f32 %v3742_v10, 0.0 }
 0x6b4   : > { %v3830_v31 = vpop.f32.mrf.mxu2  ;;  %v8004_v2 = vpack.c.bf16 %v3987_v51, %v3985_v38 }
 0x6b5   : > { %v3831_v35 = vadd.f32 %v3830_v31, %v7831_v33  ;;  %v3919_v30 = vpop.f32.mrf.mxu3  ;;  %v3655_v23 = vpop.f32.mrf.mxu0 }
 0x6b6   : > { %v3656_v24 = vadd.f32 %v3655_v23, %v7823_v8  ;;  %v3744_v42 = vpop.f32.mrf.mxu1 }
 0x6b7   : > { %v3920_v55 = vadd.f32 %v3919_v30, %v3831_v35 }
 0x6b8   : > { %v3745_v62 = vadd.f32 %v3744_v42, %v3656_v24  ;;  %4264 = vmatmul.bf16.gmra.mxu0 %v7920_v28 }
 0x6b9   : > { %v3988_v34 = vmax.f32 %v3920_v55, 0.0  ;;  %4353 = vmatmul.bf16.gmra.mxu1 %v7928_v32  ;;  %4442 = vmatmul.bf16.gmra.mxu2 %v7920_v28 }
 0x6ba   : > { %4531 = vmatmul.bf16.gmra.mxu3 %v7928_v32  ;;  %v3989_v15 = vmax.f32 %v3745_v62, 0.0 }
 0x6bb   : > { %v8012_v0 = vpack.c.bf16 %v3988_v34, %v3986_v19 }
 0x6bc   : > { %v3833_v27 = vpop.f32.mrf.mxu2 }
 0x6bd   : > { %v3834_v26 = vadd.f32 %v3833_v27, %v7831_v33  ;;  %v3922_v57 = vpop.f32.mrf.mxu3  ;;  %v3657_v39 = vpop.f32.mrf.mxu0 }
 0x6be   : > { %v3658_v6 = vadd.f32 %v3657_v39, %v7823_v8  ;;  %v3746_v56 = vpop.f32.mrf.mxu1 }
 0x6bf   : > { %v3923_v58 = vadd.f32 %v3922_v57, %v3834_v26  ;;  %v4065_v26 = vld [vmem:[%s339_s21] sm:$0x3] }
 0x6c0   : > { %v3747_v29 = vadd.f32 %v3746_v56, %v3658_v6  ;;  %v8042_v56 = vperm.slane %v4065_v26, 0 }
 0x6c1   : > { %v3990_v13 = vmax.f32 %v3923_v58, 0.0 }
 0x6c2   : > { %v3991_v4 = vmax.f32 %v3747_v29, 0.0 }
 0x6c4   : > { %v3835_v60 = vpop.f32.mrf.mxu2  ;;  %v8016_v16 = vpack.c.bf16 %v3991_v4, %v3989_v15 }
 0x6c5   : > { %v3836_v28 = vadd.f32 %v3835_v60, %v7831_v33  ;;  %v3924_v32 = vpop.f32.mrf.mxu3  ;;  %v3660_v47 = vpop.f32.mrf.mxu0 }
 0x6c6   : > { %v3661_v1 = vadd.f32 %v3660_v47, %v7823_v8  ;;  %v3749_v21 = vpop.f32.mrf.mxu1 }
 0x6c7   : > { %v3925_v61 = vadd.f32 %v3924_v32, %v3836_v28 }
 0x6c8   : > { %v3750_v5 = vadd.f32 %v3749_v21, %v3661_v1  ;;  %4269 = vmatmul.bf16.gmra.mxu0 %v7932_v59  ;;  %v8053_v1 = vperm.slane %v4065_v26, 1 }
 0x6c9   : > { %v3992_v37 = vmax.f32 %v3925_v61, 0.0  ;;  %4358 = vmatmul.bf16.gmra.mxu1 %v7940_v25  ;;  %4447 = vmatmul.bf16.gmra.mxu2 %v7932_v59 }
 0x6ca   : > { %4536 = vmatmul.bf16.gmra.mxu3 %v7940_v25  ;;  %v3993_v14 = vmax.f32 %v3750_v5, 0.0 }
 0x6cb   : > { %v8024_v20 = vpack.c.bf16 %v3992_v37, %v3990_v13 }
 0x6cc   : > { %v3838_v9 = vpop.f32.mrf.mxu2 }
 0x6cd   : > { %v3839_v40 = vadd.f32 %v3838_v9, %v7831_v33  ;;  %v3927_v50 = vpop.f32.mrf.mxu3  ;;  %v3662_v22 = vpop.f32.mrf.mxu0 }
 0x6ce   : > { %v3663_v7 = vadd.f32 %v3662_v22, %v7823_v8  ;;  %v3751_v12 = vpop.f32.mrf.mxu1 }
 0x6cf   : > { %v3928_v18 = vadd.f32 %v3927_v50, %v3839_v40 }
 0x6d0   : > { %v3752_v54 = vadd.f32 %v3751_v12, %v3663_v7 }
 0x6d1   : > { %v3994_v35 = vmax.f32 %v3928_v18, 0.0 }
 0x6d2   : > { %v3995_v43 = vmax.f32 %v3752_v54, 0.0 }
 0x6d4   : > { %v3840_v17 = vpop.f32.mrf.mxu2  ;;  %v8028_v36 = vpack.c.bf16 %v3995_v43, %v3993_v14 }
 0x6d5   : > { %v3841_v59 = vadd.f32 %v3840_v17, %v7831_v33  ;;  %v3929_v25 = vpop.f32.mrf.mxu3  ;;  %v3665_v49 = vpop.f32.mrf.mxu0 }
 0x6d6   : > { %v3666_v10 = vadd.f32 %v3665_v49, %v7823_v8  ;;  %v3754_v38 = vpop.f32.mrf.mxu1 }
 0x6d7   : > { %v3930_v51 = vadd.f32 %v3929_v25, %v3841_v59 }
 0x6d8   : > { %v3755_v31 = vadd.f32 %v3754_v38, %v3666_v10  ;;  %4274 = vmatmul.bf16.gmra.mxu0 %v7944_v44 }
 0x6d9   : > { %v3996_v30 = vmax.f32 %v3930_v51, 0.0  ;;  %4363 = vmatmul.bf16.gmra.mxu1 %v7952_v46  ;;  %4452 = vmatmul.bf16.gmra.mxu2 %v7944_v44 }
 0x6da   : > { %4541 = vmatmul.bf16.gmra.mxu3 %v7952_v46  ;;  %v3997_v39 = vmax.f32 %v3755_v31, 0.0 }
 0x6db   : > { %v8036_v23 = vpack.c.bf16 %v3996_v30, %v3994_v35 }
 0x6dc   : > { %v3843_v24 = vpop.f32.mrf.mxu2 }
 0x6dd   : > { %v3844_v42 = vadd.f32 %v3843_v24, %v7831_v33  ;;  %v3932_v55 = vpop.f32.mrf.mxu3  ;;  %v3667_v62 = vpop.f32.mrf.mxu0 }
 0x6de   : > { %v3668_v19 = vadd.f32 %v3667_v62, %v7823_v8  ;;  %v3756_v34 = vpop.f32.mrf.mxu1 }
 0x6df   : > { %v3933_v27 = vadd.f32 %v3932_v55, %v3844_v42 }
 0x6e0   : > { %v3757_v57 = vadd.f32 %v3756_v34, %v3668_v19 }
 0x6e1   : > { %v3998_v32 = vmax.f32 %v3933_v27, 0.0 }
 0x6e2   : > { %v3999_v6 = vmax.f32 %v3757_v57, 0.0 }
 0x6e4   : > { %v3845_v44 = vpop.f32.mrf.mxu2  ;;  %v8044_v46 = vpack.c.bf16 %v3999_v6, %v3997_v39 }
 0x6e5   : > { %v3846_v58 = vadd.f32 %v3845_v44, %v7831_v33  ;;  %v3934_v29 = vpop.f32.mrf.mxu3  ;;  %v4240_v15 = vpop.f32.mrf.mxu0 }
 0x6e6   : > { %v4241_v4 = vadd.f32 %v4240_v15, %v8042_v56  ;;  %v4329_v60 = vpop.f32.mrf.mxu1 }
 0x6e7   : > { %v3935_v8 = vadd.f32 %v3934_v29, %v3846_v58 }
 0x6e8   : > { %v8048_v28 = vadd.f32 %v4329_v60, %v4241_v4  ;;  %4279 = vmatmul.bf16.gmra.mxu0 %v7956_v48 }
 0x6e9   : > { %v4000_v47 = vmax.f32 %v3935_v8, 0.0  ;;  %4368 = vmatmul.bf16.gmra.mxu1 %v7964_v11  ;;  %4457 = vmatmul.bf16.gmra.mxu2 %v7956_v48 }
 0x6ea   : > { %4546 = vmatmul.bf16.gmra.mxu3 %v7964_v11 }
 0x6eb   : > { %v8056_v33 = vpack.c.bf16 %v4000_v47, %v3998_v32 }
 0x6ec   : > { %v4418_v21 = vpop.f32.mrf.mxu2 }
 0x6ed   : > { %v4419_v61 = vadd.f32 %v4418_v21, %v8053_v1  ;;  %v4507_v5 = vpop.f32.mrf.mxu3  ;;  %v4242_v13 = vpop.f32.mrf.mxu0 }
 0x6ee   : > { %v4243_v37 = vadd.f32 %v4242_v13, %v8042_v56  ;;  %v4331_v9 = vpop.f32.mrf.mxu1 }
 0x6ef   : > { %v8060_v40 = vadd.f32 %v4507_v5, %v4419_v61 }
 0x6f0   : > { %v8062_v50 = vadd.f32 %v4331_v9, %v4243_v37 }
 0x6f2   : > { %8553 = vst [vmem:[#allocation55_spill] sm:$0xff] %v8062_v50 }
 0x6f4   : > { %v4420_v22 = vpop.f32.mrf.mxu2 }
 0x6f5   : > { %v4421_v48 = vadd.f32 %v4420_v22, %v8053_v1  ;;  %v4509_v7 = vpop.f32.mrf.mxu3  ;;  %v4245_v12 = vpop.f32.mrf.mxu0 }
 0x6f6   : > { %v4246_v11 = vadd.f32 %v4245_v12, %v8042_v56  ;;  %v4334_v18 = vpop.f32.mrf.mxu1 }
 0x6f7   : > { %v8066_v54 = vadd.f32 %v4509_v7, %v4421_v48 }
 0x6f8   : > { %v8068_v14 = vadd.f32 %v4334_v18, %v4246_v11  ;;  %4284 = vmatmul.bf16.gmra.mxu0 %v7968_v45 }
 0x6f9   : > { %8554 = vst [vmem:[#allocation56_spill] sm:$0xff] %v8066_v54  ;;  %4373 = vmatmul.bf16.gmra.mxu1 %v7976_v41  ;;  %4462 = vmatmul.bf16.gmra.mxu2 %v7968_v45 }
 0x6fa   : > { %8555 = vst [vmem:[#allocation57_spill] sm:$0xff] %v8068_v14  ;;  %4551 = vmatmul.bf16.gmra.mxu3 %v7976_v41 }
 0x6fc   : > { %v4423_v43 = vpop.f32.mrf.mxu2 }
 0x6fd   : > { %v4424_v17 = vadd.f32 %v4423_v43, %v8053_v1  ;;  %v4512_v59 = vpop.f32.mrf.mxu3  ;;  %v4247_v25 = vpop.f32.mrf.mxu0 }
 0x6fe   : > { %v4248_v49 = vadd.f32 %v4247_v25, %v8042_v56  ;;  %v4336_v10 = vpop.f32.mrf.mxu1 }
 0x6ff   : > { %v8076_v38 = vadd.f32 %v4512_v59, %v4424_v17 }
 0x700   : > { %v8078_v51 = vadd.f32 %v4336_v10, %v4248_v49 }
 0x701   : > { %8556 = vst [vmem:[#allocation58_spill] sm:$0xff] %v8076_v38 }
 0x702   : > { %8557 = vst [vmem:[#allocation59_spill] sm:$0xff] %v8078_v51 }
 0x704   : > { %v4425_v31 = vpop.f32.mrf.mxu2 }
 0x705   : > { %v4426_v35 = vadd.f32 %v4425_v31, %v8053_v1  ;;  %v4514_v30 = vpop.f32.mrf.mxu3  ;;  %v4250_v24 = vpop.f32.mrf.mxu0 }
 0x706   : > { %v4251_v45 = vadd.f32 %v4250_v24, %v8042_v56  ;;  %v4339_v41 = vpop.f32.mrf.mxu1 }
 0x707   : > { %v8082_v42 = vadd.f32 %v4514_v30, %v4426_v35 }
 0x708   : > { %v8084_v55 = vadd.f32 %v4339_v41, %v4251_v45  ;;  %4289 = vmatmul.bf16.gmra.mxu0 %v7980_v3 }
 0x709   : > { %8558 = vst [vmem:[#allocation60_spill] sm:$0xff] %v8082_v42  ;;  %4378 = vmatmul.bf16.gmra.mxu1 %v7988_v53  ;;  %4467 = vmatmul.bf16.gmra.mxu2 %v7980_v3 }
 0x70a   : > { %4556 = vmatmul.bf16.gmra.mxu3 %v7988_v53 }
 0x70c   : > { %v4428_v62 = vpop.f32.mrf.mxu2 }
 0x70d   : > { %v4429_v19 = vadd.f32 %v4428_v62, %v8053_v1  ;;  %v4517_v34 = vpop.f32.mrf.mxu3  ;;  %v4252_v27 = vpop.f32.mrf.mxu0 }
 0x70e   : > { %v4253_v26 = vadd.f32 %v4252_v27, %v8042_v56  ;;  %v4341_v57 = vpop.f32.mrf.mxu1 }
 0x70f   : > { %v8092_v39 = vadd.f32 %v4517_v34, %v4429_v19 }
 0x710   : > { %v8094_v6 = vadd.f32 %v4341_v57, %v4253_v26 }
 0x714   : > { %v4430_v44 = vpop.f32.mrf.mxu2 }
 0x715   : > { %v4431_v58 = vadd.f32 %v4430_v44, %v8053_v1  ;;  %v4519_v29 = vpop.f32.mrf.mxu3  ;;  %v4255_v15 = vpop.f32.mrf.mxu0 }
 0x716   : > { %v4256_v3 = vadd.f32 %v4255_v15, %v8042_v56  ;;  %v4344_v53 = vpop.f32.mrf.mxu1 }
 0x717   : > { %v8098_v4 = vadd.f32 %v4519_v29, %v4431_v58 }
 0x718   : > { %v8100_v60 = vadd.f32 %v4344_v53, %v4256_v3  ;;  %4294 = vmatmul.bf16.gmra.mxu0 %v7992_v63 }
 0x719   : > { %4383 = vmatmul.bf16.gmra.mxu1 %v8000_v52  ;;  %4472 = vmatmul.bf16.gmra.mxu2 %v7992_v63 }
 0x71a   : > { %4561 = vmatmul.bf16.gmra.mxu3 %v8000_v52 }
 0x71c   : > { %v4433_v8 = vpop.f32.mrf.mxu2 }
 0x71d   : > { %v4434_v32 = vadd.f32 %v4433_v8, %v8053_v1  ;;  %v4522_v47 = vpop.f32.mrf.mxu3  ;;  %v4257_v21 = vpop.f32.mrf.mxu0 }
 0x71e   : > { %v4258_v61 = vadd.f32 %v4257_v21, %v8042_v56  ;;  %v4346_v5 = vpop.f32.mrf.mxu1 }
 0x71f   : > { %v8108_v13 = vadd.f32 %v4522_v47, %v4434_v32 }
 0x720   : > { %v8110_v37 = vadd.f32 %v4346_v5, %v4258_v61 }
 0x724   : > { %v4435_v9 = vpop.f32.mrf.mxu2 }
 0x725   : > { %v4436_v22 = vadd.f32 %v4435_v9, %v8053_v1  ;;  %v4524_v48 = vpop.f32.mrf.mxu3  ;;  %v4260_v7 = vpop.f32.mrf.mxu0 }
 0x726   : > { %v4261_v63 = vadd.f32 %v4260_v7, %v8042_v56  ;;  %v4349_v52 = vpop.f32.mrf.mxu1 }
 0x727   : > { %v8114_v12 = vadd.f32 %v4524_v48, %v4436_v22 }
 0x728   : > { %v8116_v11 = vadd.f32 %v4349_v52, %v4261_v63  ;;  %4299 = vmatmul.bf16.gmra.mxu0 %v8004_v2 }
 0x729   : > { %4388 = vmatmul.bf16.gmra.mxu1 %v8012_v0  ;;  %4477 = vmatmul.bf16.gmra.mxu2 %v8004_v2 }
 0x72a   : > { %4566 = vmatmul.bf16.gmra.mxu3 %v8012_v0 }
 0x72c   : > { %v4438_v18 = vpop.f32.mrf.mxu2 }
 0x72d   : > { %v4439_v43 = vadd.f32 %v4438_v18, %v8053_v1  ;;  %v4527_v17 = vpop.f32.mrf.mxu3  ;;  %v4262_v59 = vpop.f32.mrf.mxu0 }
 0x72e   : > { %v4263_v25 = vadd.f32 %v4262_v59, %v8042_v56  ;;  %v4351_v49 = vpop.f32.mrf.mxu1 }
 0x72f   : > { %v8124_v10 = vadd.f32 %v4527_v17, %v4439_v43 }
 0x730   : > { %v8126_v31 = vadd.f32 %v4351_v49, %v4263_v25 }
 0x734   : > { %v4440_v35 = vpop.f32.mrf.mxu2 }
 0x735   : > { %v4441_v30 = vadd.f32 %v4440_v35, %v8053_v1  ;;  %v4529_v24 = vpop.f32.mrf.mxu3  ;;  %v4265_v45 = vpop.f32.mrf.mxu0 }
 0x736   : > { %v4266_v2 = vadd.f32 %v4265_v45, %v8042_v56  ;;  %v4354_v0 = vpop.f32.mrf.mxu1 }
 0x737   : > { %v8130_v41 = vadd.f32 %v4529_v24, %v4441_v30 }
 0x738   : > { %v8132_v62 = vadd.f32 %v4354_v0, %v4266_v2  ;;  %4304 = vmatmul.bf16.gmra.mxu0 %v8016_v16 }
 0x739   : > { %4393 = vmatmul.bf16.gmra.mxu1 %v8024_v20  ;;  %4482 = vmatmul.bf16.gmra.mxu2 %v8016_v16 }
 0x73a   : > { %8559 = vst [vmem:[#allocation61_spill] sm:$0xff] %v8132_v62  ;;  %4571 = vmatmul.bf16.gmra.mxu3 %v8024_v20 }
 0x73c   : > { %v4443_v19 = vpop.f32.mrf.mxu2 }
 0x73d   : > { %v4444_v34 = vadd.f32 %v4443_v19, %v8053_v1  ;;  %v4532_v27 = vpop.f32.mrf.mxu3  ;;  %v4267_v26 = vpop.f32.mrf.mxu0 }
 0x73e   : > { %v4268_v57 = vadd.f32 %v4267_v26, %v8042_v56  ;;  %v4356_v44 = vpop.f32.mrf.mxu1 }
 0x73f   : > { %v8140_v58 = vadd.f32 %v4532_v27, %v4444_v34 }
 0x740   : > { %v8142_v29 = vadd.f32 %v4356_v44, %v4268_v57 }
 0x744   : > { %v4445_v15 = vpop.f32.mrf.mxu2 }
 0x745   : > { %v4446_v3 = vadd.f32 %v4445_v15, %v8053_v1  ;;  %v4534_v53 = vpop.f32.mrf.mxu3  ;;  %v4270_v8 = vpop.f32.mrf.mxu0 }
 0x746   : > { %v4271_v16 = vadd.f32 %v4270_v8, %v8042_v56  ;;  %v4359_v20 = vpop.f32.mrf.mxu1 }
 0x747   : > { %v8146_v32 = vadd.f32 %v4534_v53, %v4446_v3 }
 0x748   : > { %v8148_v47 = vadd.f32 %v4359_v20, %v4271_v16  ;;  %4309 = vmatmul.bf16.gmra.mxu0 %v8028_v36 }
 0x749   : > { %4398 = vmatmul.bf16.gmra.mxu1 %v8036_v23  ;;  %4487 = vmatmul.bf16.gmra.mxu2 %v8028_v36 }
 0x74a   : > { %4576 = vmatmul.bf16.gmra.mxu3 %v8036_v23 }
 0x74c   : > { %v4448_v21 = vpop.f32.mrf.mxu2 }
 0x74d   : > { %v4449_v61 = vadd.f32 %v4448_v21, %v8053_v1  ;;  %v4537_v5 = vpop.f32.mrf.mxu3  ;;  %v4272_v9 = vpop.f32.mrf.mxu0 }
 0x74e   : > { %v4273_v22 = vadd.f32 %v4272_v9, %v8042_v56  ;;  %v4361_v48 = vpop.f32.mrf.mxu1 }
 0x74f   : > { %v8156_v7 = vadd.f32 %v4537_v5, %v4449_v61 }
 0x750   : > { %v8158_v63 = vadd.f32 %v4361_v48, %v4273_v22 }
 0x751   : > { %8560 = vst [vmem:[#allocation62_spill] sm:$0xff] %v8156_v7 }
 0x754   : > { %v4450_v52 = vpop.f32.mrf.mxu2 }
 0x755   : > { %v4451_v18 = vadd.f32 %v4450_v52, %v8053_v1  ;;  %v4539_v43 = vpop.f32.mrf.mxu3  ;;  %v4275_v17 = vpop.f32.mrf.mxu0 }
 0x756   : > { %v4276_v36 = vadd.f32 %v4275_v17, %v8042_v56  ;;  %v4364_v23 = vpop.f32.mrf.mxu1 }
 0x757   : > { %v8162_v59 = vadd.f32 %v4539_v43, %v4451_v18 }
 0x758   : > { %v8164_v25 = vadd.f32 %v4364_v23, %v4276_v36  ;;  %4314 = vmatmul.bf16.gmra.mxu0 %v8044_v46 }
 0x759   : > { %4403 = vmatmul.bf16.gmra.mxu1 %v8056_v33  ;;  %4492 = vmatmul.bf16.gmra.mxu2 %v8044_v46 }
 0x75a   : > { %4581 = vmatmul.bf16.gmra.mxu3 %v8056_v33 }
 0x75c   : > { %v4453_v49 = vpop.f32.mrf.mxu2 }
 0x75d   : > { %v4454_v35 = vadd.f32 %v4453_v49, %v8053_v1  ;;  %v4542_v30 = vpop.f32.mrf.mxu3  ;;  %v4277_v24 = vpop.f32.mrf.mxu0 }
 0x75e   : > { %v4278_v45 = vadd.f32 %v4277_v24, %v8042_v56  ;;  %v4366_v2 = vpop.f32.mrf.mxu1 }
 0x75f   : > { %v8172_v0 = vadd.f32 %v4542_v30, %v4454_v35 }
 0x760   : > { %v8174_v19 = vadd.f32 %v4366_v2, %v4278_v45 }
 0x764   : > { %v4455_v34 = vpop.f32.mrf.mxu2 }
 0x765   : > { %v4456_v27 = vadd.f32 %v4455_v34, %v8053_v1  ;;  %v4544_v26 = vpop.f32.mrf.mxu3  ;;  %v4280_v57 = vpop.f32.mrf.mxu0 }
 0x766   : > { %v4281_v46 = vadd.f32 %v4280_v57, %v8042_v56  ;;  %v4369_v33 = vpop.f32.mrf.mxu1 }
 0x767   : > { %v8178_v44 = vadd.f32 %v4544_v26, %v4456_v27 }
 0x768   : > { %v8180_v15 = vadd.f32 %v4369_v33, %v4281_v46 }
 0x76c   : > { %v4458_v3 = vpop.f32.mrf.mxu2 }
 0x76d   : > { %v4459_v53 = vadd.f32 %v4458_v3, %v8053_v1  ;;  %v4547_v8 = vpop.f32.mrf.mxu3  ;;  %v4282_v16 = vpop.f32.mrf.mxu0 }
 0x76e   : > { %v4283_v20 = vadd.f32 %v4282_v16, %v8042_v56  ;;  %v4371_v21 = vpop.f32.mrf.mxu1 }
 0x76f   : > { %v8184_v61 = vadd.f32 %v4547_v8, %v4459_v53 }
 0x770   : > { %v8186_v5 = vadd.f32 %v4371_v21, %v4283_v20 }
 0x774   : > { %v4460_v9 = vpop.f32.mrf.mxu2 }
 0x775   : > { %v4461_v22 = vadd.f32 %v4460_v9, %v8053_v1  ;;  %v4549_v48 = vpop.f32.mrf.mxu3  ;;  %v4285_v52 = vpop.f32.mrf.mxu0 }
 0x776   : > { %v4286_v18 = vadd.f32 %v4285_v52, %v8042_v56  ;;  %v4374_v43 = vpop.f32.mrf.mxu1 }
 0x777   : > { %v8190_v17 = vadd.f32 %v4549_v48, %v4461_v22 }
 0x778   : > { %v8192_v36 = vadd.f32 %v4374_v43, %v4286_v18 }
 0x77c   : > { %v4463_v23 = vpop.f32.mrf.mxu2 }
 0x77d   : > { %v4464_v49 = vadd.f32 %v4463_v23, %v8053_v1  ;;  %v4552_v35 = vpop.f32.mrf.mxu3  ;;  %v4287_v30 = vpop.f32.mrf.mxu0 }
 0x77e   : > { %v4288_v24 = vadd.f32 %v4287_v30, %v8042_v56  ;;  %v4376_v45 = vpop.f32.mrf.mxu1 }
 0x77f   : > { %v8196_v2 = vadd.f32 %v4552_v35, %v4464_v49 }
 0x780   : > { %v8198_v34 = vadd.f32 %v4376_v45, %v4288_v24 }
 0x784   : > { %v4465_v27 = vpop.f32.mrf.mxu2 }
 0x785   : > { %v4466_v26 = vadd.f32 %v4465_v27, %v8053_v1  ;;  %v4554_v57 = vpop.f32.mrf.mxu3  ;;  %v4290_v46 = vpop.f32.mrf.mxu0 }
 0x786   : > { %v4291_v33 = vadd.f32 %v4290_v46, %v8042_v56  ;;  %v4379_v3 = vpop.f32.mrf.mxu1 }
 0x787   : > { %v8202_v53 = vadd.f32 %v4554_v57, %v4466_v26 }
 0x788   : > { %v8204_v8 = vadd.f32 %v4379_v3, %v4291_v33 }
 0x789   : > { %8561 = vst [vmem:[#allocation63_spill] sm:$0xff] %v8202_v53 }
 0x78a   : > { %8562 = vst [vmem:[#allocation64_spill] sm:$0xff] %v8204_v8 }
 0x78c   : > { %v4468_v16 = vpop.f32.mrf.mxu2 }
 0x78d   : > { %v4469_v20 = vadd.f32 %v4468_v16, %v8053_v1  ;;  %v4557_v21 = vpop.f32.mrf.mxu3  ;;  %v4292_v9 = vpop.f32.mrf.mxu0 }
 0x78e   : > { %v4293_v22 = vadd.f32 %v4292_v9, %v8042_v56  ;;  %v4381_v48 = vpop.f32.mrf.mxu1 }
 0x78f   : > { %v8208_v52 = vadd.f32 %v4557_v21, %v4469_v20 }
 0x790   : > { %v8210_v18 = vadd.f32 %v4381_v48, %v4293_v22 }
 0x791   : > { %8563 = vst [vmem:[#allocation65_spill] sm:$0xff] %v8208_v52 }
 0x792   : > { %8564 = vst [vmem:[#allocation66_spill] sm:$0xff] %v8210_v18 }
 0x794   : > { %v4470_v43 = vpop.f32.mrf.mxu2 }
 0x795   : > { %v4471_v23 = vadd.f32 %v4470_v43, %v8053_v1  ;;  %v4559_v49 = vpop.f32.mrf.mxu3  ;;  %v4295_v35 = vpop.f32.mrf.mxu0 }
 0x796   : > { %v4296_v30 = vadd.f32 %v4295_v35, %v8042_v56  ;;  %v4384_v24 = vpop.f32.mrf.mxu1 }
 0x797   : > { %v8214_v45 = vadd.f32 %v4559_v49, %v4471_v23 }
 0x798   : > { %v8216_v27 = vadd.f32 %v4384_v24, %v4296_v30 }
 0x799   : > { %8565 = vst [vmem:[#allocation67_spill] sm:$0xff] %v8214_v45 }
 0x79a   : > { %8566 = vst [vmem:[#allocation68_spill] sm:$0xff] %v8216_v27 }
 0x79c   : > { %v4473_v26 = vpop.f32.mrf.mxu2 }
 0x79d   : > { %v4474_v57 = vadd.f32 %v4473_v26, %v8053_v1  ;;  %v4562_v46 = vpop.f32.mrf.mxu3  ;;  %v4297_v33 = vpop.f32.mrf.mxu0 }
 0x79e   : > { %v4298_v3 = vadd.f32 %v4297_v33, %v8042_v56  ;;  %v4386_v16 = vpop.f32.mrf.mxu1 }
 0x79f   : > { %v8220_v20 = vadd.f32 %v4562_v46, %v4474_v57 }
 0x7a0   : > { %v8222_v21 = vadd.f32 %v4386_v16, %v4298_v3 }
 0x7a1   : > { %8567 = vst [vmem:[#allocation69_spill] sm:$0xff] %v8220_v20 }
 0x7a2   : > { %8568 = vst [vmem:[#allocation70_spill] sm:$0xff] %v8222_v21 }
 0x7a4   : > { %v4475_v9 = vpop.f32.mrf.mxu2 }
 0x7a5   : > { %v4476_v22 = vadd.f32 %v4475_v9, %v8053_v1  ;;  %v4564_v48 = vpop.f32.mrf.mxu3  ;;  %v4300_v43 = vpop.f32.mrf.mxu0 }
 0x7a6   : > { %v4301_v23 = vadd.f32 %v4300_v43, %v8042_v56  ;;  %v4389_v49 = vpop.f32.mrf.mxu1 }
 0x7a7   : > { %v8226_v35 = vadd.f32 %v4564_v48, %v4476_v22 }
 0x7a8   : > { %v8228_v30 = vadd.f32 %v4389_v49, %v4301_v23 }
 0x7a9   : > { %8569 = vst [vmem:[#allocation71_spill] sm:$0xff] %v8226_v35 }
 0x7aa   : > { %8570 = vst [vmem:[#allocation72_spill] sm:$0xff] %v8228_v30 }
 0x7ac   : > { %v4478_v24 = vpop.f32.mrf.mxu2 }
 0x7ad   : > { %v4479_v26 = vadd.f32 %v4478_v24, %v8053_v1  ;;  %v4567_v33 = vpop.f32.mrf.mxu3  ;;  %v4302_v57 = vpop.f32.mrf.mxu0 }
 0x7ae   : > { %v4303_v46 = vadd.f32 %v4302_v57, %v8042_v56  ;;  %v4391_v3 = vpop.f32.mrf.mxu1 }
 0x7af   : > { %v8232_v16 = vadd.f32 %v4567_v33, %v4479_v26 }
 0x7b0   : > { %v8234_v9 = vadd.f32 %v4391_v3, %v4303_v46 }
 0x7b1   : > { %8571 = vst [vmem:[#allocation73_spill] sm:$0xff] %v8232_v16 }
 0x7b2   : > { %8572 = vst [vmem:[#allocation74_spill] sm:$0xff] %v8234_v9 }
 0x7b4   : > { %v4480_v21 = vpop.f32.mrf.mxu2 }
 0x7b5   : > { %v4481_v43 = vadd.f32 %v4480_v21, %v8053_v1  ;;  %v4569_v20 = vpop.f32.mrf.mxu3  ;;  %v4305_v22 = vpop.f32.mrf.mxu0 }
 0x7b6   : > { %v4306_v48 = vadd.f32 %v4305_v22, %v8042_v56  ;;  %v4394_v23 = vpop.f32.mrf.mxu1 }
 0x7b7   : > { %v8238_v49 = vadd.f32 %v4569_v20, %v4481_v43 }
 0x7b8   : > { %v8240_v24 = vadd.f32 %v4394_v23, %v4306_v48 }
 0x7b9   : > { %8573 = vst [vmem:[#allocation75_spill] sm:$0xff] %v8238_v49 }
 0x7ba   : > { %8574 = vst [vmem:[#allocation76_spill] sm:$0xff] %v8240_v24 }
 0x7bc   : > { %v4483_v30 = vpop.f32.mrf.mxu2 }
 0x7bd   : > { %v4484_v57 = vadd.f32 %v4483_v30, %v8053_v1  ;;  %v4572_v35 = vpop.f32.mrf.mxu3  ;;  %v4307_v26 = vpop.f32.mrf.mxu0 }
 0x7be   : > { %v4308_v33 = vadd.f32 %v4307_v26, %v8042_v56  ;;  %v4396_v46 = vpop.f32.mrf.mxu1 }
 0x7bf   : > { %v8244_v3 = vadd.f32 %v4572_v35, %v4484_v57 }
 0x7c0   : > { %v8246_v21 = vadd.f32 %v4396_v46, %v4308_v33 }
 0x7c1   : > { %8575 = vst [vmem:[#allocation77_spill] sm:$0xff] %v8244_v3 }
 0x7c2   : > { %8576 = vst [vmem:[#allocation78_spill] sm:$0xff] %v8246_v21 }
 0x7c4   : > { %v4485_v9 = vpop.f32.mrf.mxu2 }
 0x7c5   : > { %v4486_v22 = vadd.f32 %v4485_v9, %v8053_v1  ;;  %v4574_v16 = vpop.f32.mrf.mxu3  ;;  %v4310_v20 = vpop.f32.mrf.mxu0 }
 0x7c6   : > { %v4311_v43 = vadd.f32 %v4310_v20, %v8042_v56  ;;  %v4399_v48 = vpop.f32.mrf.mxu1 }
 0x7c7   : > { %v8250_v23 = vadd.f32 %v4574_v16, %v4486_v22 }
 0x7c8   : > { %v8252_v30 = vadd.f32 %v4399_v48, %v4311_v43 }
 0x7c9   : > { %8577 = vst [vmem:[#allocation79_spill] sm:$0xff] %v8250_v23 }
 0x7ca   : > { %8578 = vst [vmem:[#allocation80_spill] sm:$0xff] %v8252_v30 }
 0x7cc   : > { %v4488_v24 = vpop.f32.mrf.mxu2 }
 0x7cd   : > { %v4489_v26 = vadd.f32 %v4488_v24, %v8053_v1  ;;  %v4577_v49 = vpop.f32.mrf.mxu3  ;;  %v4312_v35 = vpop.f32.mrf.mxu0 }
 0x7ce   : > { %v4313_v57 = vadd.f32 %v4312_v35, %v8042_v56  ;;  %v4401_v33 = vpop.f32.mrf.mxu1 }
 0x7cf   : > { %v8256_v46 = vadd.f32 %v4577_v49, %v4489_v26 }
 0x7d0   : > { %v8258_v9 = vadd.f32 %v4401_v33, %v4313_v57 }
 0x7d1   : > { %8579 = vst [vmem:[#allocation81_spill] sm:$0xff] %v8256_v46 }
 0x7d2   : > { %8580 = vst [vmem:[#allocation82_spill] sm:$0xff] %v8258_v9 }
 0x7d4   : > { %v4490_v21 = vpop.f32.mrf.mxu2 }
 0x7d5   : > { %v4491_v20 = vadd.f32 %v4490_v21, %v8053_v1  ;;  %v4579_v3 = vpop.f32.mrf.mxu3  ;;  %v4315_v16 = vpop.f32.mrf.mxu0 }
 0x7d6   : > { %v4316_v22 = vadd.f32 %v4315_v16, %v8042_v56  ;;  %v4404_v43 = vpop.f32.mrf.mxu1 }
 0x7d7   : > { %v8262_v48 = vadd.f32 %v4579_v3, %v4491_v20 }
 0x7d8   : > { %v8264_v24 = vadd.f32 %v4404_v43, %v4316_v22 }
 0x7dc   : > { %v4493_v30 = vpop.f32.mrf.mxu2 }
 0x7dd   : > { %v4494_v35 = vadd.f32 %v4493_v30, %v8053_v1  ;;  %v4582_v23 = vpop.f32.mrf.mxu3  ;;  %v4317_v49 = vpop.f32.mrf.mxu0 }
 0x7de   : > { %v4318_v26 = vadd.f32 %v4317_v49, %v8042_v56  ;;  %v4406_v33 = vpop.f32.mrf.mxu1 }
 0x7df   : > { %v8268_v57 = vadd.f32 %v4582_v23, %v4494_v35 }
 0x7e0   : > { %v8270_v21 = vadd.f32 %v4406_v33, %v4318_v26 }
 0x7e3   : > { %4590 = sbr.rel (%p6006_p8) target bundleno = 2060 (0x80c), region = 88 }
 0x7e4   : > { %v4495_v9 = vpop.f32.mrf.mxu2 }
 0x7e5   : > { %v4496_v16 = vadd.f32 %v4495_v9, %v8053_v1  ;;  %v4584_v46 = vpop.f32.mrf.mxu3 }
 0x7e7   : > { %v8273_v3 = vadd.f32 %v4584_v46, %v4496_v16 }
 0x7e8   : > { %v4591_v30 = vmax.f32 %v8048_v28, 0.0  ;;  %v4592_v20 = vmax.f32 %v8060_v40, 0.0  ;;  %v4593_v56 = vmax.f32 %v8062_v50, 0.0  ;;  %v4594_v23 = vmax.f32 %v8066_v54, 0.0 }
 0x7e9   : > { %v4595_v22 = vmax.f32 %v8068_v14, 0.0  ;;  %v4596_v43 = vmax.f32 %v8076_v38, 0.0  ;;  %v4597_v1 = vmax.f32 %v8078_v51, 0.0  ;;  %v4598_v46 = vmax.f32 %v8082_v42, 0.0 }
 0x7ea   : > { %v4655_v9 = vpack.c.bf16 %v4592_v20, %v4591_v30  ;;  %v4656_v35 = vpack.c.bf16 %v4594_v23, %v4593_v56  ;;  %v4599_v49 = vmax.f32 %v8084_v55, 0.0  ;;  %v4600_v26 = vmax.f32 %v8092_v39, 0.0 }
 0x7eb   : > { %v4657_v33 = vpack.c.bf16 %v4596_v43, %v4595_v22  ;;  %v4658_v16 = vpack.c.bf16 %v4598_v46, %v4597_v1  ;;  %v4601_v50 = vmax.f32 %v8094_v6, 0.0  ;;  %v4602_v54 = vmax.f32 %v8098_v4, 0.0 }
 0x7ec   : > { %4689 = vst [vmem:[#allocation2] sm:$0xff] %v4655_v9  ;;  %v4659_v14 = vpack.c.bf16 %v4600_v26, %v4599_v49  ;;  %v4603_v38 = vmax.f32 %v8100_v60, 0.0  ;;  %v4604_v51 = vmax.f32 %v8108_v13, 0.0  ;;  %v4605_v42 = vmax.f32 %v8110_v37, 0.0 }
 0x7ed   : > { %4690 = vst [vmem:[#allocation2 + $0x8] sm:$0xff] %v4656_v35  ;;  %v4660_v30 = vpack.c.bf16 %v4602_v54, %v4601_v50  ;;  %v4606_v20 = vmax.f32 %v8114_v12, 0.0  ;;  %v4607_v56 = vmax.f32 %v8116_v11, 0.0  ;;  %v4608_v23 = vmax.f32 %v8124_v10, 0.0 }
 0x7ee   : > { %4691 = vst [vmem:[#allocation2 + $0x10] sm:$0xff] %v4657_v33  ;;  %v4661_v22 = vpack.c.bf16 %v4604_v51, %v4603_v38  ;;  %v4609_v43 = vmax.f32 %v8126_v31, 0.0  ;;  %v4610_v1 = vmax.f32 %v8130_v41, 0.0  ;;  %v4611_v46 = vmax.f32 %v8132_v62, 0.0 }
 0x7ef   : > { %4692 = vst [vmem:[#allocation2 + $0x18] sm:$0xff] %v4658_v16  ;;  %v4662_v9 = vpack.c.bf16 %v4606_v20, %v4605_v42  ;;  %v4612_v49 = vmax.f32 %v8140_v58, 0.0  ;;  %v4613_v50 = vmax.f32 %v8142_v29, 0.0  ;;  %v4663_v54 = vpack.c.bf16 %v4608_v23, %v4607_v56 }
 0x7f0   : > { %4693 = vst [vmem:[#allocation2 + $0x20] sm:$0xff] %v4659_v14  ;;  %v4614_v35 = vmax.f32 %v8146_v32, 0.0  ;;  %v4615_v26 = vmax.f32 %v8148_v47, 0.0  ;;  %v4616_v38 = vmax.f32 %v8156_v7, 0.0  ;;  %v4664_v51 = vpack.c.bf16 %v4610_v1, %v4609_v43 }
 0x7f1   : > { %4694 = vst [vmem:[#allocation2 + $0x28] sm:$0xff] %v4660_v30  ;;  %v4617_v33 = vmax.f32 %v8158_v63, 0.0  ;;  %v4618_v62 = vmax.f32 %v8162_v59, 0.0  ;;  %v4665_v42 = vpack.c.bf16 %v4612_v49, %v4611_v46  ;;  %v4619_v16 = vmax.f32 %v8164_v25, 0.0 }
 0x7f2   : > { %4695 = vst [vmem:[#allocation2 + $0x30] sm:$0xff] %v4661_v22  ;;  %v4620_v20 = vmax.f32 %v8172_v0, 0.0  ;;  %v4666_v14 = vpack.c.bf16 %v4614_v35, %v4613_v50  ;;  %v4621_v56 = vmax.f32 %v8174_v19, 0.0  ;;  %v4622_v23 = vmax.f32 %v8178_v44, 0.0 }
 0x7f3   : > { %4696 = vst [vmem:[#allocation2 + $0x38] sm:$0xff] %v4662_v9  ;;  %v4667_v7 = vpack.c.bf16 %v4616_v38, %v4615_v26  ;;  %v4623_v30 = vmax.f32 %v8180_v15, 0.0  ;;  %v4624_v43 = vmax.f32 %v8184_v61, 0.0  ;;  %v4668_v1 = vpack.c.bf16 %v4618_v62, %v4617_v33 }
 0x7f4   : > { %4697 = vst [vmem:[#allocation2 + $0x40] sm:$0xff] %v4663_v54  ;;  %v4625_v22 = vmax.f32 %v8186_v5, 0.0  ;;  %v4626_v46 = vmax.f32 %v8190_v17, 0.0  ;;  %v4669_v49 = vpack.c.bf16 %v4620_v20, %v4619_v16  ;;  %v4627_v9 = vmax.f32 %v8192_v36, 0.0 }
 0x7f5   : > { %4698 = vst [vmem:[#allocation2 + $0x48] sm:$0xff] %v4664_v51  ;;  %v4628_v50 = vmax.f32 %v8196_v2, 0.0  ;;  %v4670_v35 = vpack.c.bf16 %v4622_v23, %v4621_v56  ;;  %v4629_v54 = vmax.f32 %v8198_v34, 0.0  ;;  %v4630_v26 = vmax.f32 %v8202_v53, 0.0  ;;  %v8581_v56 = vld [vmem:[#allocation69_spill] sm:$0xff] }
 0x7f6   : > { %4699 = vst [vmem:[#allocation2 + $0x50] sm:$0xff] %v4665_v42  ;;  %v4671_v38 = vpack.c.bf16 %v4624_v43, %v4623_v30  ;;  %v4631_v62 = vmax.f32 %v8204_v8, 0.0  ;;  %v4632_v51 = vmax.f32 %v8208_v52, 0.0  ;;  %v4672_v33 = vpack.c.bf16 %v4626_v46, %v4625_v22  ;;  %v8583_v43 = vld [vmem:[#allocation71_spill] sm:$0xff]  ;;  %v8585_v46 = vld [vmem:[#allocation73_spill] sm:$0xff] }
 0x7f7   : > { %4700 = vst [vmem:[#allocation2 + $0x58] sm:$0xff] %v4666_v14  ;;  %v4633_v42 = vmax.f32 %v8210_v18, 0.0  ;;  %v4634_v16 = vmax.f32 %v8214_v45, 0.0  ;;  %v4673_v20 = vpack.c.bf16 %v4628_v50, %v4627_v9  ;;  %v4635_v14 = vmax.f32 %v8216_v27, 0.0  ;;  %v8587_v50 = vld [vmem:[#allocation75_spill] sm:$0xff] }
 0x7f8   : > { %4701 = vst [vmem:[#allocation2 + $0x60] sm:$0xff] %v4667_v7  ;;  %v4636_v23 = vmax.f32 %v8581_v56, 0.0  ;;  %v4674_v53 = vpack.c.bf16 %v4630_v26, %v4629_v54  ;;  %v8582_v7 = vld [vmem:[#allocation70_spill] sm:$0xff]  ;;  %v4638_v8 = vmax.f32 %v8583_v43, 0.0  ;;  %v4675_v52 = vpack.c.bf16 %v4632_v51, %v4631_v62  ;;  %v8589_v26 = vld [vmem:[#allocation77_spill] sm:$0xff]  ;;  %v8591_v51 = vld [vmem:[#allocation79_spill] sm:$0xff] }
 0x7f9   : > { %4702 = vst [vmem:[#allocation2 + $0x68] sm:$0xff] %v4668_v1  ;;  %v4637_v30 = vmax.f32 %v8582_v7, 0.0  ;;  %v8584_v1 = vld [vmem:[#allocation72_spill] sm:$0xff]  ;;  %v4640_v18 = vmax.f32 %v8585_v46, 0.0  ;;  %v4676_v45 = vpack.c.bf16 %v4634_v16, %v4633_v42  ;;  %v4642_v27 = vmax.f32 %v8587_v50, 0.0  ;;  %v8593_v16 = vld [vmem:[#allocation81_spill] sm:$0xff] }
 0x7fa   : > { %4703 = vst [vmem:[#allocation2 + $0x70] sm:$0xff] %v4669_v49  ;;  %v4639_v22 = vmax.f32 %v8584_v1, 0.0  ;;  %v8586_v49 = vld [vmem:[#allocation74_spill] sm:$0xff]  ;;  %v4677_v56 = vpack.c.bf16 %v4636_v23, %v4635_v14  ;;  %v4644_v7 = vmax.f32 %v8589_v26, 0.0  ;;  %v4646_v1 = vmax.f32 %v8591_v51, 0.0 }
 0x7fb   : > { %4704 = vst [vmem:[#allocation2 + $0x78] sm:$0xff] %v4670_v35  ;;  %v4641_v9 = vmax.f32 %v8586_v49, 0.0  ;;  %v8588_v35 = vld [vmem:[#allocation76_spill] sm:$0xff]  ;;  %v4678_v43 = vpack.c.bf16 %v4638_v8, %v4637_v30  ;;  %v4648_v49 = vmax.f32 %v8593_v16, 0.0  ;;  %v4650_v23 = vmax.f32 %v8262_v48, 0.0 }
 0x7fc   : > { %4705 = vst [vmem:[#allocation2 + $0x80] sm:$0xff] %v4671_v38  ;;  %v4643_v54 = vmax.f32 %v8588_v35, 0.0  ;;  %v8590_v38 = vld [vmem:[#allocation78_spill] sm:$0xff]  ;;  %v4679_v46 = vpack.c.bf16 %v4640_v18, %v4639_v22  ;;  %v4652_v8 = vmax.f32 %v8268_v57, 0.0  ;;  %v4654_v18 = vmax.f32 %v8273_v3, 0.0 }
 0x7fd   : > { %4706 = vst [vmem:[#allocation2 + $0x88] sm:$0xff] %v4672_v33  ;;  %v4645_v62 = vmax.f32 %v8590_v38, 0.0  ;;  %v8592_v33 = vld [vmem:[#allocation80_spill] sm:$0xff]  ;;  %v4680_v50 = vpack.c.bf16 %v4642_v27, %v4641_v9 }
 0x7fe   : > { %4707 = vst [vmem:[#allocation2 + $0x90] sm:$0xff] %v4673_v20  ;;  %v4647_v42 = vmax.f32 %v8592_v33, 0.0  ;;  %v8594_v20 = vld [vmem:[#allocation82_spill] sm:$0xff]  ;;  %v4681_v35 = vpack.c.bf16 %v4644_v7, %v4643_v54 }
 0x7ff   : > { %4708 = vst [vmem:[#allocation2 + $0x98] sm:$0xff] %v4674_v53  ;;  %v4649_v14 = vmax.f32 %v8594_v20, 0.0  ;;  %v4651_v53 = vmax.f32 %v8264_v24, 0.0  ;;  %v4682_v30 = vpack.c.bf16 %v4646_v1, %v4645_v62 }
 0x800   : > { %4709 = vst [vmem:[#allocation2 + $0xa0] sm:$0xff] %v4675_v52  ;;  %v4653_v52 = vmax.f32 %v8270_v21, 0.0  ;;  %v4683_v22 = vpack.c.bf16 %v4648_v49, %v4647_v42 }
 0x801   : > { %4710 = vst [vmem:[#allocation2 + $0xa8] sm:$0xff] %v4676_v45  ;;  %v4684_v45 = vpack.c.bf16 %v4650_v23, %v4649_v14  ;;  %v4685_v27 = vpack.c.bf16 %v4652_v8, %v4651_v53 }
 0x802   : > { %4711 = vst [vmem:[#allocation2 + $0xb0] sm:$0xff] %v4677_v56  ;;  %v4686_v9 = vpack.c.bf16 %v4654_v18, %v4653_v52 }
 0x803   : > { %4712 = vst [vmem:[#allocation2 + $0xb8] sm:$0xff] %v4678_v43 }
 0x804   : > { %4713 = vst [vmem:[#allocation2 + $0xc0] sm:$0xff] %v4679_v46 }
 0x805   : > { %4714 = vst [vmem:[#allocation2 + $0xc8] sm:$0xff] %v4680_v50 }
 0x806   : > { %4715 = vst [vmem:[#allocation2 + $0xd0] sm:$0xff] %v4681_v35 }
 0x807   : > { %4716 = vst [vmem:[#allocation2 + $0xd8] sm:$0xff] %v4682_v30 }
 0x808   : > { %4717 = vst [vmem:[#allocation2 + $0xe0] sm:$0xff] %v4683_v22 }
 0x809   : > { %4718 = vst [vmem:[#allocation2 + $0xe8] sm:$0xff] %v4684_v45 }
 0x80a   : > { %4719 = vst [vmem:[#allocation2 + $0xf0] sm:$0xff] %v4685_v27 }
 0x80b   : > { %4720 = vst [vmem:[#allocation2 + $0xf8] sm:$0xff] %v4686_v9 }
 0x80c PF: > { %p6007_p9 = scmp.ne.s32.totalorder %s6631_s24, 4 }
 0x80e   : > { %4724 = sbr.rel (%p6007_p9) target bundleno = 2101 (0x835), region = 92 }
 0x813   : > { %v4725_v56 = vpack.c.bf16 %v8060_v40, %v8048_v28  ;;  %v8595_v54 = vld [vmem:[#allocation55_spill] sm:$0xff]  ;;  %v8596_v26 = vld [vmem:[#allocation56_spill] sm:$0xff]  ;;  %v8597_v43 = vld [vmem:[#allocation57_spill] sm:$0xff]  ;;  %v4729_v33 = vpack.c.bf16 %v8092_v39, %v8084_v55  ;;  %v4730_v42 = vpack.c.bf16 %v8098_v4, %v8094_v6  ;;  %v4731_v28 = vpack.c.bf16 %v8108_v13, %v8100_v60 }
 0x814   : > { %v4726_v7 = vpack.c.bf16 %v8596_v26, %v8595_v54  ;;  %v8598_v38 = vld [vmem:[#allocation58_spill] sm:$0xff]  ;;  %v8599_v51 = vld [vmem:[#allocation59_spill] sm:$0xff]  ;;  %v8600_v1 = vld [vmem:[#allocation60_spill] sm:$0xff]  ;;  %v4732_v40 = vpack.c.bf16 %v8114_v12, %v8110_v37  ;;  %v4733_v16 = vpack.c.bf16 %v8124_v10, %v8116_v11  ;;  %v4734_v55 = vpack.c.bf16 %v8130_v41, %v8126_v31 }
 0x815   : > { %v4727_v62 = vpack.c.bf16 %v8598_v38, %v8597_v43  ;;  %v4728_v46 = vpack.c.bf16 %v8600_v1, %v8599_v51  ;;  %4759 = vst [vmem:[#allocation2] sm:$0xff] %v4725_v56  ;;  %v8601_v39 = vld [vmem:[#allocation61_spill] sm:$0xff]  ;;  %v4736_v4 = vpack.c.bf16 %v8146_v32, %v8142_v29  ;;  %v8602_v60 = vld [vmem:[#allocation62_spill] sm:$0xff]  ;;  %v4738_v37 = vpack.c.bf16 %v8162_v59, %v8158_v63  ;;  %v8604_v32 = vld [vmem:[#allocation64_spill] sm:$0xff] }
 0x816   : > { %4760 = vst [vmem:[#allocation2 + $0x8] sm:$0xff] %v4726_v7  ;;  %v4735_v6 = vpack.c.bf16 %v8140_v58, %v8601_v39  ;;  %v4737_v13 = vpack.c.bf16 %v8602_v60, %v8148_v47  ;;  %v4739_v12 = vpack.c.bf16 %v8172_v0, %v8164_v25  ;;  %v4740_v11 = vpack.c.bf16 %v8178_v44, %v8174_v19  ;;  %v8603_v58 = vld [vmem:[#allocation63_spill] sm:$0xff]  ;;  %v8605_v47 = vld [vmem:[#allocation65_spill] sm:$0xff]  ;;  %v8606_v59 = vld [vmem:[#allocation66_spill] sm:$0xff] }
 0x817   : > { %4761 = vst [vmem:[#allocation2 + $0x10] sm:$0xff] %v4727_v62  ;;  %v4741_v10 = vpack.c.bf16 %v8184_v61, %v8180_v15  ;;  %v4742_v31 = vpack.c.bf16 %v8190_v17, %v8186_v5  ;;  %v4743_v41 = vpack.c.bf16 %v8196_v2, %v8192_v36  ;;  %v4744_v29 = vpack.c.bf16 %v8603_v58, %v8198_v34  ;;  %v8607_v25 = vld [vmem:[#allocation67_spill] sm:$0xff]  ;;  %v8608_v19 = vld [vmem:[#allocation68_spill] sm:$0xff]  ;;  %v8609_v44 = vld [vmem:[#allocation69_spill] sm:$0xff] }
 0x818   : > { %4762 = vst [vmem:[#allocation2 + $0x18] sm:$0xff] %v4728_v46  ;;  %v4745_v63 = vpack.c.bf16 %v8605_v47, %v8604_v32  ;;  %v4746_v0 = vpack.c.bf16 %v8607_v25, %v8606_v59  ;;  %v4747_v15 = vpack.c.bf16 %v8609_v44, %v8608_v19  ;;  %v8610_v61 = vld [vmem:[#allocation70_spill] sm:$0xff]  ;;  %v8611_v5 = vld [vmem:[#allocation71_spill] sm:$0xff]  ;;  %v8612_v36 = vld [vmem:[#allocation72_spill] sm:$0xff]  ;;  %v4755_v9 = vpack.c.bf16 %v8268_v57, %v8264_v24 }
 0x819   : > { %4763 = vst [vmem:[#allocation2 + $0x20] sm:$0xff] %v4729_v33  ;;  %v4748_v17 = vpack.c.bf16 %v8611_v5, %v8610_v61  ;;  %v8613_v2 = vld [vmem:[#allocation73_spill] sm:$0xff]  ;;  %v8614_v49 = vld [vmem:[#allocation74_spill] sm:$0xff]  ;;  %v8615_v50 = vld [vmem:[#allocation75_spill] sm:$0xff]  ;;  %v4756_v56 = vpack.c.bf16 %v8273_v3, %v8270_v21 }
 0x81a   : > { %4764 = vst [vmem:[#allocation2 + $0x28] sm:$0xff] %v4730_v42  ;;  %v4749_v34 = vpack.c.bf16 %v8613_v2, %v8612_v36  ;;  %v4750_v20 = vpack.c.bf16 %v8615_v50, %v8614_v49  ;;  %v8616_v14 = vld [vmem:[#allocation76_spill] sm:$0xff]  ;;  %v8617_v23 = vld [vmem:[#allocation77_spill] sm:$0xff]  ;;  %v8618_v53 = vld [vmem:[#allocation78_spill] sm:$0xff] }
 0x81b   : > { %4765 = vst [vmem:[#allocation2 + $0x30] sm:$0xff] %v4731_v28  ;;  %v4751_v35 = vpack.c.bf16 %v8617_v23, %v8616_v14  ;;  %v8619_v8 = vld [vmem:[#allocation79_spill] sm:$0xff]  ;;  %v8620_v52 = vld [vmem:[#allocation80_spill] sm:$0xff]  ;;  %v8621_v18 = vld [vmem:[#allocation81_spill] sm:$0xff] }
 0x81c   : > { %4766 = vst [vmem:[#allocation2 + $0x38] sm:$0xff] %v4732_v40  ;;  %v4752_v30 = vpack.c.bf16 %v8619_v8, %v8618_v53  ;;  %v4753_v22 = vpack.c.bf16 %v8621_v18, %v8620_v52  ;;  %v8622_v45 = vld [vmem:[#allocation82_spill] sm:$0xff] }
 0x81d   : > { %4767 = vst [vmem:[#allocation2 + $0x40] sm:$0xff] %v4733_v16  ;;  %v4754_v27 = vpack.c.bf16 %v8262_v48, %v8622_v45 }
 0x81e   : > { %4768 = vst [vmem:[#allocation2 + $0x48] sm:$0xff] %v4734_v55 }
 0x81f   : > { %4769 = vst [vmem:[#allocation2 + $0x50] sm:$0xff] %v4735_v6 }
 0x820   : > { %4770 = vst [vmem:[#allocation2 + $0x58] sm:$0xff] %v4736_v4 }
 0x821   : > { %4771 = vst [vmem:[#allocation2 + $0x60] sm:$0xff] %v4737_v13 }
 0x822   : > { %4772 = vst [vmem:[#allocation2 + $0x68] sm:$0xff] %v4738_v37 }
 0x823   : > { %4773 = vst [vmem:[#allocation2 + $0x70] sm:$0xff] %v4739_v12 }
 0x824   : > { %4774 = vst [vmem:[#allocation2 + $0x78] sm:$0xff] %v4740_v11 }
 0x825   : > { %4775 = vst [vmem:[#allocation2 + $0x80] sm:$0xff] %v4741_v10 }
 0x826   : > { %4776 = vst [vmem:[#allocation2 + $0x88] sm:$0xff] %v4742_v31 }
 0x827   : > { %4777 = vst [vmem:[#allocation2 + $0x90] sm:$0xff] %v4743_v41 }
 0x828   : > { %4778 = vst [vmem:[#allocation2 + $0x98] sm:$0xff] %v4744_v29 }
 0x829   : > { %4779 = vst [vmem:[#allocation2 + $0xa0] sm:$0xff] %v4745_v63 }
 0x82a   : > { %4780 = vst [vmem:[#allocation2 + $0xa8] sm:$0xff] %v4746_v0 }
 0x82b   : > { %4781 = vst [vmem:[#allocation2 + $0xb0] sm:$0xff] %v4747_v15 }
 0x82c   : > { %4782 = vst [vmem:[#allocation2 + $0xb8] sm:$0xff] %v4748_v17 }
 0x82d   : > { %4783 = vst [vmem:[#allocation2 + $0xc0] sm:$0xff] %v4749_v34 }
 0x82e   : > { %4784 = vst [vmem:[#allocation2 + $0xc8] sm:$0xff] %v4750_v20 }
 0x82f   : > { %4785 = vst [vmem:[#allocation2 + $0xd0] sm:$0xff] %v4751_v35 }
 0x830   : > { %4786 = vst [vmem:[#allocation2 + $0xd8] sm:$0xff] %v4752_v30 }
 0x831   : > { %4787 = vst [vmem:[#allocation2 + $0xe0] sm:$0xff] %v4753_v22 }
 0x832   : > { %4788 = vst [vmem:[#allocation2 + $0xe8] sm:$0xff] %v4754_v27 }
 0x833   : > { %4789 = vst [vmem:[#allocation2 + $0xf0] sm:$0xff] %v4755_v9 }
 0x834   : > { %4790 = vst [vmem:[#allocation2 + $0xf8] sm:$0xff] %v4756_v56 }
 0x835 PF: > { %p6310_p10 = scmp.eq.s32.totalorder %s6764_s11, 4  ;;  %s4798_s8 = sshll.u32 %s8433_s6, 4  ;;  %s4799_s8 = int_to_ptr.hbm [resolvable:$true] %s4798_s8 }
 0x836   : > { %s6645_s28 = smov [#allocation13]   ;;  %s6646_s2 = smov 128  }
 0x837   : > { %s4796_s0 = sshll.u32 %s6645_s28, 4  ;;  %s6647_s4 = smov 8   ;;  %s4797_s0 = int_to_ptr.vmem [resolvable:$true] %s4796_s0 }
 0x838   : > { %6287 = dma.vmem_to_hbm [thread:$0]  (%p6310_p10), %s4797_s0, 4096, %s4799_s8, [#allocation6], %s6646_s2, %s6646_s2, %s6647_s4  }
 0x839   : > { %6614 = dma.done.wait (%p6310_p10), [#allocation6], 4096  }
 0x83a   : > { %6616 = vsyncadd (%p6310_p10), [#allocation6], 4294963200 }
 0x83b PF: > { %s24_s26 = sadd.s32 1, %s6639_s26   ;;  %s8623_s27 = sld [smem:[#allocation23_spill]] }
 0x83c   : > { %p21_p11 = scmp.ge.s32.totalorder %s24_s26, 7   ;;  %s8624_s23 = sld [smem:[#allocation26_spill]] }
 0x83d   : > { %s8625_s24 = sld [smem:[#allocation24_spill]]  ;;  %s8627_s21 = smov %s6623_s22 }
 0x83e   : > { %s8626_s25 = sld [smem:[#allocation25_spill]]  ;;  %23 = sbr.rel (!%p21_p11) target bundleno = 12 (0xc), region = 155 }
 0x841   : > { %s8628_s22 = smov %s8623_s27 }
 0x843   :  { %4815 = vsyncpa [#allocation5], 1 }
 0x844   :  { %4817 = vsyncpa [#allocation5 + $0x1], 1 }
 0x845   :  { %4818 = vsyncpa [#allocation8], 1 }
 0x846   :  { %4820 = vsyncpa [#allocation8 + $0x1], 1 }
 0x847   :  { %4821 = vsyncpa [#allocation11], 1 }
 0x848   :  { %4823 = vsyncpa [#allocation11 + $0x1], 1 }
 0x849   :  { %4824 = vsyncpa [#allocation6], 1 }
 0x84a   :  { %4826 = vsyncpa [#allocation6 + $0x1], 1 }
 0x84b   :  { %4827 = vsyncmov [#allocation3] }
 0x84e   :  { %s4828_s11 = vpop.sfrf %4827 }
 0x84f   :  { %p6012_p12 = scmp.ne.s32.totalorder %s4828_s11, 0 }
 0x851   :  { %4832 = shalt.err (%p6012_p12)  }

</bundles_post_ra>
